<compile_context>
chip_gen: v5e
topology: v5e:2x2
jax: 0.10.0
libtpu: 0.0.40
codegen_flags: <defaults>
</compile_context>

<pallas_src>
import jax
import jax.numpy as jnp
from jax.experimental import pallas as pl
from jax.experimental.pallas import tpu as pltpu


def make_stage_kernel(H, W, Cin, C0, C1, K):
    P = (K - 1) // 2
    Wp = W + 2 * P
    WC0, WC1 = W * C0, W * C1

    def dwconv_relu(pad_ref, y_pad, wd_ref, bd_ref, C, WC):
        # y_pad: (H, (W+2P)*C) in packed layout, zero halo columns already baked in by the
        # 1x1-conv weights, so only the top/bottom halo row strips need zeroing each step.
        pad_ref[0:P, :] = jnp.zeros((P, Wp * C), jnp.float32)
        pad_ref[P + H:P + H + P, :] = jnp.zeros((P, Wp * C), jnp.float32)
        pad_ref[P:P + H, :] = y_pad                       # lane-aligned full-width store

        # 25-tap shift-and-MAC; dx shifts are lane offsets (multiples of C), dy shifts are
        # sublane offsets. Weight rows are pre-tiled across W on the host: (K*K, W*C).
        acc = pad_ref[0:H, 0:WC] * wd_ref[0:1, :]
        for t in range(1, K * K):
            dy, dx = divmod(t, K)
            acc = acc + pad_ref[dy:dy + H, dx * C:dx * C + WC] * wd_ref[t:t + 1, :]
        return jnp.maximum(acc + bd_ref[...], 0.0)        # (H, W*C)

    def kernel(x_ref, w0c_ref, b0c_ref, w0d_ref, b0d_ref,
               w1a_ref, w1b_ref, b1c_ref, w1d_ref, b1d_ref,
               re_ref, ro_ref, ce_ref, co_ref,
               o_ref, pad0_ref, pad1_ref):
        x = x_ref[0]                                      # (H, W*Cin) packed

        # ---- denselayer 0: 1x1 conv (block-diag weight, MXU) + ReLU, output stays packed ----
        y0 = jnp.maximum(
            jnp.dot(x, w0c_ref[...], preferred_element_type=jnp.float32) + b0c_ref[...],
            0.0)                                          # (H, (W+2P)*C0), halo cols == 0
        # ---- denselayer 0: depthwise KxK + ReLU ----
        z0 = dwconv_relu(pad0_ref, y0, w0d_ref, b0d_ref, C0, WC0)        # (H, W*C0)

        # ---- denselayer 1: 1x1 conv over concat([x, z0], C) + ReLU ----
        # concat avoided by splitting the weight: cat(x,z0) @ W == x @ W[:Cin] + z0 @ W[Cin:]
        y1 = jnp.maximum(
            jnp.dot(x, w1a_ref[...], preferred_element_type=jnp.float32)
            + jnp.dot(z0, w1b_ref[...], preferred_element_type=jnp.float32)
            + b1c_ref[...],
            0.0)                                          # (H, (W+2P)*C1), halo cols == 0
        # ---- denselayer 1: depthwise KxK + ReLU ----
        z1 = dwconv_relu(pad1_ref, y1, w1d_ref, b1d_ref, C1, WC1)        # (H, W*C1)

        # ---- 2x2/stride-2 max pool (AdaptiveMaxPool2d(H//2) for even square inputs) ----
        # Row-pair and column-pair gathers are exact 0/1 selection matmuls on the idle MXU;
        # result is written with a single lane-dense (H//2, (W//2)*C1) store.
        r = jnp.maximum(
            jnp.dot(re_ref[...], z1, preferred_element_type=jnp.float32),
            jnp.dot(ro_ref[...], z1, preferred_element_type=jnp.float32))     # (H//2, W*C1)
        pooled = jnp.maximum(
            jnp.dot(r, ce_ref[...], preferred_element_type=jnp.float32),
            jnp.dot(r, co_ref[...], preferred_element_type=jnp.float32))      # (H//2, (W//2)*C1)
        o_ref[0] = pooled

    return kernel


def _pack_params(params, W, Cin, C0, C1, K):
    """Host-side repack of the PyTorch-style weights into the lane-packed layout."""
    P = (K - 1) // 2
    w0c, b0c, w0d, b0d, w1c, b1c, w1d, b1d = [jnp.asarray(p, jnp.float32) for p in params]

    def blockdiag_pad(w_small):
        # (a, b) -> (W*a, (W+2P)*b): block "diagonal" shifted by P so the 1x1-conv output
        # lands directly in the halo-padded packed layout with zero halo columns.
        sel = jnp.zeros((W, W + 2 * P), jnp.float32).at[
            jnp.arange(W), jnp.arange(W) + P].set(1.0)
        return jnp.kron(sel, w_small)

    def bias_pad(b_small):
        C = b_small.shape[1]
        z = jnp.zeros((1, P * C), jnp.float32)
        return jnp.concatenate([z, jnp.tile(b_small, (1, W)), z], axis=1)

    w0c_bd = blockdiag_pad(w0c)                        # (W*Cin, (W+2P)*C0)
    w1a_bd = blockdiag_pad(w1c[:Cin, :])               # (W*Cin, (W+2P)*C1)
    w1b_bd = blockdiag_pad(w1c[Cin:, :])               # (W*C0,  (W+2P)*C1)
    b0c_p = bias_pad(b0c)                              # (1, (W+2P)*C0)
    b1c_p = bias_pad(b1c)                              # (1, (W+2P)*C1)
    w0d_p = jnp.tile(w0d.reshape(K * K, C0), (1, W))   # (K*K, W*C0)
    w1d_p = jnp.tile(w1d.reshape(K * K, C1), (1, W))   # (K*K, W*C1)
    b0d_p = jnp.tile(b0d, (1, W))                      # (1, W*C0)
    b1d_p = jnp.tile(b1d, (1, W))                      # (1, W*C1)
    return w0c_bd, b0c_p, w0d_p, b0d_p, w1a_bd, w1b_bd, b1c_p, w1d_p, b1d_p


def _pool_mats(H, W, C1):
    """Exact 0/1 selection matrices for the vectorized 2x2 max pool."""
    eye_h = jnp.eye(H, dtype=jnp.float32)
    re = eye_h[0::2]                                   # (H//2, H): row i selects row 2i
    ro = eye_h[1::2]                                   # (H//2, H): row i selects row 2i+1
    out_idx = jnp.arange((W // 2) * C1)
    j = out_idx // C1
    c = out_idx % C1
    ce = jnp.zeros((W * C1, (W // 2) * C1), jnp.float32).at[
        2 * j * C1 + c, out_idx].set(1.0)              # selects even W-blocks (compacting)
    co = jnp.zeros((W * C1, (W // 2) * C1), jnp.float32).at[
        (2 * j + 1) * C1 + c, out_idx].set(1.0)        # selects odd  W-blocks (compacting)
    return re, ro, ce, co


def stage_forward(msi_nchw, params, K=5):
    B, Cin, H, W = msi_nchw.shape
    assert H == W and H % 2 == 0, "AdaptiveMaxPool2d(H//2) implemented as 2x2 pool (square, even H)"
    C0 = params[0].shape[1]
    C1 = params[4].shape[1]
    P = (K - 1) // 2
    Wp = W + 2 * P
    WC0, WC1 = W * C0, W * C1

    # NCHW -> NHWC -> packed (B, H, W*Cin); all wrapper-side plumbing is free layout work.
    x_packed = jnp.transpose(msi_nchw, (0, 2, 3, 1)).astype(jnp.float32).reshape(B, H, W * Cin)
    packed = _pack_params(params, W, Cin, C0, C1, K)
    pools = _pool_mats(H, W, C1)

    # TODO(synk): for production image sizes (H,W in the hundreds) add an H-tile grid axis
    # with a (K-1)-row halo and cap vmem_limit_bytes for v7x's 64 MiB VMEM; at the test
    # shape everything fits comfortably on all generations.
    out_packed = pl.pallas_call(
        make_stage_kernel(H, W, Cin, C0, C1, K),
        out_shape=jax.ShapeDtypeStruct((B, H // 2, (W // 2) * C1), jnp.float32),
        grid_spec=pltpu.PrefetchScalarGridSpec(
            num_scalar_prefetch=0,
            grid=(B,),
            in_specs=[
                pl.BlockSpec((1, H, W * Cin), lambda b: (b, 0, 0)),       # x (packed)
                pl.BlockSpec((W * Cin, Wp * C0), lambda b: (0, 0)),       # w0c block-diag (+halo)
                pl.BlockSpec((1, Wp * C0), lambda b: (0, 0)),             # b0c (halo-zeroed)
                pl.BlockSpec((K * K, WC0), lambda b: (0, 0)),             # w0d packed
                pl.BlockSpec((1, WC0), lambda b: (0, 0)),                 # b0d packed
                pl.BlockSpec((W * Cin, Wp * C1), lambda b: (0, 0)),       # w1c[:Cin] block-diag
                pl.BlockSpec((WC0, Wp * C1), lambda b: (0, 0)),           # w1c[Cin:] block-diag
                pl.BlockSpec((1, Wp * C1), lambda b: (0, 0)),             # b1c (halo-zeroed)
                pl.BlockSpec((K * K, WC1), lambda b: (0, 0)),             # w1d packed
                pl.BlockSpec((1, WC1), lambda b: (0, 0)),                 # b1d packed
                pl.BlockSpec((H // 2, H), lambda b: (0, 0)),              # pool row-even select
                pl.BlockSpec((H // 2, H), lambda b: (0, 0)),              # pool row-odd select
                pl.BlockSpec((WC1, (W // 2) * C1), lambda b: (0, 0)),     # pool col-even select
                pl.BlockSpec((WC1, (W // 2) * C1), lambda b: (0, 0)),     # pool col-odd select
            ],
            out_specs=pl.BlockSpec((1, H // 2, (W // 2) * C1), lambda b: (b, 0, 0)),
            scratch_shapes=[
                pltpu.VMEM((H + 2 * P, Wp * C0), jnp.float32),   # halo-padded dw scratch, layer 0
                pltpu.VMEM((H + 2 * P, Wp * C1), jnp.float32),   # halo-padded dw scratch, layer 1
            ],
        ),
        compiler_params=pltpu.CompilerParams(dimension_semantics=("parallel",)),
    )(x_packed, *packed, *pools)

    # packed (B, H//2, (W//2)*C1) -> NCHW (B, C1, H//2, W//2)
    out = out_packed.reshape(B, H // 2, W // 2, C1)
    return jnp.transpose(out, (0, 3, 1, 2))


def stage_reference(msi_nchw, params, K=5):
    """Plain-JAX reference mirroring the PyTorch module (Bn=False path)."""
    P = (K - 1) // 2
    w0c, b0c, w0d, b0d, w1c, b1c, w1d, b1d = params

    def conv1x1_relu(v, w, b):                     # v NCHW, w (Cin, Cout), b (1, Cout)
        return jnp.maximum(jnp.einsum('bchw,cd->bdhw', v, w) + b[0][None, :, None, None], 0.0)

    def dwconv_relu(v, w, b):                      # w (K, K, C), b (1, C)
        C = v.shape[1]
        wk = jnp.transpose(w, (2, 0, 1))[:, None, :, :]   # (C, 1, K, K)
        y = jax.lax.conv_general_dilated(
            v, wk, window_strides=(1, 1), padding=[(P, P), (P, P)],
            dimension_numbers=('NCHW', 'OIHW', 'NCHW'), feature_group_count=C)
        return jnp.maximum(y + b[0][None, :, None, None], 0.0)

    f1 = dwconv_relu(conv1x1_relu(msi_nchw, w0c, b0c), w0d, b0d)
    f2 = dwconv_relu(conv1x1_relu(jnp.concatenate([msi_nchw, f1], axis=1), w1c, b1c), w1d, b1d)
    B, C1, H, W = f2.shape
    return f2.reshape(B, C1, H // 2, 2, W // 2, 2).max(axis=(3, 5))


if __name__ == "__main__":
    # Small shapes: B=2, cin=4, H=W=16, cout=(8, 16), kernel_size=5
    B, Cin, H, W = 2, 4, 16, 16
    C0, C1, K = 8, 16, 5

    key = jax.random.PRNGKey(0)
    ks = jax.random.split(key, 9)

    def init(k, shape, scale):
        return (scale * jax.random.normal(k, shape)).astype(jnp.float32)

    params = (
        init(ks[0], (Cin, C0), 0.3),        # w0c : 1x1 conv weight, (cin, cout0)
        init(ks[1], (1, C0), 0.1),          # b0c
        init(ks[2], (K, K, C0), 0.2),       # w0d : depthwise weight, (K, K, cout0)
        init(ks[3], (1, C0), 0.1),          # b0d
        init(ks[4], (Cin + C0, C1), 0.3),   # w1c
        init(ks[5], (1, C1), 0.1),          # b1c
        init(ks[6], (K, K, C1), 0.2),       # w1d
        init(ks[7], (1, C1), 0.1),          # b1d
    )
    msi = jax.random.normal(ks[8], (B, Cin, H, W), jnp.float32)

    out = jax.block_until_ready(stage_forward(msi, params, K=K))
    ref = jax.block_until_ready(stage_reference(msi, params, K=K))

    assert out.shape == (B, C1, H // 2, W // 2), out.shape
    assert jnp.allclose(out, ref, rtol=1e-4, atol=1e-4), float(jnp.max(jnp.abs(out - ref)))

    # TODO(synk): BN branches (My_Bn_1 / My_Bn_2) not implemented — `stage` defaults to Bn=False.
    # TODO(synk): full SPFNet forward (stage chain + Fstage + resp.mat mixing) needs external
    # data (resp.mat); this kernel covers the `stage` building block.
    print("KERNEL_OK")
</pallas_src>

<mosaic_0001>
module attributes {stable_mosaic.version = 11 : i64} {
  func.func @kernel(%arg0: i32, %arg1: memref<1x16x64xf32, #tpu.memory_space<vmem>>, %arg2: memref<64x160xf32, #tpu.memory_space<vmem>>, %arg3: memref<1x160xf32, #tpu.memory_space<vmem>>, %arg4: memref<25x128xf32, #tpu.memory_space<vmem>>, %arg5: memref<1x128xf32, #tpu.memory_space<vmem>>, %arg6: memref<64x320xf32, #tpu.memory_space<vmem>>, %arg7: memref<128x320xf32, #tpu.memory_space<vmem>>, %arg8: memref<1x320xf32, #tpu.memory_space<vmem>>, %arg9: memref<25x256xf32, #tpu.memory_space<vmem>>, %arg10: memref<1x256xf32, #tpu.memory_space<vmem>>, %arg11: memref<8x16xf32, #tpu.memory_space<vmem>>, %arg12: memref<8x16xf32, #tpu.memory_space<vmem>>, %arg13: memref<256x128xf32, #tpu.memory_space<vmem>>, %arg14: memref<256x128xf32, #tpu.memory_space<vmem>>, %arg15: memref<1x8x128xf32, #tpu.memory_space<vmem>>, %arg16: memref<20x160xf32, #tpu.memory_space<vmem>>, %arg17: memref<20x320xf32, #tpu.memory_space<vmem>>) attributes {dimension_semantics = [#tpu.dimension_semantics<parallel>], iteration_bounds = array<i64: 2>, scalar_prefetch = 0 : i64, scratch_operands = 2 : i64, tpu.core_type = #tpu.core_type<tc>, window_params = [{transform_indices = @transform_0, window_bounds = array<i64: 1, 16, 64>}, {pipeline_mode = #tpu.pipeline_mode<synchronous>, transform_indices = @transform_1, window_bounds = array<i64: 64, 160>}, {pipeline_mode = #tpu.pipeline_mode<synchronous>, transform_indices = @transform_2, window_bounds = array<i64: 1, 160>}, {pipeline_mode = #tpu.pipeline_mode<synchronous>, transform_indices = @transform_3, window_bounds = array<i64: 25, 128>}, {pipeline_mode = #tpu.pipeline_mode<synchronous>, transform_indices = @transform_4, window_bounds = array<i64: 1, 128>}, {pipeline_mode = #tpu.pipeline_mode<synchronous>, transform_indices = @transform_5, window_bounds = array<i64: 64, 320>}, {pipeline_mode = #tpu.pipeline_mode<synchronous>, transform_indices = @transform_6, window_bounds = array<i64: 128, 320>}, {pipeline_mode = #tpu.pipeline_mode<synchronous>, transform_indices = @transform_7, window_bounds = array<i64: 1, 320>}, {pipeline_mode = #tpu.pipeline_mode<synchronous>, transform_indices = @transform_8, window_bounds = array<i64: 25, 256>}, {pipeline_mode = #tpu.pipeline_mode<synchronous>, transform_indices = @transform_9, window_bounds = array<i64: 1, 256>}, {pipeline_mode = #tpu.pipeline_mode<synchronous>, transform_indices = @transform_10, window_bounds = array<i64: 8, 16>}, {pipeline_mode = #tpu.pipeline_mode<synchronous>, transform_indices = @transform_11, window_bounds = array<i64: 8, 16>}, {pipeline_mode = #tpu.pipeline_mode<synchronous>, transform_indices = @transform_12, window_bounds = array<i64: 256, 128>}, {pipeline_mode = #tpu.pipeline_mode<synchronous>, transform_indices = @transform_13, window_bounds = array<i64: 256, 128>}, {transform_indices = @transform_14, window_bounds = array<i64: 1, 8, 128>}]} {
    %c0 = arith.constant 0 : index
    %c0_0 = arith.constant 0 : index
    %c0_1 = arith.constant 0 : index
    %0 = vector.load %arg1[%c0, %c0_0, %c0_1] : memref<1x16x64xf32, #tpu.memory_space<vmem>>, vector<1x16x64xf32>
    %1 = vector.shape_cast %0 : vector<1x16x64xf32> to vector<16x64xf32>
    %c0_2 = arith.constant 0 : index
    %c0_3 = arith.constant 0 : index
    %2 = vector.load %arg2[%c0_2, %c0_3] : memref<64x160xf32, #tpu.memory_space<vmem>>, vector<64x160xf32>
    %cst = arith.constant dense<0.000000e+00> : vector<16x160xf32>
    %3 = tpu.matmul %1, %2, %cst {dimension_numbers = #tpu.dot_dimension_numbers<[1], [0], [0], [1], [0, 0, 1, 1], [], []>} : vector<16x64xf32>, vector<64x160xf32>, vector<16x160xf32> -> vector<16x160xf32>
    %c0_4 = arith.constant 0 : index
    %c0_5 = arith.constant 0 : index
    %4 = vector.load %arg3[%c0_4, %c0_5] : memref<1x160xf32, #tpu.memory_space<vmem>>, vector<1x160xf32>
    %5 = vector.broadcast %4 : vector<1x160xf32> to vector<16x160xf32>
    %6 = arith.addf %3, %5 : vector<16x160xf32>
    %cst_6 = arith.constant 0.000000e+00 : f32
    %7 = vector.broadcast %cst_6 : f32 to vector<16x160xf32>
    %8 = arith.maximumf %6, %7 : vector<16x160xf32>
    %cst_7 = arith.constant 0.000000e+00 : f32
    %9 = vector.broadcast %cst_7 : f32 to vector<2x160xf32>
    %c0_8 = arith.constant 0 : index
    %c0_9 = arith.constant 0 : index
    %10 = vector.load %arg16[%c0_8, %c0_9] : memref<20x160xf32, #tpu.memory_space<vmem>>, vector<2x160xf32>
    tpu.vector_store %arg16[%c0_8, %c0_9], %9 {strides = array<i32>} : memref<20x160xf32, #tpu.memory_space<vmem>>, vector<2x160xf32>,
    %cst_10 = arith.constant 0.000000e+00 : f32
    %11 = vector.broadcast %cst_10 : f32 to vector<2x160xf32>
    %c18 = arith.constant 18 : index
    %c0_11 = arith.constant 0 : index
    %12 = vector.load %arg16[%c18, %c0_11] : memref<20x160xf32, #tpu.memory_space<vmem>>, vector<2x160xf32>
    tpu.vector_store %arg16[%c18, %c0_11], %11 {strides = array<i32>} : memref<20x160xf32, #tpu.memory_space<vmem>>, vector<2x160xf32>,
    %c2 = arith.constant 2 : index
    %c0_12 = arith.constant 0 : index
    %13 = vector.load %arg16[%c2, %c0_12] : memref<20x160xf32, #tpu.memory_space<vmem>>, vector<16x160xf32>
    tpu.vector_store %arg16[%c2, %c0_12], %8 {strides = array<i32>} : memref<20x160xf32, #tpu.memory_space<vmem>>, vector<16x160xf32>,
    %c0_13 = arith.constant 0 : index
    %c0_14 = arith.constant 0 : index
    %14 = vector.load %arg16[%c0_13, %c0_14] : memref<20x160xf32, #tpu.memory_space<vmem>>, vector<16x128xf32>
    %c0_15 = arith.constant 0 : index
    %c0_16 = arith.constant 0 : index
    %15 = vector.load %arg4[%c0_15, %c0_16] : memref<25x128xf32, #tpu.memory_space<vmem>>, vector<1x128xf32>
    %16 = vector.broadcast %15 : vector<1x128xf32> to vector<16x128xf32>
    %17 = arith.mulf %14, %16 : vector<16x128xf32>
    %c0_17 = arith.constant 0 : index
    %c8 = arith.constant 8 : index
    %18 = vector.load %arg16[%c0_17, %c8] : memref<20x160xf32, #tpu.memory_space<vmem>>, vector<16x128xf32>
    %c1 = arith.constant 1 : index
    %c0_18 = arith.constant 0 : index
    %19 = vector.load %arg4[%c1, %c0_18] : memref<25x128xf32, #tpu.memory_space<vmem>>, vector<1x128xf32>
    %20 = vector.broadcast %19 : vector<1x128xf32> to vector<16x128xf32>
    %21 = arith.mulf %18, %20 : vector<16x128xf32>
    %22 = arith.addf %17, %21 : vector<16x128xf32>
    %c0_19 = arith.constant 0 : index
    %c16 = arith.constant 16 : index
    %23 = vector.load %arg16[%c0_19, %c16] : memref<20x160xf32, #tpu.memory_space<vmem>>, vector<16x128xf32>
    %c2_20 = arith.constant 2 : index
    %c0_21 = arith.constant 0 : index
    %24 = vector.load %arg4[%c2_20, %c0_21] : memref<25x128xf32, #tpu.memory_space<vmem>>, vector<1x128xf32>
    %25 = vector.broadcast %24 : vector<1x128xf32> to vector<16x128xf32>
    %26 = arith.mulf %23, %25 : vector<16x128xf32>
    %27 = arith.addf %22, %26 : vector<16x128xf32>
    %c0_22 = arith.constant 0 : index
    %c24 = arith.constant 24 : index
    %28 = vector.load %arg16[%c0_22, %c24] : memref<20x160xf32, #tpu.memory_space<vmem>>, vector<16x128xf32>
    %c3 = arith.constant 3 : index
    %c0_23 = arith.constant 0 : index
    %29 = vector.load %arg4[%c3, %c0_23] : memref<25x128xf32, #tpu.memory_space<vmem>>, vector<1x128xf32>
    %30 = vector.broadcast %29 : vector<1x128xf32> to vector<16x128xf32>
    %31 = arith.mulf %28, %30 : vector<16x128xf32>
    %32 = arith.addf %27, %31 : vector<16x128xf32>
    %c0_24 = arith.constant 0 : index
    %c32 = arith.constant 32 : index
    %33 = vector.load %arg16[%c0_24, %c32] : memref<20x160xf32, #tpu.memory_space<vmem>>, vector<16x128xf32>
    %c4 = arith.constant 4 : index
    %c0_25 = arith.constant 0 : index
    %34 = vector.load %arg4[%c4, %c0_25] : memref<25x128xf32, #tpu.memory_space<vmem>>, vector<1x128xf32>
    %35 = vector.broadcast %34 : vector<1x128xf32> to vector<16x128xf32>
    %36 = arith.mulf %33, %35 : vector<16x128xf32>
    %37 = arith.addf %32, %36 : vector<16x128xf32>
    %c1_26 = arith.constant 1 : index
    %c0_27 = arith.constant 0 : index
    %38 = vector.load %arg16[%c1_26, %c0_27] : memref<20x160xf32, #tpu.memory_space<vmem>>, vector<16x128xf32>
    %c5 = arith.constant 5 : index
    %c0_28 = arith.constant 0 : index
    %39 = vector.load %arg4[%c5, %c0_28] : memref<25x128xf32, #tpu.memory_space<vmem>>, vector<1x128xf32>
    %40 = vector.broadcast %39 : vector<1x128xf32> to vector<16x128xf32>
    %41 = arith.mulf %38, %40 : vector<16x128xf32>
    %42 = arith.addf %37, %41 : vector<16x128xf32>
    %c1_29 = arith.constant 1 : index
    %c8_30 = arith.constant 8 : index
    %43 = vector.load %arg16[%c1_29, %c8_30] : memref<20x160xf32, #tpu.memory_space<vmem>>, vector<16x128xf32>
    %c6 = arith.constant 6 : index
    %c0_31 = arith.constant 0 : index
    %44 = vector.load %arg4[%c6, %c0_31] : memref<25x128xf32, #tpu.memory_space<vmem>>, vector<1x128xf32>
    %45 = vector.broadcast %44 : vector<1x128xf32> to vector<16x128xf32>
    %46 = arith.mulf %43, %45 : vector<16x128xf32>
    %47 = arith.addf %42, %46 : vector<16x128xf32>
    %c1_32 = arith.constant 1 : index
    %c16_33 = arith.constant 16 : index
    %48 = vector.load %arg16[%c1_32, %c16_33] : memref<20x160xf32, #tpu.memory_space<vmem>>, vector<16x128xf32>
    %c7 = arith.constant 7 : index
    %c0_34 = arith.constant 0 : index
    %49 = vector.load %arg4[%c7, %c0_34] : memref<25x128xf32, #tpu.memory_space<vmem>>, vector<1x128xf32>
    %50 = vector.broadcast %49 : vector<1x128xf32> to vector<16x128xf32>
    %51 = arith.mulf %48, %50 : vector<16x128xf32>
    %52 = arith.addf %47, %51 : vector<16x128xf32>
    %c1_35 = arith.constant 1 : index
    %c24_36 = arith.constant 24 : index
    %53 = vector.load %arg16[%c1_35, %c24_36] : memref<20x160xf32, #tpu.memory_space<vmem>>, vector<16x128xf32>
    %c8_37 = arith.constant 8 : index
    %c0_38 = arith.constant 0 : index
    %54 = vector.load %arg4[%c8_37, %c0_38] : memref<25x128xf32, #tpu.memory_space<vmem>>, vector<1x128xf32>
    %55 = vector.broadcast %54 : vector<1x128xf32> to vector<16x128xf32>
    %56 = arith.mulf %53, %55 : vector<16x128xf32>
    %57 = arith.addf %52, %56 : vector<16x128xf32>
    %c1_39 = arith.constant 1 : index
    %c32_40 = arith.constant 32 : index
    %58 = vector.load %arg16[%c1_39, %c32_40] : memref<20x160xf32, #tpu.memory_space<vmem>>, vector<16x128xf32>
    %c9 = arith.constant 9 : index
    %c0_41 = arith.constant 0 : index
    %59 = vector.load %arg4[%c9, %c0_41] : memref<25x128xf32, #tpu.memory_space<vmem>>, vector<1x128xf32>
    %60 = vector.broadcast %59 : vector<1x128xf32> to vector<16x128xf32>
    %61 = arith.mulf %58, %60 : vector<16x128xf32>
    %62 = arith.addf %57, %61 : vector<16x128xf32>
    %c2_42 = arith.constant 2 : index
    %c0_43 = arith.constant 0 : index
    %63 = vector.load %arg16[%c2_42, %c0_43] : memref<20x160xf32, #tpu.memory_space<vmem>>, vector<16x128xf32>
    %c10 = arith.constant 10 : index
    %c0_44 = arith.constant 0 : index
    %64 = vector.load %arg4[%c10, %c0_44] : memref<25x128xf32, #tpu.memory_space<vmem>>, vector<1x128xf32>
    %65 = vector.broadcast %64 : vector<1x128xf32> to vector<16x128xf32>
    %66 = arith.mulf %63, %65 : vector<16x128xf32>
    %67 = arith.addf %62, %66 : vector<16x128xf32>
    %c2_45 = arith.constant 2 : index
    %c8_46 = arith.constant 8 : index
    %68 = vector.load %arg16[%c2_45, %c8_46] : memref<20x160xf32, #tpu.memory_space<vmem>>, vector<16x128xf32>
    %c11 = arith.constant 11 : index
    %c0_47 = arith.constant 0 : index
    %69 = vector.load %arg4[%c11, %c0_47] : memref<25x128xf32, #tpu.memory_space<vmem>>, vector<1x128xf32>
    %70 = vector.broadcast %69 : vector<1x128xf32> to vector<16x128xf32>
    %71 = arith.mulf %68, %70 : vector<16x128xf32>
    %72 = arith.addf %67, %71 : vector<16x128xf32>
    %c2_48 = arith.constant 2 : index
    %c16_49 = arith.constant 16 : index
    %73 = vector.load %arg16[%c2_48, %c16_49] : memref<20x160xf32, #tpu.memory_space<vmem>>, vector<16x128xf32>
    %c12 = arith.constant 12 : index
    %c0_50 = arith.constant 0 : index
    %74 = vector.load %arg4[%c12, %c0_50] : memref<25x128xf32, #tpu.memory_space<vmem>>, vector<1x128xf32>
    %75 = vector.broadcast %74 : vector<1x128xf32> to vector<16x128xf32>
    %76 = arith.mulf %73, %75 : vector<16x128xf32>
    %77 = arith.addf %72, %76 : vector<16x128xf32>
    %c2_51 = arith.constant 2 : index
    %c24_52 = arith.constant 24 : index
    %78 = vector.load %arg16[%c2_51, %c24_52] : memref<20x160xf32, #tpu.memory_space<vmem>>, vector<16x128xf32>
    %c13 = arith.constant 13 : index
    %c0_53 = arith.constant 0 : index
    %79 = vector.load %arg4[%c13, %c0_53] : memref<25x128xf32, #tpu.memory_space<vmem>>, vector<1x128xf32>
    %80 = vector.broadcast %79 : vector<1x128xf32> to vector<16x128xf32>
    %81 = arith.mulf %78, %80 : vector<16x128xf32>
    %82 = arith.addf %77, %81 : vector<16x128xf32>
    %c2_54 = arith.constant 2 : index
    %c32_55 = arith.constant 32 : index
    %83 = vector.load %arg16[%c2_54, %c32_55] : memref<20x160xf32, #tpu.memory_space<vmem>>, vector<16x128xf32>
    %c14 = arith.constant 14 : index
    %c0_56 = arith.constant 0 : index
    %84 = vector.load %arg4[%c14, %c0_56] : memref<25x128xf32, #tpu.memory_space<vmem>>, vector<1x128xf32>
    %85 = vector.broadcast %84 : vector<1x128xf32> to vector<16x128xf32>
    %86 = arith.mulf %83, %85 : vector<16x128xf32>
    %87 = arith.addf %82, %86 : vector<16x128xf32>
    %c3_57 = arith.constant 3 : index
    %c0_58 = arith.constant 0 : index
    %88 = vector.load %arg16[%c3_57, %c0_58] : memref<20x160xf32, #tpu.memory_space<vmem>>, vector<16x128xf32>
    %c15 = arith.constant 15 : index
    %c0_59 = arith.constant 0 : index
    %89 = vector.load %arg4[%c15, %c0_59] : memref<25x128xf32, #tpu.memory_space<vmem>>, vector<1x128xf32>
    %90 = vector.broadcast %89 : vector<1x128xf32> to vector<16x128xf32>
    %91 = arith.mulf %88, %90 : vector<16x128xf32>
    %92 = arith.addf %87, %91 : vector<16x128xf32>
    %c3_60 = arith.constant 3 : index
    %c8_61 = arith.constant 8 : index
    %93 = vector.load %arg16[%c3_60, %c8_61] : memref<20x160xf32, #tpu.memory_space<vmem>>, vector<16x128xf32>
    %c16_62 = arith.constant 16 : index
    %c0_63 = arith.constant 0 : index
    %94 = vector.load %arg4[%c16_62, %c0_63] : memref<25x128xf32, #tpu.memory_space<vmem>>, vector<1x128xf32>
    %95 = vector.broadcast %94 : vector<1x128xf32> to vector<16x128xf32>
    %96 = arith.mulf %93, %95 : vector<16x128xf32>
    %97 = arith.addf %92, %96 : vector<16x128xf32>
    %c3_64 = arith.constant 3 : index
    %c16_65 = arith.constant 16 : index
    %98 = vector.load %arg16[%c3_64, %c16_65] : memref<20x160xf32, #tpu.memory_space<vmem>>, vector<16x128xf32>
    %c17 = arith.constant 17 : index
    %c0_66 = arith.constant 0 : index
    %99 = vector.load %arg4[%c17, %c0_66] : memref<25x128xf32, #tpu.memory_space<vmem>>, vector<1x128xf32>
    %100 = vector.broadcast %99 : vector<1x128xf32> to vector<16x128xf32>
    %101 = arith.mulf %98, %100 : vector<16x128xf32>
    %102 = arith.addf %97, %101 : vector<16x128xf32>
    %c3_67 = arith.constant 3 : index
    %c24_68 = arith.constant 24 : index
    %103 = vector.load %arg16[%c3_67, %c24_68] : memref<20x160xf32, #tpu.memory_space<vmem>>, vector<16x128xf32>
    %c18_69 = arith.constant 18 : index
    %c0_70 = arith.constant 0 : index
    %104 = vector.load %arg4[%c18_69, %c0_70] : memref<25x128xf32, #tpu.memory_space<vmem>>, vector<1x128xf32>
    %105 = vector.broadcast %104 : vector<1x128xf32> to vector<16x128xf32>
    %106 = arith.mulf %103, %105 : vector<16x128xf32>
    %107 = arith.addf %102, %106 : vector<16x128xf32>
    %c3_71 = arith.constant 3 : index
    %c32_72 = arith.constant 32 : index
    %108 = vector.load %arg16[%c3_71, %c32_72] : memref<20x160xf32, #tpu.memory_space<vmem>>, vector<16x128xf32>
    %c19 = arith.constant 19 : index
    %c0_73 = arith.constant 0 : index
    %109 = vector.load %arg4[%c19, %c0_73] : memref<25x128xf32, #tpu.memory_space<vmem>>, vector<1x128xf32>
    %110 = vector.broadcast %109 : vector<1x128xf32> to vector<16x128xf32>
    %111 = arith.mulf %108, %110 : vector<16x128xf32>
    %112 = arith.addf %107, %111 : vector<16x128xf32>
    %c4_74 = arith.constant 4 : index
    %c0_75 = arith.constant 0 : index
    %113 = vector.load %arg16[%c4_74, %c0_75] : memref<20x160xf32, #tpu.memory_space<vmem>>, vector<16x128xf32>
    %c20 = arith.constant 20 : index
    %c0_76 = arith.constant 0 : index
    %114 = vector.load %arg4[%c20, %c0_76] : memref<25x128xf32, #tpu.memory_space<vmem>>, vector<1x128xf32>
    %115 = vector.broadcast %114 : vector<1x128xf32> to vector<16x128xf32>
    %116 = arith.mulf %113, %115 : vector<16x128xf32>
    %117 = arith.addf %112, %116 : vector<16x128xf32>
    %c4_77 = arith.constant 4 : index
    %c8_78 = arith.constant 8 : index
    %118 = vector.load %arg16[%c4_77, %c8_78] : memref<20x160xf32, #tpu.memory_space<vmem>>, vector<16x128xf32>
    %c21 = arith.constant 21 : index
    %c0_79 = arith.constant 0 : index
    %119 = vector.load %arg4[%c21, %c0_79] : memref<25x128xf32, #tpu.memory_space<vmem>>, vector<1x128xf32>
    %120 = vector.broadcast %119 : vector<1x128xf32> to vector<16x128xf32>
    %121 = arith.mulf %118, %120 : vector<16x128xf32>
    %122 = arith.addf %117, %121 : vector<16x128xf32>
    %c4_80 = arith.constant 4 : index
    %c16_81 = arith.constant 16 : index
    %123 = vector.load %arg16[%c4_80, %c16_81] : memref<20x160xf32, #tpu.memory_space<vmem>>, vector<16x128xf32>
    %c22 = arith.constant 22 : index
    %c0_82 = arith.constant 0 : index
    %124 = vector.load %arg4[%c22, %c0_82] : memref<25x128xf32, #tpu.memory_space<vmem>>, vector<1x128xf32>
    %125 = vector.broadcast %124 : vector<1x128xf32> to vector<16x128xf32>
    %126 = arith.mulf %123, %125 : vector<16x128xf32>
    %127 = arith.addf %122, %126 : vector<16x128xf32>
    %c4_83 = arith.constant 4 : index
    %c24_84 = arith.constant 24 : index
    %128 = vector.load %arg16[%c4_83, %c24_84] : memref<20x160xf32, #tpu.memory_space<vmem>>, vector<16x128xf32>
    %c23 = arith.constant 23 : index
    %c0_85 = arith.constant 0 : index
    %129 = vector.load %arg4[%c23, %c0_85] : memref<25x128xf32, #tpu.memory_space<vmem>>, vector<1x128xf32>
    %130 = vector.broadcast %129 : vector<1x128xf32> to vector<16x128xf32>
    %131 = arith.mulf %128, %130 : vector<16x128xf32>
    %132 = arith.addf %127, %131 : vector<16x128xf32>
    %c4_86 = arith.constant 4 : index
    %c32_87 = arith.constant 32 : index
    %133 = vector.load %arg16[%c4_86, %c32_87] : memref<20x160xf32, #tpu.memory_space<vmem>>, vector<16x128xf32>
    %c24_88 = arith.constant 24 : index
    %c0_89 = arith.constant 0 : index
    %134 = vector.load %arg4[%c24_88, %c0_89] : memref<25x128xf32, #tpu.memory_space<vmem>>, vector<1x128xf32>
    %135 = vector.broadcast %134 : vector<1x128xf32> to vector<16x128xf32>
    %136 = arith.mulf %133, %135 : vector<16x128xf32>
    %137 = arith.addf %132, %136 : vector<16x128xf32>
    %c0_90 = arith.constant 0 : index
    %c0_91 = arith.constant 0 : index
    %138 = vector.load %arg5[%c0_90, %c0_91] : memref<1x128xf32, #tpu.memory_space<vmem>>, vector<1x128xf32>
    %139 = vector.broadcast %138 : vector<1x128xf32> to vector<16x128xf32>
    %140 = arith.addf %137, %139 : vector<16x128xf32>
    %cst_92 = arith.constant 0.000000e+00 : f32
    %141 = vector.broadcast %cst_92 : f32 to vector<16x128xf32>
    %142 = arith.maximumf %140, %141 : vector<16x128xf32>
    %c0_93 = arith.constant 0 : index
    %c0_94 = arith.constant 0 : index
    %143 = vector.load %arg6[%c0_93, %c0_94] : memref<64x320xf32, #tpu.memory_space<vmem>>, vector<64x320xf32>
    %cst_95 = arith.constant dense<0.000000e+00> : vector<16x320xf32>
    %144 = tpu.matmul %1, %143, %cst_95 {dimension_numbers = #tpu.dot_dimension_numbers<[1], [0], [0], [1], [0, 0, 1, 1], [], []>} : vector<16x64xf32>, vector<64x320xf32>, vector<16x320xf32> -> vector<16x320xf32>
    %c0_96 = arith.constant 0 : index
    %c0_97 = arith.constant 0 : index
    %145 = vector.load %arg7[%c0_96, %c0_97] : memref<128x320xf32, #tpu.memory_space<vmem>>, vector<128x320xf32>
    %cst_98 = arith.constant dense<0.000000e+00> : vector<16x320xf32>
    %146 = tpu.matmul %142, %145, %cst_98 {dimension_numbers = #tpu.dot_dimension_numbers<[1], [0], [0], [1], [0, 0, 1, 1], [], []>} : vector<16x128xf32>, vector<128x320xf32>, vector<16x320xf32> -> vector<16x320xf32>
    %147 = arith.addf %144, %146 : vector<16x320xf32>
    %c0_99 = arith.constant 0 : index
    %c0_100 = arith.constant 0 : index
    %148 = vector.load %arg8[%c0_99, %c0_100] : memref<1x320xf32, #tpu.memory_space<vmem>>, vector<1x320xf32>
    %149 = vector.broadcast %148 : vector<1x320xf32> to vector<16x320xf32>
    %150 = arith.addf %147, %149 : vector<16x320xf32>
    %cst_101 = arith.constant 0.000000e+00 : f32
    %151 = vector.broadcast %cst_101 : f32 to vector<16x320xf32>
    %152 = arith.maximumf %150, %151 : vector<16x320xf32>
    %cst_102 = arith.constant 0.000000e+00 : f32
    %153 = vector.broadcast %cst_102 : f32 to vector<2x320xf32>
    %c0_103 = arith.constant 0 : index
    %c0_104 = arith.constant 0 : index
    %154 = vector.load %arg17[%c0_103, %c0_104] : memref<20x320xf32, #tpu.memory_space<vmem>>, vector<2x320xf32>
    tpu.vector_store %arg17[%c0_103, %c0_104], %153 {strides = array<i32>} : memref<20x320xf32, #tpu.memory_space<vmem>>, vector<2x320xf32>,
    %cst_105 = arith.constant 0.000000e+00 : f32
    %155 = vector.broadcast %cst_105 : f32 to vector<2x320xf32>
    %c18_106 = arith.constant 18 : index
    %c0_107 = arith.constant 0 : index
    %156 = vector.load %arg17[%c18_106, %c0_107] : memref<20x320xf32, #tpu.memory_space<vmem>>, vector<2x320xf32>
    tpu.vector_store %arg17[%c18_106, %c0_107], %155 {strides = array<i32>} : memref<20x320xf32, #tpu.memory_space<vmem>>, vector<2x320xf32>,
    %c2_108 = arith.constant 2 : index
    %c0_109 = arith.constant 0 : index
    %157 = vector.load %arg17[%c2_108, %c0_109] : memref<20x320xf32, #tpu.memory_space<vmem>>, vector<16x320xf32>
    tpu.vector_store %arg17[%c2_108, %c0_109], %152 {strides = array<i32>} : memref<20x320xf32, #tpu.memory_space<vmem>>, vector<16x320xf32>,
    %c0_110 = arith.constant 0 : index
    %c0_111 = arith.constant 0 : index
    %158 = vector.load %arg17[%c0_110, %c0_111] : memref<20x320xf32, #tpu.memory_space<vmem>>, vector<16x256xf32>
    %c0_112 = arith.constant 0 : index
    %c0_113 = arith.constant 0 : index
    %159 = vector.load %arg9[%c0_112, %c0_113] : memref<25x256xf32, #tpu.memory_space<vmem>>, vector<1x256xf32>
    %160 = vector.broadcast %159 : vector<1x256xf32> to vector<16x256xf32>
    %161 = arith.mulf %158, %160 : vector<16x256xf32>
    %c0_114 = arith.constant 0 : index
    %c16_115 = arith.constant 16 : index
    %162 = vector.load %arg17[%c0_114, %c16_115] : memref<20x320xf32, #tpu.memory_space<vmem>>, vector<16x256xf32>
    %c1_116 = arith.constant 1 : index
    %c0_117 = arith.constant 0 : index
    %163 = vector.load %arg9[%c1_116, %c0_117] : memref<25x256xf32, #tpu.memory_space<vmem>>, vector<1x256xf32>
    %164 = vector.broadcast %163 : vector<1x256xf32> to vector<16x256xf32>
    %165 = arith.mulf %162, %164 : vector<16x256xf32>
    %166 = arith.addf %161, %165 : vector<16x256xf32>
    %c0_118 = arith.constant 0 : index
    %c32_119 = arith.constant 32 : index
    %167 = vector.load %arg17[%c0_118, %c32_119] : memref<20x320xf32, #tpu.memory_space<vmem>>, vector<16x256xf32>
    %c2_120 = arith.constant 2 : index
    %c0_121 = arith.constant 0 : index
    %168 = vector.load %arg9[%c2_120, %c0_121] : memref<25x256xf32, #tpu.memory_space<vmem>>, vector<1x256xf32>
    %169 = vector.broadcast %168 : vector<1x256xf32> to vector<16x256xf32>
    %170 = arith.mulf %167, %169 : vector<16x256xf32>
    %171 = arith.addf %166, %170 : vector<16x256xf32>
    %c0_122 = arith.constant 0 : index
    %c48 = arith.constant 48 : index
    %172 = vector.load %arg17[%c0_122, %c48] : memref<20x320xf32, #tpu.memory_space<vmem>>, vector<16x256xf32>
    %c3_123 = arith.constant 3 : index
    %c0_124 = arith.constant 0 : index
    %173 = vector.load %arg9[%c3_123, %c0_124] : memref<25x256xf32, #tpu.memory_space<vmem>>, vector<1x256xf32>
    %174 = vector.broadcast %173 : vector<1x256xf32> to vector<16x256xf32>
    %175 = arith.mulf %172, %174 : vector<16x256xf32>
    %176 = arith.addf %171, %175 : vector<16x256xf32>
    %c0_125 = arith.constant 0 : index
    %c64 = arith.constant 64 : index
    %177 = vector.load %arg17[%c0_125, %c64] : memref<20x320xf32, #tpu.memory_space<vmem>>, vector<16x256xf32>
    %c4_126 = arith.constant 4 : index
    %c0_127 = arith.constant 0 : index
    %178 = vector.load %arg9[%c4_126, %c0_127] : memref<25x256xf32, #tpu.memory_space<vmem>>, vector<1x256xf32>
    %179 = vector.broadcast %178 : vector<1x256xf32> to vector<16x256xf32>
    %180 = arith.mulf %177, %179 : vector<16x256xf32>
    %181 = arith.addf %176, %180 : vector<16x256xf32>
    %c1_128 = arith.constant 1 : index
    %c0_129 = arith.constant 0 : index
    %182 = vector.load %arg17[%c1_128, %c0_129] : memref<20x320xf32, #tpu.memory_space<vmem>>, vector<16x256xf32>
    %c5_130 = arith.constant 5 : index
    %c0_131 = arith.constant 0 : index
    %183 = vector.load %arg9[%c5_130, %c0_131] : memref<25x256xf32, #tpu.memory_space<vmem>>, vector<1x256xf32>
    %184 = vector.broadcast %183 : vector<1x256xf32> to vector<16x256xf32>
    %185 = arith.mulf %182, %184 : vector<16x256xf32>
    %186 = arith.addf %181, %185 : vector<16x256xf32>
    %c1_132 = arith.constant 1 : index
    %c16_133 = arith.constant 16 : index
    %187 = vector.load %arg17[%c1_132, %c16_133] : memref<20x320xf32, #tpu.memory_space<vmem>>, vector<16x256xf32>
    %c6_134 = arith.constant 6 : index
    %c0_135 = arith.constant 0 : index
    %188 = vector.load %arg9[%c6_134, %c0_135] : memref<25x256xf32, #tpu.memory_space<vmem>>, vector<1x256xf32>
    %189 = vector.broadcast %188 : vector<1x256xf32> to vector<16x256xf32>
    %190 = arith.mulf %187, %189 : vector<16x256xf32>
    %191 = arith.addf %186, %190 : vector<16x256xf32>
    %c1_136 = arith.constant 1 : index
    %c32_137 = arith.constant 32 : index
    %192 = vector.load %arg17[%c1_136, %c32_137] : memref<20x320xf32, #tpu.memory_space<vmem>>, vector<16x256xf32>
    %c7_138 = arith.constant 7 : index
    %c0_139 = arith.constant 0 : index
    %193 = vector.load %arg9[%c7_138, %c0_139] : memref<25x256xf32, #tpu.memory_space<vmem>>, vector<1x256xf32>
    %194 = vector.broadcast %193 : vector<1x256xf32> to vector<16x256xf32>
    %195 = arith.mulf %192, %194 : vector<16x256xf32>
    %196 = arith.addf %191, %195 : vector<16x256xf32>
    %c1_140 = arith.constant 1 : index
    %c48_141 = arith.constant 48 : index
    %197 = vector.load %arg17[%c1_140, %c48_141] : memref<20x320xf32, #tpu.memory_space<vmem>>, vector<16x256xf32>
    %c8_142 = arith.constant 8 : index
    %c0_143 = arith.constant 0 : index
    %198 = vector.load %arg9[%c8_142, %c0_143] : memref<25x256xf32, #tpu.memory_space<vmem>>, vector<1x256xf32>
    %199 = vector.broadcast %198 : vector<1x256xf32> to vector<16x256xf32>
    %200 = arith.mulf %197, %199 : vector<16x256xf32>
    %201 = arith.addf %196, %200 : vector<16x256xf32>
    %c1_144 = arith.constant 1 : index
    %c64_145 = arith.constant 64 : index
    %202 = vector.load %arg17[%c1_144, %c64_145] : memref<20x320xf32, #tpu.memory_space<vmem>>, vector<16x256xf32>
    %c9_146 = arith.constant 9 : index
    %c0_147 = arith.constant 0 : index
    %203 = vector.load %arg9[%c9_146, %c0_147] : memref<25x256xf32, #tpu.memory_space<vmem>>, vector<1x256xf32>
    %204 = vector.broadcast %203 : vector<1x256xf32> to vector<16x256xf32>
    %205 = arith.mulf %202, %204 : vector<16x256xf32>
    %206 = arith.addf %201, %205 : vector<16x256xf32>
    %c2_148 = arith.constant 2 : index
    %c0_149 = arith.constant 0 : index
    %207 = vector.load %arg17[%c2_148, %c0_149] : memref<20x320xf32, #tpu.memory_space<vmem>>, vector<16x256xf32>
    %c10_150 = arith.constant 10 : index
    %c0_151 = arith.constant 0 : index
    %208 = vector.load %arg9[%c10_150, %c0_151] : memref<25x256xf32, #tpu.memory_space<vmem>>, vector<1x256xf32>
    %209 = vector.broadcast %208 : vector<1x256xf32> to vector<16x256xf32>
    %210 = arith.mulf %207, %209 : vector<16x256xf32>
    %211 = arith.addf %206, %210 : vector<16x256xf32>
    %c2_152 = arith.constant 2 : index
    %c16_153 = arith.constant 16 : index
    %212 = vector.load %arg17[%c2_152, %c16_153] : memref<20x320xf32, #tpu.memory_space<vmem>>, vector<16x256xf32>
    %c11_154 = arith.constant 11 : index
    %c0_155 = arith.constant 0 : index
    %213 = vector.load %arg9[%c11_154, %c0_155] : memref<25x256xf32, #tpu.memory_space<vmem>>, vector<1x256xf32>
    %214 = vector.broadcast %213 : vector<1x256xf32> to vector<16x256xf32>
    %215 = arith.mulf %212, %214 : vector<16x256xf32>
    %216 = arith.addf %211, %215 : vector<16x256xf32>
    %c2_156 = arith.constant 2 : index
    %c32_157 = arith.constant 32 : index
    %217 = vector.load %arg17[%c2_156, %c32_157] : memref<20x320xf32, #tpu.memory_space<vmem>>, vector<16x256xf32>
    %c12_158 = arith.constant 12 : index
    %c0_159 = arith.constant 0 : index
    %218 = vector.load %arg9[%c12_158, %c0_159] : memref<25x256xf32, #tpu.memory_space<vmem>>, vector<1x256xf32>
    %219 = vector.broadcast %218 : vector<1x256xf32> to vector<16x256xf32>
    %220 = arith.mulf %217, %219 : vector<16x256xf32>
    %221 = arith.addf %216, %220 : vector<16x256xf32>
    %c2_160 = arith.constant 2 : index
    %c48_161 = arith.constant 48 : index
    %222 = vector.load %arg17[%c2_160, %c48_161] : memref<20x320xf32, #tpu.memory_space<vmem>>, vector<16x256xf32>
    %c13_162 = arith.constant 13 : index
    %c0_163 = arith.constant 0 : index
    %223 = vector.load %arg9[%c13_162, %c0_163] : memref<25x256xf32, #tpu.memory_space<vmem>>, vector<1x256xf32>
    %224 = vector.broadcast %223 : vector<1x256xf32> to vector<16x256xf32>
    %225 = arith.mulf %222, %224 : vector<16x256xf32>
    %226 = arith.addf %221, %225 : vector<16x256xf32>
    %c2_164 = arith.constant 2 : index
    %c64_165 = arith.constant 64 : index
    %227 = vector.load %arg17[%c2_164, %c64_165] : memref<20x320xf32, #tpu.memory_space<vmem>>, vector<16x256xf32>
    %c14_166 = arith.constant 14 : index
    %c0_167 = arith.constant 0 : index
    %228 = vector.load %arg9[%c14_166, %c0_167] : memref<25x256xf32, #tpu.memory_space<vmem>>, vector<1x256xf32>
    %229 = vector.broadcast %228 : vector<1x256xf32> to vector<16x256xf32>
    %230 = arith.mulf %227, %229 : vector<16x256xf32>
    %231 = arith.addf %226, %230 : vector<16x256xf32>
    %c3_168 = arith.constant 3 : index
    %c0_169 = arith.constant 0 : index
    %232 = vector.load %arg17[%c3_168, %c0_169] : memref<20x320xf32, #tpu.memory_space<vmem>>, vector<16x256xf32>
    %c15_170 = arith.constant 15 : index
    %c0_171 = arith.constant 0 : index
    %233 = vector.load %arg9[%c15_170, %c0_171] : memref<25x256xf32, #tpu.memory_space<vmem>>, vector<1x256xf32>
    %234 = vector.broadcast %233 : vector<1x256xf32> to vector<16x256xf32>
    %235 = arith.mulf %232, %234 : vector<16x256xf32>
    %236 = arith.addf %231, %235 : vector<16x256xf32>
    %c3_172 = arith.constant 3 : index
    %c16_173 = arith.constant 16 : index
    %237 = vector.load %arg17[%c3_172, %c16_173] : memref<20x320xf32, #tpu.memory_space<vmem>>, vector<16x256xf32>
    %c16_174 = arith.constant 16 : index
    %c0_175 = arith.constant 0 : index
    %238 = vector.load %arg9[%c16_174, %c0_175] : memref<25x256xf32, #tpu.memory_space<vmem>>, vector<1x256xf32>
    %239 = vector.broadcast %238 : vector<1x256xf32> to vector<16x256xf32>
    %240 = arith.mulf %237, %239 : vector<16x256xf32>
    %241 = arith.addf %236, %240 : vector<16x256xf32>
    %c3_176 = arith.constant 3 : index
    %c32_177 = arith.constant 32 : index
    %242 = vector.load %arg17[%c3_176, %c32_177] : memref<20x320xf32, #tpu.memory_space<vmem>>, vector<16x256xf32>
    %c17_178 = arith.constant 17 : index
    %c0_179 = arith.constant 0 : index
    %243 = vector.load %arg9[%c17_178, %c0_179] : memref<25x256xf32, #tpu.memory_space<vmem>>, vector<1x256xf32>
    %244 = vector.broadcast %243 : vector<1x256xf32> to vector<16x256xf32>
    %245 = arith.mulf %242, %244 : vector<16x256xf32>
    %246 = arith.addf %241, %245 : vector<16x256xf32>
    %c3_180 = arith.constant 3 : index
    %c48_181 = arith.constant 48 : index
    %247 = vector.load %arg17[%c3_180, %c48_181] : memref<20x320xf32, #tpu.memory_space<vmem>>, vector<16x256xf32>
    %c18_182 = arith.constant 18 : index
    %c0_183 = arith.constant 0 : index
    %248 = vector.load %arg9[%c18_182, %c0_183] : memref<25x256xf32, #tpu.memory_space<vmem>>, vector<1x256xf32>
    %249 = vector.broadcast %248 : vector<1x256xf32> to vector<16x256xf32>
    %250 = arith.mulf %247, %249 : vector<16x256xf32>
    %251 = arith.addf %246, %250 : vector<16x256xf32>
    %c3_184 = arith.constant 3 : index
    %c64_185 = arith.constant 64 : index
    %252 = vector.load %arg17[%c3_184, %c64_185] : memref<20x320xf32, #tpu.memory_space<vmem>>, vector<16x256xf32>
    %c19_186 = arith.constant 19 : index
    %c0_187 = arith.constant 0 : index
    %253 = vector.load %arg9[%c19_186, %c0_187] : memref<25x256xf32, #tpu.memory_space<vmem>>, vector<1x256xf32>
    %254 = vector.broadcast %253 : vector<1x256xf32> to vector<16x256xf32>
    %255 = arith.mulf %252, %254 : vector<16x256xf32>
    %256 = arith.addf %251, %255 : vector<16x256xf32>
    %c4_188 = arith.constant 4 : index
    %c0_189 = arith.constant 0 : index
    %257 = vector.load %arg17[%c4_188, %c0_189] : memref<20x320xf32, #tpu.memory_space<vmem>>, vector<16x256xf32>
    %c20_190 = arith.constant 20 : index
    %c0_191 = arith.constant 0 : index
    %258 = vector.load %arg9[%c20_190, %c0_191] : memref<25x256xf32, #tpu.memory_space<vmem>>, vector<1x256xf32>
    %259 = vector.broadcast %258 : vector<1x256xf32> to vector<16x256xf32>
    %260 = arith.mulf %257, %259 : vector<16x256xf32>
    %261 = arith.addf %256, %260 : vector<16x256xf32>
    %c4_192 = arith.constant 4 : index
    %c16_193 = arith.constant 16 : index
    %262 = vector.load %arg17[%c4_192, %c16_193] : memref<20x320xf32, #tpu.memory_space<vmem>>, vector<16x256xf32>
    %c21_194 = arith.constant 21 : index
    %c0_195 = arith.constant 0 : index
    %263 = vector.load %arg9[%c21_194, %c0_195] : memref<25x256xf32, #tpu.memory_space<vmem>>, vector<1x256xf32>
    %264 = vector.broadcast %263 : vector<1x256xf32> to vector<16x256xf32>
    %265 = arith.mulf %262, %264 : vector<16x256xf32>
    %266 = arith.addf %261, %265 : vector<16x256xf32>
    %c4_196 = arith.constant 4 : index
    %c32_197 = arith.constant 32 : index
    %267 = vector.load %arg17[%c4_196, %c32_197] : memref<20x320xf32, #tpu.memory_space<vmem>>, vector<16x256xf32>
    %c22_198 = arith.constant 22 : index
    %c0_199 = arith.constant 0 : index
    %268 = vector.load %arg9[%c22_198, %c0_199] : memref<25x256xf32, #tpu.memory_space<vmem>>, vector<1x256xf32>
    %269 = vector.broadcast %268 : vector<1x256xf32> to vector<16x256xf32>
    %270 = arith.mulf %267, %269 : vector<16x256xf32>
    %271 = arith.addf %266, %270 : vector<16x256xf32>
    %c4_200 = arith.constant 4 : index
    %c48_201 = arith.constant 48 : index
    %272 = vector.load %arg17[%c4_200, %c48_201] : memref<20x320xf32, #tpu.memory_space<vmem>>, vector<16x256xf32>
    %c23_202 = arith.constant 23 : index
    %c0_203 = arith.constant 0 : index
    %273 = vector.load %arg9[%c23_202, %c0_203] : memref<25x256xf32, #tpu.memory_space<vmem>>, vector<1x256xf32>
    %274 = vector.broadcast %273 : vector<1x256xf32> to vector<16x256xf32>
    %275 = arith.mulf %272, %274 : vector<16x256xf32>
    %276 = arith.addf %271, %275 : vector<16x256xf32>
    %c4_204 = arith.constant 4 : index
    %c64_205 = arith.constant 64 : index
    %277 = vector.load %arg17[%c4_204, %c64_205] : memref<20x320xf32, #tpu.memory_space<vmem>>, vector<16x256xf32>
    %c24_206 = arith.constant 24 : index
    %c0_207 = arith.constant 0 : index
    %278 = vector.load %arg9[%c24_206, %c0_207] : memref<25x256xf32, #tpu.memory_space<vmem>>, vector<1x256xf32>
    %279 = vector.broadcast %278 : vector<1x256xf32> to vector<16x256xf32>
    %280 = arith.mulf %277, %279 : vector<16x256xf32>
    %281 = arith.addf %276, %280 : vector<16x256xf32>
    %c0_208 = arith.constant 0 : index
    %c0_209 = arith.constant 0 : index
    %282 = vector.load %arg10[%c0_208, %c0_209] : memref<1x256xf32, #tpu.memory_space<vmem>>, vector<1x256xf32>
    %283 = vector.broadcast %282 : vector<1x256xf32> to vector<16x256xf32>
    %284 = arith.addf %281, %283 : vector<16x256xf32>
    %cst_210 = arith.constant 0.000000e+00 : f32
    %285 = vector.broadcast %cst_210 : f32 to vector<16x256xf32>
    %286 = arith.maximumf %284, %285 : vector<16x256xf32>
    %c0_211 = arith.constant 0 : index
    %c0_212 = arith.constant 0 : index
    %287 = vector.load %arg11[%c0_211, %c0_212] : memref<8x16xf32, #tpu.memory_space<vmem>>, vector<8x16xf32>
    %cst_213 = arith.constant dense<0.000000e+00> : vector<8x256xf32>
    %288 = tpu.matmul %287, %286, %cst_213 {dimension_numbers = #tpu.dot_dimension_numbers<[1], [0], [0], [1], [0, 0, 1, 1], [], []>} : vector<8x16xf32>, vector<16x256xf32>, vector<8x256xf32> -> vector<8x256xf32>
    %c0_214 = arith.constant 0 : index
    %c0_215 = arith.constant 0 : index
    %289 = vector.load %arg12[%c0_214, %c0_215] : memref<8x16xf32, #tpu.memory_space<vmem>>, vector<8x16xf32>
    %cst_216 = arith.constant dense<0.000000e+00> : vector<8x256xf32>
    %290 = tpu.matmul %289, %286, %cst_216 {dimension_numbers = #tpu.dot_dimension_numbers<[1], [0], [0], [1], [0, 0, 1, 1], [], []>} : vector<8x16xf32>, vector<16x256xf32>, vector<8x256xf32> -> vector<8x256xf32>
    %291 = arith.maximumf %288, %290 : vector<8x256xf32>
    %c0_217 = arith.constant 0 : index
    %c0_218 = arith.constant 0 : index
    %292 = vector.load %arg13[%c0_217, %c0_218] : memref<256x128xf32, #tpu.memory_space<vmem>>, vector<256x128xf32>
    %cst_219 = arith.constant dense<0.000000e+00> : vector<8x128xf32>
    %293 = tpu.matmul %291, %292, %cst_219 {dimension_numbers = #tpu.dot_dimension_numbers<[1], [0], [0], [1], [0, 0, 1, 1], [], []>} : vector<8x256xf32>, vector<256x128xf32>, vector<8x128xf32> -> vector<8x128xf32>
    %c0_220 = arith.constant 0 : index
    %c0_221 = arith.constant 0 : index
    %294 = vector.load %arg14[%c0_220, %c0_221] : memref<256x128xf32, #tpu.memory_space<vmem>>, vector<256x128xf32>
    %cst_222 = arith.constant dense<0.000000e+00> : vector<8x128xf32>
    %295 = tpu.matmul %291, %294, %cst_222 {dimension_numbers = #tpu.dot_dimension_numbers<[1], [0], [0], [1], [0, 0, 1, 1], [], []>} : vector<8x256xf32>, vector<256x128xf32>, vector<8x128xf32> -> vector<8x128xf32>
    %296 = arith.maximumf %293, %295 : vector<8x128xf32>
    %c0_223 = arith.constant 0 : index
    %c0_224 = arith.constant 0 : index
    %c0_225 = arith.constant 0 : index
    %297 = vector.load %arg15[%c0_223, %c0_224, %c0_225] : memref<1x8x128xf32, #tpu.memory_space<vmem>>, vector<1x8x128xf32>
    %298 = vector.shape_cast %297 : vector<1x8x128xf32> to vector<8x128xf32>
    %299 = vector.shape_cast %296 : vector<8x128xf32> to vector<1x8x128xf32>
    tpu.vector_store %arg15[%c0_223, %c0_224, %c0_225], %299 {strides = array<i32>} : memref<1x8x128xf32, #tpu.memory_space<vmem>>, vector<1x8x128xf32>,
    return
  }
  func.func @transform_0(%arg0: i32) -> (i32, i32, i32) {
    %c0_i32 = arith.constant 0 : i32
    %c0_i32_0 = arith.constant 0 : i32
    %c0_i32_1 = arith.constant 0 : i32
    return %arg0, %c0_i32, %c0_i32_0 : i32, i32, i32
  }
  func.func @transform_1(%arg0: i32) -> (i32, i32) {
    %c0_i32 = arith.constant 0 : i32
    %c0_i32_0 = arith.constant 0 : i32
    %c0_i32_1 = arith.constant 0 : i32
    return %c0_i32, %c0_i32_0 : i32, i32
  }
  func.func @transform_2(%arg0: i32) -> (i32, i32) {
    %c0_i32 = arith.constant 0 : i32
    %c0_i32_0 = arith.constant 0 : i32
    %c0_i32_1 = arith.constant 0 : i32
    return %c0_i32, %c0_i32_0 : i32, i32
  }
  func.func @transform_3(%arg0: i32) -> (i32, i32) {
    %c0_i32 = arith.constant 0 : i32
    %c0_i32_0 = arith.constant 0 : i32
    %c0_i32_1 = arith.constant 0 : i32
    return %c0_i32, %c0_i32_0 : i32, i32
  }
  func.func @transform_4(%arg0: i32) -> (i32, i32) {
    %c0_i32 = arith.constant 0 : i32
    %c0_i32_0 = arith.constant 0 : i32
    %c0_i32_1 = arith.constant 0 : i32
    return %c0_i32, %c0_i32_0 : i32, i32
  }
  func.func @transform_5(%arg0: i32) -> (i32, i32) {
    %c0_i32 = arith.constant 0 : i32
    %c0_i32_0 = arith.constant 0 : i32
    %c0_i32_1 = arith.constant 0 : i32
    return %c0_i32, %c0_i32_0 : i32, i32
  }
  func.func @transform_6(%arg0: i32) -> (i32, i32) {
    %c0_i32 = arith.constant 0 : i32
    %c0_i32_0 = arith.constant 0 : i32
    %c0_i32_1 = arith.constant 0 : i32
    return %c0_i32, %c0_i32_0 : i32, i32
  }
  func.func @transform_7(%arg0: i32) -> (i32, i32) {
    %c0_i32 = arith.constant 0 : i32
    %c0_i32_0 = arith.constant 0 : i32
    %c0_i32_1 = arith.constant 0 : i32
    return %c0_i32, %c0_i32_0 : i32, i32
  }
  func.func @transform_8(%arg0: i32) -> (i32, i32) {
    %c0_i32 = arith.constant 0 : i32
    %c0_i32_0 = arith.constant 0 : i32
    %c0_i32_1 = arith.constant 0 : i32
    return %c0_i32, %c0_i32_0 : i32, i32
  }
  func.func @transform_9(%arg0: i32) -> (i32, i32) {
    %c0_i32 = arith.constant 0 : i32
    %c0_i32_0 = arith.constant 0 : i32
    %c0_i32_1 = arith.constant 0 : i32
    return %c0_i32, %c0_i32_0 : i32, i32
  }
  func.func @transform_10(%arg0: i32) -> (i32, i32) {
    %c0_i32 = arith.constant 0 : i32
    %c0_i32_0 = arith.constant 0 : i32
    %c0_i32_1 = arith.constant 0 : i32
    return %c0_i32, %c0_i32_0 : i32, i32
  }
  func.func @transform_11(%arg0: i32) -> (i32, i32) {
    %c0_i32 = arith.constant 0 : i32
    %c0_i32_0 = arith.constant 0 : i32
    %c0_i32_1 = arith.constant 0 : i32
    return %c0_i32, %c0_i32_0 : i32, i32
  }
  func.func @transform_12(%arg0: i32) -> (i32, i32) {
    %c0_i32 = arith.constant 0 : i32
    %c0_i32_0 = arith.constant 0 : i32
    %c0_i32_1 = arith.constant 0 : i32
    return %c0_i32, %c0_i32_0 : i32, i32
  }
  func.func @transform_13(%arg0: i32) -> (i32, i32) {
    %c0_i32 = arith.constant 0 : i32
    %c0_i32_0 = arith.constant 0 : i32
    %c0_i32_1 = arith.constant 0 : i32
    return %c0_i32, %c0_i32_0 : i32, i32
  }
  func.func @transform_14(%arg0: i32) -> (i32, i32, i32) {
    %c0_i32 = arith.constant 0 : i32
    %c0_i32_0 = arith.constant 0 : i32
    %c0_i32_1 = arith.constant 0 : i32
    return %arg0, %c0_i32, %c0_i32_0 : i32, i32, i32
  }
}

</mosaic_0001>

<bundles_post_ra>
// kernel: tpu_custom_call.1
= control target key start
LH: loop header
LB: loop body
LE: loop exit
PB: predicated region body
PF: predicated region fallthrough
CT: control target
= control target key end

     0   :  { %s7103_s0 = inlined_call_operand.hbm [shape: f32[2,16,64], index: 0, kind: input, shape index: {}]   ;;  %s7104_s1 = inlined_call_operand.hbm [shape: f32[64,160], index: 1, kind: input, shape index: {}]   ;;  %s7105_s2 = inlined_call_operand.hbm [shape: f32[1,160], index: 2, kind: input, shape index: {}]   ;;  %s7106_s3 = inlined_call_operand.hbm [shape: f32[25,128], index: 3, kind: input, shape index: {}]   ;;  %s7107_s4 = inlined_call_operand.hbm [shape: f32[1,128], index: 4, kind: input, shape index: {}]   ;;  %s7108_s5 = inlined_call_operand.vmem [shape: f32[64,320], index: 5, kind: input, shape index: {}]   ;;  %s7109_s6 = inlined_call_operand.vmem [shape: f32[128,320], index: 6, kind: input, shape index: {}]   ;;  %s7110_s7 = inlined_call_operand.hbm [shape: f32[1,320], index: 7, kind: input, shape index: {}]   ;;  %s7111_s8 = inlined_call_operand.hbm [shape: f32[25,256], index: 8, kind: input, shape index: {}]   ;;  %s7112_s9 = inlined_call_operand.vmem [shape: f32[1,256], index: 9, kind: input, shape index: {}]   ;;  %s7113_s10 = inlined_call_operand.hbm [shape: f32[8,16], index: 10, kind: input, shape index: {}]   ;;  %s7114_s11 = inlined_call_operand.hbm [shape: f32[8,16], index: 11, kind: input, shape index: {}]   ;;  %s7115_s12 = inlined_call_operand.vmem [shape: f32[256,128], index: 12, kind: input, shape index: {}]   ;;  %s7116_s13 = inlined_call_operand.vmem [shape: f32[256,128], index: 13, kind: input, shape index: {}]   ;;  %s7117_s14 = inlined_call_operand.hbm [shape: f32[2,8,128], index: 14, kind: output, shape index: {}]  }
   0x1   :  { %7144 = sst [smem:[#allocation39_spill]] %s7104_s1 }
   0x2   :  { %7145 = sst [smem:[#allocation40_spill]] %s7105_s2 }
   0x3   :  { %7146 = sst [smem:[#allocation41_spill]] %s7106_s3 }
   0x4   :  { %7147 = sst [smem:[#allocation42_spill]] %s7107_s4 }
   0x5   :  { %7148 = sst [smem:[#allocation43_spill]] %s7110_s7 }
   0x6   :  { %7149 = sst [smem:[#allocation44_spill]] %s7112_s9 }
   0x7   :  { %7150 = sst [smem:[#allocation45_spill]] %s7115_s12 }
   0x8   :  { %7151 = sst [smem:[#allocation46_spill]] %s7116_s13 }
   0x9   :  { %7152 = sst [smem:[#allocation47_spill]] %s7117_s14 }
   0xa   :  { %19 = vsyncpa [#allocation5], 0 }
   0xb   :  { %21 = vsyncpa [#allocation5 + $0x1], 0 }
   0xc   :  { %22 = vsyncpa [#allocation8], 0 }
   0xd   :  { %23 = vsyncpa [#allocation11], 0 }
   0xe   :  { %24 = vsyncpa [#allocation14], 0 }
   0xf   :  { %25 = vsyncpa [#allocation17], 0 }
  0x10   :  { %26 = vsyncpa [#allocation6], 0 }
  0x11   :  { %28 = vsyncpa [#allocation6 + $0x1], 0  ;;  %s4481_s29 = smov 0   ;;  %s4483_s30 = smov 0  }
  0x12   :  { %s4485_s15 = smov 0   ;;  %s4487_s16 = smov 0  }
  0x13 LB: > { %s7153_s1 = sld [smem:[#allocation39_spill]]  ;;  %s4505_s20 = sadd.s32 4294967295, %s4380_s16   ;;  %s4380_s16 = sphi %s4487_s16, %s7207_s16   ;;  %s4376_s15 = sphi %s4485_s15, %s7206_s15   ;;  %s4372_s30 = sphi %s4483_s30, %s7205_s30   ;;  %s4368_s29 = sphi %s4481_s29, %s7204_s29  }
  0x14   : > { %p3806_p0 = scmp.ge.s32.totalorder %s4380_s16, 1  ;;  %p55_p1 = scmp.eq.s32.totalorder %s4505_s20, 0 }
  0x15   : > { %p364_p2 = scmp.lt.s32.totalorder %s4380_s16, 3  ;;  %s4382_s22 = smov [#allocation7]  }
  0x16   : > { %s377_s23 = sshll.u32 %s4382_s22, 4  ;;  %s7155_s3 = sld [smem:[#allocation41_spill]]  ;;  %s378_s23 = int_to_ptr.vmem [resolvable:$true] %s377_s23 }
  0x17   : > { %p4510_p3 = pnand %p3806_p0, %p364_p2  ;;  %s4383_s28 = smov [#allocation10]  }
  0x18   : > { %s403_s17 = sshll.u32 %s4383_s28, 4  ;;  %s7121_s18 = smov 256   ;;  %s404_s17 = int_to_ptr.vmem [resolvable:$true] %s403_s17 }
  0x19   : > { %s375_s19 = sshll.u32 %s7153_s1, 4  ;;  %p3885_p4 = pneg %p4510_p3  ;;  %s376_s19 = int_to_ptr.hbm [resolvable:$true] %s375_s19 }
  0x1a   : > { %s7122_s22 = smov 16   ;;  %s7123_s24 = smov 128  }
  0x1b   : > { %p4522_p6 = pnand %p3885_p4, %p55_p1  ;;  %s7124_s25 = smov 8  }
  0x1c   : > { %s401_s26 = sshll.u32 %s7155_s3, 4  ;;  %s7157_s7 = sld [smem:[#allocation43_spill]]  ;;  %s402_s26 = int_to_ptr.hbm [resolvable:$true] %s401_s26 }
  0x1d   : > { %3888 = dma.hbm_to_vmem [thread:$0]  (!%p4522_p6), %s376_s19, 2048, %s378_s23, [#allocation8], %s7121_s18, %s7121_s18, %s7122_s22  }
  0x1e   : > { %3894 = dma.hbm_to_vmem [thread:$0]  (!%p4522_p6), %s402_s26, 512, %s404_s17, [#allocation11], %s7123_s24, %s7123_s24, %s7124_s25  }
  0x1f   : > { %s4388_s14 = smov [#allocation13]   ;;  %s463_s23 = sshll.u32 %s7113_s10, 4  ;;  %s464_s23 = int_to_ptr.hbm [resolvable:$true] %s463_s23 }
  0x20   : > { %s436_s13 = sshll.u32 %s4388_s14, 4  ;;  %s4389_s18 = smov [#allocation16]   ;;  %s437_s13 = int_to_ptr.vmem [resolvable:$true] %s436_s13 }
  0x21   : > { %s465_s22 = sshll.u32 %s4389_s18, 4  ;;  %s7158_s2 = sld [smem:[#allocation40_spill]]  ;;  %s466_s22 = int_to_ptr.vmem [resolvable:$true] %s465_s22 }
  0x22   : > { %s434_s28 = sshll.u32 %s7157_s7, 4  ;;  %s7159_s4 = sld [smem:[#allocation42_spill]]  ;;  %s435_s28 = int_to_ptr.hbm [resolvable:$true] %s434_s28 }
  0x23   : > { %3900 = dma.hbm_to_vmem [thread:$0]  (!%p4522_p6), %s435_s28, 48, %s437_s13, [#allocation14]  }
  0x24   : > { %3906 = dma.hbm_to_vmem [thread:$0]  (!%p4522_p6), %s464_s23, 128, %s466_s22, [#allocation17]  }
  0x25   : > { %s4390_s12 = smov [#allocation9]   ;;  %s4391_s13 = smov [#allocation12]  }
  0x26   : > { %s392_s19 = sshll.u32 %s4390_s12, 4  ;;  %s418_s9 = sshll.u32 %s4391_s13, 4  ;;  %s393_s19 = int_to_ptr.vmem [resolvable:$true] %s392_s19  ;;  %s419_s9 = int_to_ptr.vmem [resolvable:$true] %s418_s9 }
  0x27   : > { %s390_s1 = sshll.u32 %s7158_s2, 4  ;;  %s445_s22 = sshll.u32 %s7111_s8, 4  ;;  %s391_s1 = int_to_ptr.hbm [resolvable:$true] %s390_s1  ;;  %s446_s22 = int_to_ptr.hbm [resolvable:$true] %s445_s22 }
  0x28   : > { %s416_s17 = sshll.u32 %s7159_s4, 4  ;;  %s4392_s3 = smov [#allocation15]   ;;  %s417_s17 = int_to_ptr.hbm [resolvable:$true] %s416_s17 }
  0x29   : > { %3891 = dma.hbm_to_vmem [thread:$0]  (!%p4522_p6), %s391_s1, 32, %s393_s19, [#allocation8]  }
  0x2a   : > { %3897 = dma.hbm_to_vmem [thread:$0]  (!%p4522_p6), %s417_s17, 16, %s419_s9, [#allocation11]  }
  0x2b   : > { %s475_s1 = sshll.u32 %s7114_s11, 4  ;;  %s447_s14 = sshll.u32 %s4392_s3, 4  ;;  %s476_s1 = int_to_ptr.hbm [resolvable:$true] %s475_s1  ;;  %s448_s14 = int_to_ptr.vmem [resolvable:$true] %s447_s14 }
  0x2c   : > { %s7160_s12 = smov 16   ;;  %s7161_s19 = smov 256  }
  0x2d   : > { %3903 = dma.hbm_to_vmem [thread:$0]  (!%p4522_p6), %s446_s22, 1024, %s448_s14, [#allocation14], %s7161_s19, %s7161_s19, %s7160_s12  }
  0x2e   : > { %s4393_s17 = smov [#allocation18]   ;;  %s3805_s9 = sadd.s32 4294967294, %s4380_s16  }
  0x2f   : > { %s477_s13 = sshll.u32 %s4393_s17, 4  ;;  %s4571_s18 = sadd.s32 1, %s4380_s16   ;;  %s478_s13 = int_to_ptr.vmem [resolvable:$true] %s477_s13 }
  0x30   : > { %3909 = dma.hbm_to_vmem [thread:$0]  (!%p4522_p6), %s476_s1, 128, %s478_s13, [#allocation17]  }
  0x31   : > { %s38_s28 = ssub.s32 %s4380_s16, %s4571_s18  ;;  %s41_s23 = sadd.s32 1, %s4376_s15 }
  0x32   : > { %p39_p7 = scmp.eq.s32.totalorder %s38_s28, 0  ;;  %p48_p8 = scmp.ne.s32.totalorder %s4376_s15, %s4372_s30 }
  0x33   : > { %p49_p9 = scmp.eq.s32.totalorder %s4380_s16, 0  ;;  %p54_p10 = scmp.ne.s32.totalorder %s4372_s30, %s4368_s29 }
  0x34   : > { %s4582_s22 = scalar_select %p39_p7, %s4376_s15, %s41_s23  }
  0x35   : > { %p4584_p11 = por %p49_p9, %p48_p8  ;;  %p4590_p12 = por %p55_p1, %p54_p10 }
  0x36   : > { %p351_p13 = scmp.eq.s32.totalorder %s4505_s20, 1  ;;  %p357_p0 = scmp.eq.s32.totalorder %s3805_s9, 1 }
  0x37   : > { %p3926_p2 = scmp.lt.s32.totalorder %s4380_s16, 2  ;;  %s494_s1 = sand.u32 1, %s4376_s15  }
  0x38   : > { %p4597_p4 = por %p351_p13, %p48_p8  ;;  %p4601_p6 = por %p357_p0, %p54_p10 }
  0x39   : > { %s3816_s12 = sshll.u32 %s494_s1, 4  ;;  %s3848_s19 = sshll.u32 %s4380_s16, 4 }
  0x3a   : > { %s503_s28 = scalar_lea.hbm %s7103_s0, %s3848_s19  ;;  %s498_s23 = scalar_lea.vmem [#allocation4], %s3816_s12 }
  0x3b   : > { %s506_s24 = sshll.u32 %s498_s23, 4  ;;  %s504_s25 = sshll.u32 %s503_s28, 4  ;;  %s507_s24 = int_to_ptr.vmem [resolvable:$true] %s506_s24  ;;  %s505_s25 = int_to_ptr.hbm [resolvable:$true] %s504_s25 }
  0x3c   : > { %p4611_p7 = pnand %p3926_p2, %p4584_p11  ;;  %s495_s2 = scalar_lea.sflag [#allocation5], %s494_s1 }
  0x3d   : > { %s4268_s4 = sshra.s32 %s505_s25, 4  ;;  %s4275_s17 = scalar_lea.hbm %s7103_s0, 32  ;;  %s4269_s4 = int_to_ptr.hbm [resolvable:$true] %s4268_s4 }
  0x3e   : > { %s4270_s7 = scalar_lea.hbm %s4269_s4, 16  ;;  %p4272_p9 = pneg %p4611_p7 }
  0x3f   : > { %p4271_p8 = scmp.ne.s32.totalorder %s4269_s4, %s4270_s7  ;;  %p4276_p11 = scmp.lt.s32.totalorder %s4269_s4, %s7103_s0 }
  0x40   : > { %p4277_p0 = scmp.lt.s32.totalorder %s4275_s17, %s4270_s7 }
  0x41   : > { %p4273_p10 = pnand %p4272_p9, %p4271_p8 }
  0x42   : > { %p4278_p2 = por %p4277_p0, %p4276_p11 }
  0x43   : > { %p4274_p13 = pneg %p4273_p10 }
  0x45   : > { %p4279_p5 = pnand %p4278_p2, %p4274_p13 }
  0x47   : > { %4282 = shalt.err (!%p4279_p5)
}
  0x48   : > { %s7167_s1 = smov 8   ;;  %s7168_s28 = smov 128  }
  0x49   : > { %3913 = dma.hbm_to_vmem [thread:$0]  (!%p4611_p7), %s505_s25, 256, %s507_s24, %s495_s2, %s7168_s28, %s7168_s28, %s7167_s1  }
  0x4a   : > { %518 = sbr.rel (%p4510_p3) target bundleno = 1416 (0x588), region = 76 }
  0x4f   : > { %s4631_s23 = sand.u32 1, %s4372_s30  }
  0x50   : > { %s3820_s4 = sshll.u32 %s4631_s23, 4  ;;  %s521_s7 = scalar_lea.sflag [#allocation5], %s4631_s23 }
  0x51   : > { %s4635_s12 = scalar_lea.vmem [#allocation4], %s3820_s4 }
  0x52   : > { %4343 = dma.done.wait (%p4590_p12), %s521_s7, 256  }
  0x53   : > { %4345 = vsyncadd (%p4590_p12), %s521_s7, 4294967040 }
  0x54   : > { %4347 = dma.done.wait (%p55_p1), [#allocation8], 2080  }
  0x55   : > { %4349 = vsyncadd (%p55_p1), [#allocation8], 4294965216 }
  0x56   : > { %4351 = dma.done.wait (%p55_p1), [#allocation11], 528  }
  0x57   : > { %4353 = vsyncadd (%p55_p1), [#allocation11], 4294966768 }
  0x58   : > { %4355 = dma.done.wait (%p55_p1), [#allocation14], 1072  }
  0x59   : > { %4357 = vsyncadd (%p55_p1), [#allocation14], 4294966224 }
  0x5a   : > { %4359 = dma.done.wait (%p55_p1), [#allocation17], 256  }
  0x5b   : > { %4361 = vsyncadd (%p55_p1), [#allocation17], 4294967040  ;;  %v626_v0 = vld [vmem:[#allocation7 + $0x70] sm:$0xff]  ;;  %v627_v1 = vld [vmem:[#allocation7 + $0x78] sm:$0xff]  ;;  %s4394_s2 = smov 24   ;;  %s4395_s21 = smov 8  }
  0x5c   : > { %649 = vmatpush.msra.mxu0 %v626_v0  ;;  %672 = vmatpush.msra.mxu1 %v627_v1  ;;  %v3992_v2 = vld [vmem:[#allocation10 + $0x3] ss:$0 sm:$0xff]  ;;  %v3993_v3 = vld [vmem:[#allocation10 + $0x1] ss:$0 sm:$0xff]  ;;  %v625_v5 = vld [vmem:[#allocation7 + $0x68] sm:$0xff]  ;;  %s4396_s24 = smov 16  }
  0x5d   : > { %v624_v4 = vld [vmem:[#allocation7 + $0x60] sm:$0xff]  ;;  %791 = vrot.lane.b32.xlu1 %v3992_v2, %s4394_s2  ;;  %733 = vrot.lane.b32.xlu0 %v3993_v3, %s4395_s21  ;;  %v622_v6 = vld [vmem:[#allocation7 + $0x50] sm:$0xff]  ;;  %v623_v7 = vld [vmem:[#allocation7 + $0x58] sm:$0xff]  ;;  %s4397_s25 = smov 32   ;;  %vm634_vm0 = vcmask 523264   ;;  %vm692_vm1 = vcmask 254976  }
  0x5e   : > { %650 = vmatpush.msra.mxu0 %v624_v4  ;;  %673 = vmatpush.msra.mxu1 %v625_v5  ;;  %v620_v8 = vld [vmem:[#allocation7 + $0x40] sm:$0xff]  ;;  %v621_v9 = vld [vmem:[#allocation7 + $0x48] sm:$0xff]  ;;  %v618_v10 = vld [vmem:[#allocation7 + $0x30] sm:$0xff]  ;;  %v4398_v38 = vmov 0.0   ;;  %vm715_vm2 = vcmask 261122   ;;  %vm701_vm3 = vcmask 1041408  }
  0x5f   : > { %v619_v11 = vld [vmem:[#allocation7 + $0x38] sm:$0xff]  ;;  %v3994_v12 = vld [vmem:[#allocation10 + $0x7] ss:$0 sm:$0xff]  ;;  %v3995_v13 = vld [vmem:[#allocation10 + $0x4] ss:$0 sm:$0xff]  ;;  %vm718_vm4 = vcmask 261120  }
  0x60   : > { %651 = vmatpush.msra.mxu0 %v622_v6  ;;  %674 = vmatpush.msra.mxu1 %v623_v7  ;;  %v616_v14 = vld [vmem:[#allocation7 + $0x20] sm:$0xff]  ;;  %v617_v15 = vld [vmem:[#allocation7 + $0x28] sm:$0xff]  ;;  %v614_v17 = vld [vmem:[#allocation7 + $0x10] sm:$0xff]  ;;  %693 = vst.msk [vmem:[#allocation2 + $0x8] sm:$0x3] %vm692_vm1, %v4398_v38  ;;  %s4399_s27 = smov 104  }
  0x61   : > { %v3998_v16 = vld [vmem:[#allocation10 + $0x2] ss:$0 sm:$0xff]  ;;  %v615_v18 = vld [vmem:[#allocation7 + $0x18] sm:$0xff]  ;;  %v613_v20 = vld [vmem:[#allocation7 + $0x8] sm:$0xff]  ;;  %691 = vst [vmem:[#allocation2] sm:$0x3] %v4398_v38 }
  0x62   : > { %652 = vmatpush.msra.mxu0 %v620_v8  ;;  %675 = vmatpush.msra.mxu1 %v621_v9  ;;  %v612_v19 = vld [vmem:[#allocation7] sm:$0xff]  ;;  %v3996_v22 = vld [vmem:[#allocation10 + $0xb] ss:$0 sm:$0xff]  ;;  %v3997_v23 = vld [vmem:[#allocation10 + $0x8] ss:$0 sm:$0xff]  ;;  %s4400_s9 = smov 120  }
  0x63   : > { %762 = vrot.lane.b32.xlu2 %v3998_v16, %s4396_s24  ;;  %v610_v21 = vld [vmem:[%s4635_s12] sm:$0xff]  ;;  %v4001_v24 = vld [vmem:[#allocation10 + $0x6] ss:$0 sm:$0xff]  ;;  %v3999_v26 = vld [vmem:[#allocation10 + $0xd] ss:$0 sm:$0xff]  ;;  %s7127_s19 = smov 96  }
  0x64   : > { %653 = vmatpush.msra.mxu0 %v618_v10  ;;  %676 = vmatpush.msra.mxu1 %v619_v11  ;;  %v611_v25 = vld [vmem:[%s4635_s12 + $0x8] sm:$0xff]  ;;  %v4002_v29 = vld [vmem:[#allocation10 + $0x11] ss:$0 sm:$0xff]  ;;  %v4003_v30 = vld [vmem:[#allocation10 + $0x10] ss:$0 sm:$0xff]  ;;  %s7125_s17 = smov 112  }
  0x65   : > { %913 = vrot.lane.b32.xlu1 %v3994_v12, %s4396_s24  ;;  %820 = vrot.lane.b32.xlu0 %v3995_v13, %s4397_s25  ;;  %v4000_v27 = vld [vmem:[#allocation10 + $0xc] ss:$0 sm:$0xff]  ;;  %v4004_v28 = vld [vmem:[#allocation10 + $0x9] ss:$0 sm:$0xff]  ;;  %v4007_v31 = vld [vmem:[#allocation10 + $0xe] ss:$0 sm:$0xff] }
  0x66   : > { %654 = vmatpush.msra.mxu0 %v616_v14  ;;  %677 = vmatpush.msra.mxu1 %v617_v15  ;;  %v4005_v32 = vld [vmem:[#allocation10 + $0x15] ss:$0 sm:$0xff]  ;;  %v4006_v33 = vld [vmem:[#allocation10 + $0x13] ss:$0 sm:$0xff]  ;;  %v4010_v34 = vld [vmem:[#allocation10 + $0x12] ss:$0 sm:$0xff] }
  0x67   : > { %v4008_v35 = vld [vmem:[#allocation10 + $0x18] ss:$0 sm:$0xff]  ;;  %v4009_v36 = vld [vmem:[#allocation10 + $0x17] ss:$0 sm:$0xff]  ;;  %v4011_v37 = vld [vmem:[#allocation10 + $0x16] ss:$0 sm:$0xff] }
  0x68   : > { %655 = vmatpush.msra.mxu0 %v614_v17  ;;  %678 = vmatpush.msra.mxu1 %v615_v18  ;;  %694 = vst [vmem:[#allocation2 + $0x20] sm:$0xc] %v4398_v38  ;;  %v628_v39 = vld [vmem:[#allocation9] sm:$0x3]  ;;  %vm695_vm5 = vcmask 257026   ;;  %vm856_vm6 = vcmask 1046528  }
  0x69   : > { %1844 = vst [vmem:[#allocation3] sm:$0x3] %v4398_v38  ;;  %v630_v40 = vperm.slane %v628_v39, 0  ;;  %v631_v41 = vperm.slane %v628_v39, 1  ;;  %vm1046_vm7 = vcmask 1045504   ;;  %vm1236_vm8 = vcmask 1044480  }
  0x6a   : > { %656 = vmatpush.msra.mxu0 %v612_v19  ;;  %679 = vmatpush.msra.mxu1 %v613_v20  ;;  %1845 = vst [vmem:[#allocation3 + $0x8] sm:$0x3] %v4398_v38  ;;  %vm752_vm9 = vcmask 982016   ;;  %vm781_vm10 = vcmask 916480   ;;  %vm810_vm11 = vcmask 850944   ;;  %vm839_vm12 = vcmask 785408  }
  0x6b   : > { %3830 = vmatmul.msk.f32.vlgmr.msra.gmra.mxu0 %vm634_vm0, %v610_v21  ;;  %3832 = vmatmul.msk.f32.vlgmr.msra.gmra.mxu1 %vm634_vm0, %v610_v21  ;;  %1848 = vst [vmem:[#allocation3 + $0x30] sm:$0xc] %v4398_v38  ;;  %vm1426_vm13 = vcmask 1043456   ;;  %s4403_s13 = smov 48   ;;  %s4404_s26 = smov 64   ;;  %vm1846_vm14 = vcmask 517120  }
  0x6c   : > { %871 = vrot.lane.b32.xlu2 %v4001_v24, %s4395_s21  ;;  %1849 = vst [vmem:[#allocation3 + $0x38] sm:$0xc] %v4398_v38  ;;  %vm1911_vm15 = vcmask 130048   ;;  %s3845_s7 = sshll.u32 %s4505_s20, 3  ;;  %s3644_s4 = scalar_lea.sflag [#allocation6], %s4631_s23 }
  0x6d   : > { %1061 = vrot.lane.b32.xlu1 %v3996_v22, %s4395_s21  ;;  %955 = vrot.lane.b32.xlu0 %v3997_v23, %s4394_s2  ;;  %696 = vst.msk [vmem:[#allocation2 + $0x28] sm:$0xc] %vm695_vm5, %v4398_v38  ;;  %vm2039_vm5 = vcmask 654336  }
  0x6e   : > { %1847 = vst.msk [vmem:[#allocation3 + $0x10] sm:$0x3] %vm1846_vm14, %v4398_v38 }
  0x73   : > { %3831 = vmatmul.msk.f32.gmra.mxu0 %vm634_vm0, %v611_v25  ;;  %3833 = vmatmul.msk.f32.gmra.mxu1 %vm634_vm0, %v611_v25 }
  0x74   : > { %997 = vrot.lane.b32.xlu2 %v4004_v28, %s4397_s25 }
  0x75   : > { %1145 = vrot.lane.b32.xlu1 %v3999_v26, %s4394_s2  ;;  %1103 = vrot.lane.b32.xlu0 %v4000_v27, %s4396_s24 }
  0x7c   : > { %1187 = vrot.lane.b32.xlu2 %v4007_v31, %s4397_s25 }
  0x7d   : > { %1293 = vrot.lane.b32.xlu1 %v4002_v29, %s4396_s24  ;;  %1251 = vrot.lane.b32.xlu0 %v4003_v30, %s4395_s21 }
  0x84   : > { %1335 = vrot.lane.b32.xlu2 %v4010_v34, %s4394_s2 }
  0x85   : > { %1441 = vrot.lane.b32.xlu1 %v4005_v32, %s4395_s21  ;;  %1377 = vrot.lane.b32.xlu0 %v4006_v33, %s4397_s25 }
  0x8c   : > { %1483 = vrot.lane.b32.xlu2 %v4011_v37, %s4396_s24 }
  0x8d   : > { %1567 = vrot.lane.b32.xlu1 %v4008_v35, %s4397_s25  ;;  %1525 = vrot.lane.b32.xlu0 %v4009_v36, %s4394_s2  ;;  %s7199_s2 = sld [smem:[#allocation44_spill]] }
  0xbd   : > { %v763_v3 = vpop.permute.xlu2 %762 }
  0xc6   : > { %v872_v17 = vpop.permute.xlu2 %871 }
  0xcf   : > { %v734_v56 = vpop.permute.xlu0 %733  ;;  %v792_v59 = vpop.permute.xlu1 %791 }
  0xd7   : > { %v821_v4 = vpop.permute.xlu0 %820  ;;  %v914_v28 = vpop.permute.xlu1 %913 }
  0xe8   : > { %v658_v42 = vpop.f32.mrf.mxu0  ;;  %v681_v43 = vpop.f32.mrf.mxu1 }
  0xe9   : > { %v659_v44 = vadd.f32 %v658_v42, %v630_v40  ;;  %v682_v45 = vadd.f32 %v681_v43, %v631_v41 }
  0xeb   : > { %v687_v46 = vmax.f32 %v659_v44, 0.0  ;;  %v688_v47 = vmax.f32 %v682_v45, 0.0 }
  0xed   : > { %v702_v48 = vrot.slane %v687_v46, 6  ;;  %v703_v49 = vrot.slane %v688_v47, 6 }
  0xef   : > { %714 = vst [vmem:[#allocation2] sm:$0xfc] %v702_v48 }
  0xf0   : > { %716 = vst.msk [vmem:[#allocation2 + $0x8] sm:$0xfc] %vm715_vm2, %v703_v49  ;;  %v661_v50 = vpop.f32.mrf.mxu0  ;;  %v684_v51 = vpop.f32.mrf.mxu1  ;;  %vm1878_vm2 = vcmask 523266  }
  0xf1   : > { %v662_v52 = vadd.f32 %v661_v50, %v630_v40  ;;  %v685_v53 = vadd.f32 %v684_v51, %v631_v41 }
  0xf3   : > { %v689_v54 = vmax.f32 %v662_v52, 0.0  ;;  %v690_v55 = vmax.f32 %v685_v53, 0.0  ;;  %v998_v53 = vpop.permute.xlu2 %997 }
  0xf5   : > { %v704_v57 = vrot.slane %v689_v54, 6  ;;  %v706_v58 = vrot.slane %v690_v55, 6 }
  0xf6   : > { %v4691_v60 = vld [vmem:[#allocation2] sm:$0xff] }
  0xf7   : > { %v4694_v61 = vsel %vm701_vm3, %v702_v48, %v704_v57  ;;  %720 = vst [vmem:[#allocation2 + $0x20] sm:$0x3] %v704_v57  ;;  %v707_v62 = vsel %vm701_vm3, %v703_v49, %v706_v58  ;;  %v728_v63 = vld [vmem:[#allocation2 + $0x8] sm:$0xff]  ;;  %v794_v0 = vmul.f32 %v792_v59, %v4691_v60  ;;  %v736_v1 = vmul.f32 %v734_v56, %v4691_v60  ;;  %v4723_v15 = vld [vmem:[#allocation2] sm:$0xfe] }
  0xf8   : > { %717 = vst [vmem:[#allocation2 + $0x10] sm:$0xff] %v4694_v61  ;;  %v737_v2 = vmul.f32 %v734_v56, %v728_v63  ;;  %v824_v5 = vmul.f32 %v821_v4, %v728_v63  ;;  %v765_v6 = vmul.f32 %v763_v3, %v4691_v60  ;;  %v766_v7 = vmul.f32 %v763_v3, %v728_v63  ;;  %v4745_v36 = vld [vmem:[#allocation2 + $0x8] sm:$0xfe] }
  0xf9   : > { %719 = vst.msk [vmem:[#allocation2 + $0x18] sm:$0xff] %vm718_vm4, %v707_v62  ;;  %802 = vrot.lane.b32.xlu2 %v794_v0, %s4399_s27  ;;  %744 = vrot.lane.b32.xlu0 %v736_v1, %s4400_s9  ;;  %v795_v10 = vmul.f32 %v792_v59, %v728_v63  ;;  %v823_v11 = vmul.f32 %v821_v4, %v4691_v60 }
  0xfa   : > { %721 = vst.msk [vmem:[#allocation2 + $0x28] sm:$0x3] %vm692_vm1, %v706_v58  ;;  %746 = vrot.lane.b32.xlu1 %v737_v2, %s4400_s9  ;;  %v767_v13 = vmul.f32 %v763_v3, %v4694_v61  ;;  %v738_v14 = vmul.f32 %v734_v56, %v4694_v61  ;;  %v825_v18 = vmul.f32 %v821_v4, %v4694_v61  ;;  %vm2010_vm1 = vcmask 392192  }
  0xfb   : > { %v874_v20 = vmul.f32 %v872_v17, %v4723_v15  ;;  %v876_v21 = vmul.f32 %v872_v17, %v4694_v61  ;;  %v796_v22 = vmul.f32 %v792_v59, %v4694_v61  ;;  %v916_v30 = vmul.f32 %v914_v28, %v4723_v15 }
  0xfc   : > { %v918_v31 = vmul.f32 %v914_v28, %v4694_v61  ;;  %v875_v37 = vmul.f32 %v872_v17, %v4745_v36  ;;  %v917_v50 = vmul.f32 %v914_v28, %v4745_v36 }
  0xfd   : > { %v886_v24 = vrot.slane %v874_v20, 1  ;;  %v887_v25 = vrot.slane %v876_v21, 1  ;;  %v928_v41 = vrot.slane %v916_v30, 1  ;;  %v1062_v21 = vpop.permute.xlu1 %1061 }
  0xfe   : > { %v4725_v16 = vld [vmem:[#allocation2 + $0x20] sm:$0x1]  ;;  %v929_v42 = vrot.slane %v918_v31, 1  ;;  %v889_v43 = vrot.slane %v875_v37, 1  ;;  %v931_v55 = vrot.slane %v917_v50, 1  ;;  %v1066_v31 = vmul.f32 %v1062_v21, %v4694_v61 }
  0xff   : > { %v878_v23 = vmul.f32 %v872_v17, %v4725_v16  ;;  %v888_v29 = vsel %vm856_vm6, %v886_v24, %v887_v25  ;;  %v920_v49 = vmul.f32 %v914_v28, %v4725_v16  ;;  %v4784_v24 = vld [vmem:[#allocation2] sm:$0xfc] }
 0x100   : > { %v4709_v8 = vld [vmem:[#allocation2 + $0x18] sm:$0xff]  ;;  %v930_v45 = vsel %vm856_vm6, %v928_v41, %v929_v42  ;;  %v1064_v30 = vmul.f32 %v1062_v21, %v4784_v24 }
 0x101   : > { %833 = vrot.lane.b32.xlu2 %v824_v5, %s7127_s19  ;;  %773 = vrot.lane.b32.xlu0 %v765_v6, %s7125_s17  ;;  %v739_v9 = vmul.f32 %v734_v56, %v4709_v8  ;;  %v768_v12 = vmul.f32 %v763_v3, %v4709_v8  ;;  %v797_v19 = vmul.f32 %v792_v59, %v4709_v8  ;;  %v892_v26 = vrot.slane %v878_v23, 1  ;;  %v4736_v27 = vld [vmem:[#allocation2 + $0x28] sm:$0x1]  ;;  %v956_v56 = vpop.permute.xlu0 %955 }
 0x102   : > { %775 = vrot.lane.b32.xlu1 %v766_v7, %s7125_s17  ;;  %v826_v33 = vmul.f32 %v821_v4, %v4709_v8  ;;  %v877_v34 = vmul.f32 %v872_v17, %v4709_v8  ;;  %v879_v35 = vmul.f32 %v872_v17, %v4736_v27  ;;  %v919_v46 = vmul.f32 %v914_v28, %v4709_v8 }
 0x103   : > { %v893_v32 = vsel %vm856_vm6, %v887_v25, %v892_v26  ;;  %v921_v47 = vmul.f32 %v914_v28, %v4736_v27  ;;  %v934_v54 = vrot.slane %v920_v49, 1  ;;  %v962_v59 = vmul.f32 %v956_v56, %v4725_v16 }
 0x104   : > { %v890_v39 = vrot.slane %v877_v34, 1  ;;  %v894_v40 = vrot.slane %v879_v35, 1  ;;  %v932_v51 = vrot.slane %v919_v46, 1  ;;  %v961_v62 = vmul.f32 %v956_v56, %v4709_v8  ;;  %v1056_v46 = vld [vmem:[#allocation2 + $0x8] sm:$0xfc] }
 0x105   : > { %v936_v52 = vrot.slane %v921_v47, 1  ;;  %v935_v63 = vsel %vm856_vm6, %v929_v42, %v934_v54  ;;  %v960_v0 = vmul.f32 %v956_v56, %v4694_v61  ;;  %v958_v1 = vmul.f32 %v956_v56, %v4723_v15  ;;  %v4803_v42 = vpop.permute.xlu1 %1145 }
 0x106   : > { %v895_v44 = vsel %vm856_vm6, %v890_v39, %v894_v40  ;;  %v891_v48 = vsel %vm856_vm6, %v889_v43, %v890_v39  ;;  %v933_v57 = vsel %vm856_vm6, %v931_v55, %v932_v51  ;;  %v959_v2 = vmul.f32 %v956_v56, %v4745_v36  ;;  %v4799_v40 = vld [vmem:[#allocation2 + $0x20] sm:$0x3]  ;;  %v4805_v43 = vld [vmem:[#allocation2 + $0x28] sm:$0x3] }
 0x107   : > { %v937_v58 = vsel %vm856_vm6, %v932_v51, %v936_v52  ;;  %v976_v3 = vrot.slane %v962_v59, 1  ;;  %v974_v4 = vrot.slane %v961_v62, 1  ;;  %v971_v5 = vrot.slane %v960_v0, 1 }
 0x108   : > { %v970_v6 = vrot.slane %v958_v1, 1  ;;  %v973_v7 = vrot.slane %v959_v2, 1  ;;  %v1003_v26 = vmul.f32 %v998_v53, %v4709_v8  ;;  %v1001_v34 = vmul.f32 %v998_v53, %v4745_v36 }
 0x109   : > { %750 = vrot.lane.b32.xlu2 %v739_v9, %s4400_s9  ;;  %804 = vrot.lane.b32.xlu0 %v795_v10, %s4399_s27  ;;  %v4772_v9 = vpop.permute.xlu2 %1187  ;;  %v1000_v10 = vmul.f32 %v998_v53, %v4723_v15  ;;  %v1076_v39 = vrot.slane %v1064_v30, 2  ;;  %v4801_v41 = vpop.permute.xlu0 %1103  ;;  %v1069_v50 = vmul.f32 %v1062_v21, %v4805_v43  ;;  %v1065_v51 = vmul.f32 %v1062_v21, %v1056_v46 }
 0x10a   : > { %831 = vrot.lane.b32.xlu1 %v823_v11, %s7127_s19  ;;  %v1002_v11 = vmul.f32 %v998_v53, %v4694_v61  ;;  %v972_v17 = vsel %vm856_vm6, %v970_v6, %v971_v5  ;;  %v1016_v35 = vrot.slane %v1003_v26, 1  ;;  %v1106_v0 = vmul.f32 %v4801_v41, %v4784_v24 }
 0x10b   : > { %v1084_v55 = vrot.slane %v1069_v50, 2  ;;  %v1108_v1 = vmul.f32 %v4801_v41, %v4694_v61  ;;  %v1191_v30 = vmul.f32 %v4772_v9, %v1056_v46 }
 0x10c   : > { %v1013_v20 = vrot.slane %v1002_v11, 1 }
 0x10d   : > { %v4821_v59 = vpop.permute.xlu1 %1293  ;;  %v1119_v11 = vrot.slane %v1108_v1, 2 }
 0x111   : > { %779 = vrot.lane.b32.xlu0 %v768_v12, %s7125_s17  ;;  %777 = vrot.lane.b32.xlu2 %v767_v13, %s7125_s17  ;;  %v977_v12 = vsel %vm856_vm6, %v971_v5, %v976_v3  ;;  %v975_v13 = vsel %vm856_vm6, %v973_v7, %v974_v4  ;;  %v1148_v3 = vmul.f32 %v4803_v42, %v4784_v24 }
 0x112   : > { %748 = vrot.lane.b32.xlu1 %v738_v14, %s4400_s9  ;;  %v1004_v14 = vmul.f32 %v998_v53, %v4725_v16  ;;  %v1107_v5 = vmul.f32 %v4801_v41, %v1056_v46 }
 0x115   : > { %v4865_v26 = vpop.permute.xlu1 %1441 }
 0x119   : > { %835 = vrot.lane.b32.xlu0 %v825_v18, %s7127_s19  ;;  %808 = vrot.lane.b32.xlu2 %v797_v19, %s4399_s27  ;;  %v963_v18 = vmul.f32 %v956_v56, %v4736_v27  ;;  %v1012_v19 = vrot.slane %v1000_v10, 1  ;;  %v1079_v56 = vrot.slane %v1065_v51, 2  ;;  %v1118_v10 = vrot.slane %v1106_v0, 2 }
 0x11a   : > { %806 = vrot.lane.b32.xlu1 %v796_v22, %s4399_s27  ;;  %v1018_v22 = vrot.slane %v1004_v14, 1  ;;  %v1121_v14 = vrot.slane %v1107_v5, 2  ;;  %v1152_v0 = vmul.f32 %v4803_v42, %v4799_v40 }
 0x11b   : > { %v978_v23 = vrot.slane %v963_v18, 1  ;;  %v1014_v25 = vsel %vm856_vm6, %v1012_v19, %v1013_v20  ;;  %v1120_v19 = vsel %vm1046_vm7, %v1118_v10, %v1119_v11 }
 0x11c   : > { %v1019_v28 = vsel %vm856_vm6, %v1013_v20, %v1018_v22  ;;  %v4850_v20 = vmul.f32 %v4772_v9, %v4694_v61 }
 0x11d   : > { %v4901_v51 = vpop.permute.xlu1 %1567 }
 0x121   : > { %896 = vrot.lane.b32.xlu0 %v888_v29, %s4400_s9  ;;  %900 = vrot.lane.b32.xlu2 %v893_v32, %s4400_s9  ;;  %v1005_v29 = vmul.f32 %v998_v53, %v4736_v27  ;;  %v4792_v32 = vpop.permute.xlu2 %1335  ;;  %v1077_v27 = vrot.slane %v1066_v31, 2 }
 0x122   : > { %837 = vrot.lane.b32.xlu1 %v826_v33, %s7127_s19  ;;  %v979_v33 = vsel %vm856_vm6, %v974_v4, %v978_v23  ;;  %v4837_v4 = vmul.f32 %v4803_v42, %v4694_v61 }
 0x123   : > { %v1020_v37 = vrot.slane %v1005_v29, 1  ;;  %v1078_v36 = vsel %vm1046_vm7, %v1076_v39, %v1077_v27  ;;  %v4875_v39 = vld [vmem:[#allocation2] sm:$0xf8] }
 0x125   : > { %v1021_v47 = vsel %vm856_vm6, %v1016_v35, %v1020_v37 }
 0x129   : > { %902 = vrot.lane.b32.xlu0 %v895_v44, %s4400_s9  ;;  %938 = vrot.lane.b32.xlu2 %v930_v45, %s7125_s17  ;;  %v1015_v44 = vrot.slane %v1001_v34, 1  ;;  %v1068_v45 = vmul.f32 %v1062_v21, %v4799_v40  ;;  %v4816_v52 = vpop.permute.xlu2 %1483 }
 0x12a   : > { %898 = vrot.lane.b32.xlu1 %v891_v48, %s4400_s9  ;;  %v1067_v48 = vmul.f32 %v1062_v21, %v4709_v8  ;;  %v4854_v21 = vmul.f32 %v4803_v42, %v4709_v8 }
 0x12b   : > { %v1017_v49 = vsel %vm856_vm6, %v1015_v44, %v1016_v35  ;;  %v1082_v53 = vrot.slane %v1068_v45, 2 }
 0x12c   : > { %v1080_v54 = vrot.slane %v1067_v48, 2  ;;  %v1164_v34 = vrot.slane %v4854_v21, 2  ;;  %v1296_v21 = vmul.f32 %v4821_v59, %v4875_v39 }
 0x12e   : > { %v1081_v62 = vsel %vm1046_vm7, %v1079_v56, %v1080_v54  ;;  %v1085_v2 = vsel %vm1046_vm7, %v1080_v54, %v1084_v55 }
 0x131   : > { %940 = vrot.lane.b32.xlu0 %v933_v57, %s7125_s17  ;;  %944 = vrot.lane.b32.xlu2 %v937_v58, %s7125_s17  ;;  %v4818_v57 = vpop.permute.xlu0 %1251  ;;  %v1083_v58 = vsel %vm1046_vm7, %v1077_v27, %v1082_v53  ;;  %v1205_v27 = vrot.slane %v1191_v30, 2  ;;  %v1194_v30 = vmul.f32 %v4772_v9, %v4799_v40 }
 0x132   : > { %942 = vrot.lane.b32.xlu1 %v935_v63, %s7125_s17  ;;  %v1109_v63 = vmul.f32 %v4801_v41, %v4709_v8  ;;  %v1254_v48 = vmul.f32 %v4818_v57, %v4875_v39  ;;  %v4912_v1 = vmul.f32 %v4818_v57, %v4709_v8 }
 0x134   : > { %v1122_v7 = vrot.slane %v1109_v63, 2  ;;  %v1266_v55 = vrot.slane %v1254_v48, 3  ;;  %v1208_v48 = vrot.slane %v1194_v30, 2 }
 0x136   : > { %v1123_v18 = vsel %vm1046_vm7, %v1121_v14, %v1122_v7 }
 0x139   : > { %984 = vrot.lane.b32.xlu0 %v977_v12, %s4399_s27  ;;  %982 = vrot.lane.b32.xlu2 %v975_v13, %s4399_s27  ;;  %v1160_v12 = vrot.slane %v1148_v3, 2  ;;  %v1161_v13 = vrot.slane %v4837_v4, 2  ;;  %v4856_v22 = vpop.permute.xlu0 %1377  ;;  %v1153_v3 = vmul.f32 %v4803_v42, %v4805_v43 }
 0x13a   : > { %980 = vrot.lane.b32.xlu1 %v972_v17, %s4399_s27  ;;  %v1190_v17 = vmul.f32 %v4772_v9, %v4784_v24 }
 0x13b   : > { %v1162_v23 = vsel %vm1046_vm7, %v1160_v12, %v1161_v13  ;;  %v1270_v12 = vrot.slane %v4912_v1, 3  ;;  %v1168_v14 = vrot.slane %v1153_v3, 2 }
 0x13c   : > { %v1202_v31 = vrot.slane %v1190_v17, 2 }
 0x141   : > { %1022 = vrot.lane.b32.xlu0 %v1014_v25, %s7127_s19  ;;  %1026 = vrot.lane.b32.xlu2 %v1019_v28, %s7127_s19  ;;  %v4863_v25 = vmul.f32 %v4772_v9, %v4709_v8  ;;  %v1149_v28 = vmul.f32 %v4803_v42, %v1056_v46  ;;  %v1111_v46 = vmul.f32 %v4801_v41, %v4805_v43  ;;  %v4897_v50 = vpop.permute.xlu0 %1525 }
 0x142   : > { %986 = vrot.lane.b32.xlu1 %v979_v33, %s4399_s27  ;;  %v1203_v33 = vrot.slane %v4850_v20, 2 }
 0x143   : > { %v1206_v35 = vrot.slane %v4863_v25, 2  ;;  %v1163_v37 = vrot.slane %v1149_v28, 2  ;;  %v1126_v53 = vrot.slane %v1111_v46, 2  ;;  %v1169_v28 = vsel %vm1046_vm7, %v1164_v34, %v1168_v14 }
 0x144   : > { %v1204_v44 = vsel %vm1046_vm7, %v1202_v31, %v1203_v33  ;;  %v4949_v31 = vld [vmem:[#allocation10] ss:$0 sm:$0xff]  ;;  %v1308_v46 = vrot.slane %v1296_v21, 3 }
 0x145   : > { %v1165_v45 = vsel %vm1046_vm7, %v1163_v37, %v1164_v34 }
 0x149   : > { %1028 = vrot.lane.b32.xlu0 %v1021_v47, %s7127_s19  ;;  %1086 = vrot.lane.b32.xlu2 %v1078_v36, %s4400_s9  ;;  %v1110_v47 = vmul.f32 %v4801_v41, %v4799_v40  ;;  %v1207_v36 = vsel %vm1046_vm7, %v1205_v27, %v1206_v35 }
 0x14a   : > { %1024 = vrot.lane.b32.xlu1 %v1017_v49, %s7127_s19  ;;  %v4894_v49 = vmul.f32 %v4818_v57, %v4694_v61 }
 0x14b   : > { %v1124_v54 = vrot.slane %v1110_v47, 2  ;;  %v4955_v47 = vld [vmem:[#allocation10 + $0x5] ss:$0 sm:$0xff] }
 0x14c   : > { %v1267_v56 = vrot.slane %v4894_v49, 3  ;;  %v5071_v49 = vmul.f32 %v4865_v26, %v4709_v8 }
 0x14d   : > { %v1125_v63 = vsel %vm1046_vm7, %v1119_v11, %v1124_v54  ;;  %v1166_v11 = vrot.slane %v1152_v0, 2  ;;  %v1338_v54 = vmul.f32 %v4792_v32, %v4875_v39  ;;  %v1195_v0 = vmul.f32 %v4772_v9, %v4805_v43 }
 0x14e   : > { %v1209_v9 = vsel %vm1046_vm7, %v1203_v33, %v1208_v48  ;;  %v4988_v43 = vmul.f32 %v4792_v32, %v4709_v8 }
 0x14f   : > { %v1167_v42 = vsel %vm1046_vm7, %v1161_v13, %v1166_v11 }
 0x150   : > { %v1354_v30 = vrot.slane %v4988_v43, 3 }
 0x151   : > { %1090 = vrot.lane.b32.xlu0 %v1083_v58, %s4400_s9  ;;  %1088 = vrot.lane.b32.xlu2 %v1081_v62, %s4400_s9  ;;  %v4904_v58 = vld [vmem:[#allocation2 + $0x8] sm:$0xf8]  ;;  %v1127_v62 = vsel %vm1046_vm7, %v1122_v7, %v1126_v53 }
 0x152   : > { %1092 = vrot.lane.b32.xlu1 %v1085_v2, %s4400_s9  ;;  %v1268_v2 = vsel %vm1236_vm8, %v1266_v55, %v1267_v56  ;;  %v1255_v4 = vmul.f32 %v4818_v57, %v4904_v58  ;;  %v1297_v13 = vmul.f32 %v4821_v59, %v4904_v58  ;;  %v4962_v55 = vmul.f32 %v4792_v32, %v4694_v61 }
 0x153   : > { %v4841_v6 = vpop.permute.xlu2 %802  ;;  %v1339_v20 = vmul.f32 %v4792_v32, %v4904_v58 }
 0x154   : > { %v1269_v17 = vrot.slane %v1255_v4, 3  ;;  %v4977_v4 = vmul.f32 %v4955_v47, %v4694_v61  ;;  %v1351_v11 = vrot.slane %v4962_v55, 3 }
 0x155   : > { %v1353_v48 = vrot.slane %v1339_v20, 3 }
 0x156   : > { %v858_v21 = vrot.slane %v4977_v4, 1 }
 0x157   : > { %v1355_v25 = vsel %vm1236_vm8, %v1353_v48, %v1354_v30 }
 0x159   : > { %1130 = vrot.lane.b32.xlu0 %v1123_v18, %s7125_s17  ;;  %1128 = vrot.lane.b32.xlu2 %v1120_v19, %s7125_s17  ;;  %v4929_v18 = vmul.f32 %v4821_v59, %v4709_v8  ;;  %v1271_v19 = vsel %vm1236_vm8, %v1269_v17, %v1270_v12 }
 0x15a   : > { %1170 = vrot.lane.b32.xlu1 %v1162_v23, %s4399_s27  ;;  %v4939_v23 = vmul.f32 %v4821_v59, %v4694_v61 }
 0x15b   : > { %v4869_v29 = vpop.permute.xlu2 %833 }
 0x15c   : > { %v1309_v34 = vrot.slane %v4939_v23, 3 }
 0x15e   : > { %v1310_v3 = vsel %vm1236_vm8, %v1308_v46, %v1309_v34 }
 0x161   : > { %1212 = vrot.lane.b32.xlu0 %v1204_v44, %s7127_s19  ;;  %1172 = vrot.lane.b32.xlu2 %v1165_v45, %s4399_s27  ;;  %v1312_v44 = vrot.slane %v4929_v18, 3 }
 0x162   : > { %1214 = vrot.lane.b32.xlu1 %v1207_v36, %s7127_s19  ;;  %v1311_v36 = vrot.slane %v1297_v13, 3 }
 0x163   : > { %v4899_v41 = vpop.permute.xlu2 %750 }
 0x169   : > { %1134 = vrot.lane.b32.xlu0 %v1127_v62, %s7125_s17  ;;  %1132 = vrot.lane.b32.xlu2 %v1125_v63, %s7125_s17  ;;  %v726_v62 = vmul.f32 %v4949_v31, %v4691_v60  ;;  %v1313_v63 = vsel %vm1236_vm8, %v1311_v36, %v1312_v44  ;;  %v850_v60 = vmul.f32 %v4955_v47, %v4723_v15 }
 0x16a   : > { %1276 = vrot.lane.b32.xlu1 %v1268_v2, %s4400_s9 }
 0x16b   : > { %v745_v5 = vpop.permute.xlu0 %744  ;;  %v4924_v7 = vpop.permute.xlu2 %777 }
 0x16c   : > { %v747_v10 = vpop.permute.xlu1 %746 }
 0x16d   : > { %v753_v53 = vsel %vm752_vm9, %v745_v5, %v747_v10  ;;  %v1350_v10 = vrot.slane %v1338_v54, 3  ;;  %v1380_v54 = vmul.f32 %v4856_v22, %v4875_v39 }
 0x16e   : > { %v757_v5 = vadd.f32 %v753_v53, %v726_v62  ;;  %v5012_v53 = vmul.f32 %v4856_v22, %v4709_v8 }
 0x16f   : > { %v1352_v36 = vsel %vm1236_vm8, %v1350_v10, %v1351_v11 }
 0x171   : > { %1174 = vrot.lane.b32.xlu0 %v1167_v42, %s4399_s27  ;;  %1278 = vrot.lane.b32.xlu2 %v1271_v19, %s4400_s9  ;;  %v1210_v42 = vrot.slane %v1195_v0, 2  ;;  %v1381_v0 = vmul.f32 %v4856_v22, %v4904_v58 }
 0x172   : > { %1176 = vrot.lane.b32.xlu1 %v1169_v28, %s4399_s27  ;;  %v857_v28 = vrot.slane %v850_v60, 1 }
 0x173   : > { %v774_v37 = vpop.permute.xlu0 %773  ;;  %v4951_v27 = vpop.permute.xlu2 %808 }
 0x174   : > { %v776_v45 = vpop.permute.xlu1 %775  ;;  %v859_v62 = vsel %vm856_vm6, %v857_v28, %v858_v21 }
 0x175   : > { %v782_v2 = vsel %vm781_vm10, %v774_v37, %v776_v45  ;;  %v5002_v45 = vld [vmem:[#allocation2 + $0x20] sm:$0x7] }
 0x176   : > { %v786_v15 = vadd.f32 %v782_v2, %v757_v5  ;;  %v1396_v5 = vrot.slane %v5012_v53, 3  ;;  %v5186_v53 = vmul.f32 %v4897_v50, %v4709_v8 }
 0x179   : > { %1320 = vrot.lane.b32.xlu0 %v1313_v63, %s7125_s17  ;;  %1318 = vrot.lane.b32.xlu2 %v1310_v3, %s7125_s17 }
 0x17a   : > { %1216 = vrot.lane.b32.xlu1 %v1209_v9, %s7127_s19  ;;  %v1392_v9 = vrot.slane %v1380_v54, 3  ;;  %v5065_v54 = vld [vmem:[#allocation2] sm:$0xf0] }
 0x17b   : > { %v805_v14 = vpop.permute.xlu0 %804  ;;  %v4992_v17 = vpop.permute.xlu2 %900 }
 0x17c   : > { %v832_v33 = vpop.permute.xlu1 %831  ;;  %v811_v19 = vsel %vm810_vm11, %v4841_v6, %v805_v14  ;;  %v1211_v6 = vsel %vm1046_vm7, %v1206_v35, %v1210_v42  ;;  %v1258_v35 = vmul.f32 %v4818_v57, %v5002_v45  ;;  %v1247_v14 = vld [vmem:[#allocation2 + $0x28] sm:$0x7]  ;;  %v1395_v42 = vrot.slane %v1381_v0, 3 }
 0x17d   : > { %v815_v13 = vadd.f32 %v811_v19, %v786_v15  ;;  %v840_v37 = vsel %vm839_vm12, %v832_v33, %v4869_v29  ;;  %v5018_v29 = vmul.f32 %v4856_v22, %v4694_v61  ;;  %v1300_v33 = vmul.f32 %v4821_v59, %v5002_v45 }
 0x17e   : > { %v1272_v15 = vrot.slane %v1258_v35, 3  ;;  %v1397_v20 = vsel %vm1236_vm8, %v1395_v42, %v1396_v5  ;;  %v1259_v19 = vmul.f32 %v4818_v57, %v1247_v14  ;;  %v5083_v35 = vmul.f32 %v4865_v26, %v4694_v61 }
 0x17f   : > { %v844_v46 = vadd.f32 %v840_v37, %v815_v13  ;;  %v1393_v10 = vrot.slane %v5018_v29, 3  ;;  %v1301_v13 = vmul.f32 %v4821_v59, %v1247_v14 }
 0x180   : > { %v1273_v28 = vsel %vm1236_vm8, %v1267_v56, %v1272_v15  ;;  %v1274_v57 = vrot.slane %v1259_v19, 3  ;;  %v1457_v18 = vrot.slane %v5083_v35, 4  ;;  %v1486_v19 = vmul.f32 %v4816_v52, %v5065_v54 }
 0x181   : > { %1360 = vrot.lane.b32.xlu0 %v1352_v36, %s4399_s27  ;;  %1218 = vrot.lane.b32.xlu2 %v1211_v6, %s7127_s19  ;;  %v5030_v63 = vadd.f32 %v859_v62, %v844_v46  ;;  %v1394_v58 = vsel %vm1236_vm8, %v1392_v9, %v1393_v10  ;;  %v1314_v6 = vrot.slane %v1300_v33, 3  ;;  %v1316_v48 = vrot.slane %v1301_v13, 3  ;;  %v5067_v62 = vld [vmem:[#allocation2 + $0x8] sm:$0xf0] }
 0x182   : > { %1362 = vrot.lane.b32.xlu1 %v1355_v25, %s4399_s27  ;;  %v1275_v56 = vsel %vm1236_vm8, %v1270_v12, %v1274_v57  ;;  %v1444_v25 = vmul.f32 %v4865_v26, %v5065_v54  ;;  %v1445_v1 = vmul.f32 %v4865_v26, %v5067_v62  ;;  %v1342_v12 = vmul.f32 %v4792_v32, %v5002_v45 }
 0x183   : > { %v5035_v2 = vpop.permute.xlu0 %779  ;;  %v5037_v3 = vpop.permute.xlu2 %938  ;;  %v1315_v59 = vsel %vm1236_vm8, %v1309_v34, %v1314_v6  ;;  %v1317_v23 = vsel %vm1236_vm8, %v1312_v44, %v1316_v48  ;;  %v1460_v9 = vrot.slane %v5071_v49, 4  ;;  %v1343_v13 = vmul.f32 %v4792_v32, %v1247_v14 }
 0x184   : > { %v5039_v60 = vpop.permute.xlu1 %748  ;;  %v1456_v42 = vrot.slane %v1444_v25, 4  ;;  %v1459_v44 = vrot.slane %v1445_v1, 4  ;;  %v5123_v57 = vmul.f32 %v4816_v52, %v4709_v8  ;;  %v1487_v32 = vmul.f32 %v4816_v52, %v5067_v62 }
 0x185   : > { %v1498_v25 = vrot.slane %v1486_v19, 4  ;;  %v1571_v29 = vmul.f32 %v4901_v51, %v5067_v62 }
 0x186   : > { %v1458_v33 = vsel %vm1426_vm13, %v1456_v42, %v1457_v18  ;;  %v1501_v1 = vrot.slane %v1487_v32, 4  ;;  %v1384_v42 = vmul.f32 %v4856_v22, %v5002_v45 }
 0x189   : > { %1404 = vrot.lane.b32.xlu0 %v1397_v20, %s7127_s19  ;;  %1402 = vrot.lane.b32.xlu2 %v1394_v58, %s7127_s19  ;;  %v1356_v20 = vrot.slane %v1342_v12, 3  ;;  %v1461_v58 = vsel %vm1426_vm13, %v1459_v44, %v1460_v9  ;;  %v1385_v12 = vmul.f32 %v4856_v22, %v1247_v14 }
 0x18a   : > { %1280 = vrot.lane.b32.xlu1 %v1273_v28, %s4400_s9  ;;  %v5113_v28 = vmul.f32 %v4816_v52, %v4694_v61 }
 0x18b   : > { %v5059_v37 = vpop.permute.xlu0 %835  ;;  %v5061_v46 = vpop.permute.xlu2 %944  ;;  %v1357_v6 = vsel %vm1236_vm8, %v1351_v11, %v1356_v20  ;;  %v1502_v11 = vrot.slane %v5123_v57, 4  ;;  %v1400_v14 = vrot.slane %v1385_v12, 3  ;;  %v5174_v12 = vmul.f32 %v4901_v51, %v4694_v61 }
 0x18c   : > { %v5063_v36 = vpop.permute.xlu1 %806  ;;  %v1499_v55 = vrot.slane %v5113_v28, 4 }
 0x18d   : > { %v1503_v22 = vsel %vm1426_vm13, %v1501_v1, %v1502_v11  ;;  %v1401_v1 = vsel %vm1236_vm8, %v1396_v5, %v1400_v14  ;;  %v5194_v5 = vmul.f32 %v4901_v51, %v4709_v8  ;;  %v1583_v14 = vrot.slane %v5174_v12, 4 }
 0x18e   : > { %v1500_v44 = vsel %vm1426_vm13, %v1498_v25, %v1499_v55  ;;  %v754_v25 = vsel %vm752_vm9, %v5039_v60, %v4899_v41  ;;  %v812_v8 = vsel %vm810_vm11, %v5063_v36, %v4951_v27 }
 0x191   : > { %1322 = vrot.lane.b32.xlu0 %v1315_v59, %s7125_s17  ;;  %1282 = vrot.lane.b32.xlu2 %v1275_v56, %s4400_s9 }
 0x192   : > { %1324 = vrot.lane.b32.xlu1 %v1317_v23, %s7125_s17  ;;  %v1358_v23 = vrot.slane %v1343_v13, 3  ;;  %v1398_v13 = vrot.slane %v1384_v42, 3 }
 0x193   : > { %v5095_v34 = vpop.permute.xlu0 %896  ;;  %v5097_v0 = vpop.permute.xlu2 %982 }
 0x194   : > { %v5100_v15 = vpop.permute.xlu1 %837  ;;  %v1359_v20 = vsel %vm1236_vm8, %v1354_v30, %v1358_v23  ;;  %v727_v23 = vmul.f32 %v4949_v31, %v4694_v61  ;;  %v1399_v42 = vsel %vm1236_vm8, %v1393_v10, %v1398_v13  ;;  %v1529_v31 = vmul.f32 %v4897_v50, %v5067_v62 }
 0x195   : > { %v852_v10 = vmul.f32 %v4955_v47, %v4725_v16  ;;  %v783_v13 = vsel %vm781_vm10, %v4924_v7, %v5035_v2  ;;  %v5211_v16 = vld [vmem:[#allocation2 + $0x20] sm:$0xf]  ;;  %v841_v7 = vsel %vm839_vm12, %v5059_v37, %v5100_v15  ;;  %v4014_v15 = vld [vmem:[#allocation10 + $0xa] ss:$0 sm:$0xff] }
 0x196   : > { %v758_v60 = vadd.f32 %v754_v25, %v727_v23  ;;  %v1544_v25 = vrot.slane %v5186_v53, 4  ;;  %v5209_v23 = vld [vmem:[#allocation2 + $0x28] sm:$0xf]  ;;  %v1448_v36 = vmul.f32 %v4865_v26, %v5211_v16  ;;  %v1041_v4 = vmul.f32 %v4014_v15, %v4694_v61 }
 0x197   : > { %v1449_v27 = vmul.f32 %v4865_v26, %v5209_v23 }
 0x198   : > { %v787_v47 = vadd.f32 %v783_v13, %v758_v60  ;;  %v1490_v60 = vmul.f32 %v4816_v52, %v5211_v16  ;;  %v1462_v13 = vrot.slane %v1448_v36, 4  ;;  %v1042_v36 = vmul.f32 %v4014_v15, %v4799_v40 }
 0x199   : > { %1468 = vrot.lane.b32.xlu0 %v1461_v58, %s4400_s9  ;;  %1466 = vrot.lane.b32.xlu2 %v1458_v33, %s4400_s9  ;;  %v1528_v58 = vmul.f32 %v4897_v50, %v5065_v54  ;;  %v5149_v33 = vmul.f32 %v4897_v50, %v4694_v61 }
 0x19a   : > { %1364 = vrot.lane.b32.xlu1 %v1357_v6, %s4399_s27  ;;  %v816_v2 = vadd.f32 %v812_v8, %v787_v47 }
 0x19b   : > { %v5126_v48 = vpop.permute.xlu0 %902  ;;  %v5128_v59 = vpop.permute.xlu2 %1026  ;;  %v1540_v6 = vrot.slane %v1528_v58, 4  ;;  %v1541_v32 = vrot.slane %v5149_v33, 4 }
 0x19c   : > { %v5132_v56 = vpop.permute.xlu1 %898  ;;  %v845_v37 = vadd.f32 %v841_v7, %v816_v2  ;;  %v1504_v7 = vrot.slane %v1490_v60, 4 }
 0x19d   : > { %v1542_v41 = vsel %vm1426_vm13, %v1540_v6, %v1541_v32  ;;  %v1543_v6 = vrot.slane %v1529_v31, 4 }
 0x19e   : > { %v1505_v40 = vsel %vm1426_vm13, %v1499_v55, %v1504_v7 }
 0x19f   : > { %v1545_v31 = vsel %vm1426_vm13, %v1543_v6, %v1544_v25  ;;  %v905_v6 = vsel %vm752_vm9, %v4992_v17, %v5126_v48 }
 0x1a1   : > { %1508 = vrot.lane.b32.xlu0 %v1500_v44, %s7125_s17  ;;  %1366 = vrot.lane.b32.xlu2 %v1359_v20, %s4399_s27  ;;  %v1570_v44 = vmul.f32 %v4901_v51, %v5065_v54 }
 0x1a2   : > { %1510 = vrot.lane.b32.xlu1 %v1503_v22, %s7125_s17 }
 0x1a3   : > { %v5157_v43 = vpop.permute.xlu0 %940  ;;  %v5159_v30 = vpop.permute.xlu2 %1086  ;;  %v1582_v22 = vrot.slane %v1570_v44, 4  ;;  %v1586_v44 = vrot.slane %v5194_v5, 4 }
 0x1a4   : > { %v943_v19 = vpop.permute.xlu1 %942  ;;  %v946_v48 = vsel %vm781_vm10, %v5037_v3, %v5157_v43 }
 0x1a9   : > { %1408 = vrot.lane.b32.xlu0 %v1401_v1, %s7127_s19  ;;  %1406 = vrot.lane.b32.xlu2 %v1399_v42, %s7127_s19  ;;  %v1585_v1 = vrot.slane %v1571_v29, 4  ;;  %v860_v42 = vrot.slane %v852_v10, 1 }
 0x1aa   : > { %1550 = vrot.lane.b32.xlu1 %v1542_v41, %s4399_s27  ;;  %v1584_v41 = vsel %vm1426_vm13, %v1582_v22, %v1583_v14  ;;  %v1464_v22 = vrot.slane %v1449_v27, 4  ;;  %v947_v27 = vsel %vm781_vm10, %v943_v19, %v5061_v46  ;;  %v1491_v19 = vmul.f32 %v4816_v52, %v5209_v23 }
 0x1ab   : > { %v985_v20 = vpop.permute.xlu0 %984  ;;  %v5199_v58 = vpop.permute.xlu2 %1088  ;;  %v1587_v26 = vsel %vm1426_vm13, %v1585_v1, %v1586_v44  ;;  %v861_v8 = vsel %vm856_vm6, %v858_v21, %v860_v42  ;;  %v904_v1 = vsel %vm752_vm9, %v5095_v34, %v5132_v56  ;;  %v1532_v21 = vmul.f32 %v4897_v50, %v5211_v16 }
 0x1ac   : > { %v981_v62 = vpop.permute.xlu1 %980  ;;  %v865_v2 = vadd.f32 %v861_v8, %v845_v37  ;;  %v1465_v34 = vsel %vm1426_vm13, %v1460_v9, %v1464_v22  ;;  %v908_v46 = vadd.f32 %v904_v1, %v5030_v63  ;;  %v1533_v63 = vmul.f32 %v4897_v50, %v5209_v23 }
 0x1ad   : > { %v988_v49 = vsel %vm810_vm11, %v981_v62, %v5097_v0  ;;  %v1050_v9 = vrot.slane %v1042_v36, 2  ;;  %v1048_v52 = vrot.slane %v1041_v4, 2  ;;  %v1546_v42 = vrot.slane %v1532_v21, 4 }
 0x1ae   : > { %v909_v17 = vadd.f32 %v905_v6, %v865_v2  ;;  %v950_v35 = vadd.f32 %v946_v48, %v908_v46  ;;  %v1548_v50 = vrot.slane %v1533_v63, 4  ;;  %v1575_v8 = vmul.f32 %v4901_v51, %v5209_v23 }
 0x1af   : > { %v1094_v5 = vsel %vm752_vm9, %v5159_v30, %v5199_v58 }
 0x1b0   : > { %v951_v3 = vadd.f32 %v947_v27, %v909_v17  ;;  %v1549_v23 = vsel %vm1426_vm13, %v1544_v25, %v1548_v50  ;;  %v1590_v2 = vrot.slane %v1575_v8, 4  ;;  %v1953_v25 = vld [vmem:[#allocation15 + $0x2] ss:$8 sm:$0x3]  ;;  %v4015_v27 = vld [vmem:[#allocation10 + $0xf] ss:$0 sm:$0xff] }
 0x1b1   : > { %1592 = vrot.lane.b32.xlu0 %v1584_v41, %s7127_s19  ;;  %1552 = vrot.lane.b32.xlu2 %v1545_v31, %s4399_s27  ;;  %v1040_v41 = vmul.f32 %v4014_v15, %v4784_v24  ;;  %v1463_v24 = vsel %vm1426_vm13, %v1457_v18, %v1462_v13  ;;  %v1506_v31 = vrot.slane %v1491_v19, 4  ;;  %v1051_v15 = vsel %vm1046_vm7, %v1048_v52, %v1050_v9 }
 0x1b2   : > { %1594 = vrot.lane.b32.xlu1 %v1587_v26, %s7127_s19  ;;  %v1956_v36 = vperm.slane %v1953_v25, 1  ;;  %v1230_v17 = vmul.f32 %v4015_v27, %v4875_v39  ;;  %v5319_v48 = vmul.f32 %v4015_v27, %v4694_v61 }
 0x1b3   : > { %v1023_v29 = vpop.permute.xlu0 %1022  ;;  %v5235_v10 = vpop.permute.xlu2 %1128  ;;  %v1047_v43 = vrot.slane %v1040_v41, 2 }
 0x1b4   : > { %v987_v47 = vpop.permute.xlu1 %986  ;;  %v1238_v46 = vrot.slane %v5319_v48, 3  ;;  %v1635_v48 = vld [vmem:[%s7108_s5 + $0xa8] sm:$0xff] }
 0x1b5   : > { %v989_v56 = vsel %vm810_vm11, %v985_v20, %v987_v47  ;;  %v992_v20 = vadd.f32 %v988_v49, %v950_v35  ;;  %v1049_v22 = vsel %vm1046_vm7, %v1047_v43, %v1048_v52  ;;  %v1574_v47 = vmul.f32 %v4901_v51, %v5211_v16  ;;  %1763 = vmatpush.msrb.mxu1 %v1635_v48 }
 0x1b6   : > { %v993_v18 = vadd.f32 %v989_v56, %v951_v3  ;;  %v1591_v51 = vsel %vm1426_vm13, %v1586_v44, %v1590_v2  ;;  %v5325_v56 = vld [vmem:[#allocation15 + $0x4] ss:$8 sm:$0x3] }
 0x1b7   : > { %v2055_v49 = vperm.slane %v5325_v56, 0 }
 0x1b9   : > { %1472 = vrot.lane.b32.xlu0 %v1465_v34, %s4400_s9  ;;  %1470 = vrot.lane.b32.xlu2 %v1463_v24, %s4400_s9  ;;  %v2002_v24 = vld [vmem:[#allocation15 + $0x3] ss:$8 sm:$0x3] }
 0x1ba   : > { %1512 = vrot.lane.b32.xlu1 %v1505_v40, %s7125_s17  ;;  %v2005_v61 = vperm.slane %v2002_v24, 1 }
 0x1bb   : > { %v1029_v28 = vpop.permute.xlu0 %1028  ;;  %v1173_v55 = vpop.permute.xlu2 %1172 }
 0x1bc   : > { %v1031_v0 = vsel %vm839_vm12, %v5128_v59, %v1029_v28  ;;  %v1025_v62 = vpop.permute.xlu1 %1024  ;;  %v1547_v59 = vsel %vm1426_vm13, %v1541_v32, %v1546_v42  ;;  %v1903_v32 = vld [vmem:[#allocation15 + $0x1] ss:$8 sm:$0x3] }
 0x1bd   : > { %v1035_v60 = vadd.f32 %v1031_v0, %v993_v18  ;;  %v1030_v37 = vsel %vm839_vm12, %v1023_v29, %v1025_v62  ;;  %v1507_v29 = vsel %vm1426_vm13, %v1502_v11, %v1506_v31  ;;  %v1588_v11 = vrot.slane %v1574_v47, 4  ;;  %v2145_v18 = vld [vmem:[#allocation15 + $0x6] ss:$8 sm:$0x3] }
 0x1be   : > { %v1034_v26 = vadd.f32 %v1030_v37, %v992_v20  ;;  %v1905_v1 = vperm.slane %v1903_v32, 0  ;;  %v2147_v43 = vperm.slane %v2145_v18, 0  ;;  %v2148_v52 = vperm.slane %v2145_v18, 1  ;;  %v5340_v0 = vld [vmem:[#allocation15 + $0x7] ss:$8 sm:$0x3] }
 0x1bf   : > { %v5281_v13 = vadd.f32 %v1051_v15, %v1035_v60  ;;  %v1589_v53 = vsel %vm1426_vm13, %v1583_v14, %v1588_v11  ;;  %v1955_v14 = vperm.slane %v1953_v25, 0  ;;  %v1906_v42 = vperm.slane %v1903_v32, 1  ;;  %v5342_v31 = vld [vmem:[#allocation15 + $0x10] ss:$8 sm:$0x3]  ;;  %v1671_v18 = vld [vmem:[%s7109_s6 + $0x108] sm:$0xff] }
 0x1c0   : > { %v1054_v6 = vadd.f32 %v1049_v22, %v1034_v26  ;;  %v2218_v50 = vperm.slane %v5340_v0, 1  ;;  %v2287_v26 = vperm.slane %v5342_v31, 0  ;;  %v1232_v22 = vmul.f32 %v4015_v27, %v5002_v45  ;;  %v1681_v27 = vld [vmem:[%s7109_s6 + $0x158] sm:$0xff] }
 0x1c1   : > { %1554 = vrot.lane.b32.xlu0 %v1547_v59, %s4399_s27  ;;  %1514 = vrot.lane.b32.xlu2 %v1507_v29, %s7125_s17  ;;  %v2355_v29 = vld [vmem:[#allocation15 + $0x11] ss:$8 sm:$0x3]  ;;  %v2004_v45 = vperm.slane %v2002_v24, 0  ;;  %s7200_s17 = sld [smem:[#allocation45_spill]] }
 0x1c2   : > { %1556 = vrot.lane.b32.xlu1 %v1549_v23, %s4399_s27  ;;  %v1098_v21 = vadd.f32 %v1094_v5, %v1054_v6  ;;  %v2357_v2 = vperm.slane %v2355_v29, 0  ;;  %v1682_v5 = vld [vmem:[%s7109_s6 + $0x160] sm:$0xff] }
 0x1c3   : > { %v1091_v33 = vpop.permute.xlu0 %1090  ;;  %v5299_v7 = vpop.permute.xlu2 %1132 }
 0x1c4   : > { %v1093_v57 = vpop.permute.xlu1 %1092 }
 0x1c5   : > { %v1095_v37 = vsel %vm752_vm9, %v1091_v33, %v1093_v57  ;;  %v1240_v33 = vrot.slane %v1232_v22, 3 }
 0x1c6   : > { %v1099_v8 = vadd.f32 %v1095_v37, %v5281_v13  ;;  %v2358_v13 = vperm.slane %v2355_v29, 1 }
 0x1c7   : > { %v1241_v25 = vsel %vm1236_vm8, %v1238_v46, %v1240_v33  ;;  %v1662_v33 = vld [vmem:[%s7109_s6 + $0xc0] sm:$0xff] }
 0x1c9   : > { %1598 = vrot.lane.b32.xlu0 %v1591_v51, %s7127_s19  ;;  %1596 = vrot.lane.b32.xlu2 %v1589_v53, %s7127_s19  ;;  %v1684_v51 = vld [vmem:[%s7109_s6 + $0x170] sm:$0xff]  ;;  %v1685_v53 = vld [vmem:[%s7109_s6 + $0x178] sm:$0xff]  ;;  %s7202_s19 = sld [smem:[#allocation47_spill]] }
 0x1ca   : > { %1907 = vrot.lane.b32.xlu1 %v1905_v1, %s4396_s24  ;;  %v1683_v1 = vld [vmem:[%s7109_s6 + $0x168] sm:$0xff]  ;;  %1709 = vmatpush.msra.mxu3 %v1684_v51 }
 0x1cb   : > { %v1131_v41 = vpop.permute.xlu0 %1130  ;;  %v5315_v12 = vpop.permute.xlu2 %1278  ;;  %1686 = vmatpush.msra.mxu2 %v1683_v1  ;;  %1732 = vmatpush.msrb.mxu0 %v1685_v53  ;;  %v1659_v53 = vld [vmem:[%s7109_s6 + $0xa8] sm:$0xff] }
 0x1cc   : > { %v1171_v4 = vpop.permute.xlu1 %1170  ;;  %v1136_v44 = vsel %vm781_vm10, %v5235_v10, %v1131_v41  ;;  %v1237_v10 = vrot.slane %v1230_v17, 3  ;;  %v1680_v41 = vld [vmem:[%s7109_s6 + $0x150] sm:$0xff]  ;;  %1710 = vmatpush.msra.mxu3 %v1681_v27  ;;  %v1674_v17 = vld [vmem:[%s7109_s6 + $0x120] sm:$0xff] }
 0x1cd   : > { %v1140_v34 = vadd.f32 %v1136_v44, %v1098_v21  ;;  %v1178_v30 = vsel %vm810_vm11, %v1171_v4, %v1173_v55  ;;  %v1677_v44 = vld [vmem:[%s7109_s6 + $0x138] sm:$0xff]  ;;  %1687 = vmatpush.msra.mxu2 %v1680_v41  ;;  %v1678_v21 = vld [vmem:[%s7109_s6 + $0x140] sm:$0xff]  ;;  %1733 = vmatpush.msrb.mxu0 %v1682_v5  ;;  %v1620_v41 = vld [vmem:[%s7108_s5 + $0x30] sm:$0xff] }
 0x1ce   : > { %v1239_v35 = vsel %vm1236_vm8, %v1237_v10, %v1238_v46  ;;  %v5405_v10 = vld [vmem:[#allocation15 + $0x14] ss:$8 sm:$0x3]  ;;  %1711 = vmatpush.msra.mxu3 %v1678_v21 }
 0x1cf   : > { %v1182_v40 = vadd.f32 %v1178_v30, %v1140_v34  ;;  %v5399_v34 = vld [vmem:[#allocation15 + $0x13] ss:$8 sm:$0x3]  ;;  %1688 = vmatpush.msra.mxu2 %v1677_v44  ;;  %v1675_v30 = vld [vmem:[%s7109_s6 + $0x128] sm:$0xff]  ;;  %v1658_v44 = vld [vmem:[%s7109_s6 + $0xa0] sm:$0xff]  ;;  %s3654_s27 = scalar_lea.hbm %s7202_s19, %s3845_s7 }
 0x1d0   : > { %1712 = vmatpush.msra.mxu3 %v1675_v30  ;;  %v1656_v27 = vld [vmem:[%s7109_s6 + $0x90] sm:$0xff]  ;;  %v1657_v5 = vld [vmem:[%s7109_s6 + $0x98] sm:$0xff]  ;;  %v1655_v30 = vld [vmem:[%s7109_s6 + $0x88] sm:$0xff]  ;;  %s3658_s28 = sshll.u32 %s3654_s27, 4  ;;  %s3659_s28 = int_to_ptr.hbm [resolvable:$true] %s3658_s28 }
 0x1d1   : > { %1957 = vrot.lane.b32.xlu0 %v1955_v14, %s4397_s25  ;;  %1909 = vrot.lane.b32.xlu2 %v1906_v42, %s4396_s24  ;;  %v5384_v14 = vld [vmem:[#allocation10 + $0x14] ss:$0 sm:$0xff]  ;;  %v1629_v42 = vld [vmem:[%s7108_s5 + $0x78] sm:$0xff]  ;;  %s4312_s20 = sshra.s32 %s3659_s28, 4  ;;  %s4313_s20 = int_to_ptr.hbm [resolvable:$true] %s4312_s20 }
 0x1d2   : > { %1959 = vrot.lane.b32.xlu1 %v1956_v36, %s4397_s25  ;;  %v1679_v36 = vld [vmem:[%s7109_s6 + $0x148] sm:$0xff]  ;;  %1689 = vmatpush.msra.mxu2 %v1674_v17  ;;  %v1653_v17 = vld [vmem:[%s7109_s6 + $0x78] sm:$0xff]  ;;  %p4319_p12 = scmp.lt.s32.totalorder %s4313_s20, %s7202_s19 }
 0x1d3   : > { %v1213_v58 = vpop.permute.xlu0 %1212  ;;  %v5329_v63 = vpop.permute.xlu2 %1318  ;;  %1734 = vmatpush.msrb.mxu0 %v1679_v36  ;;  %v1617_v36 = vld [vmem:[%s7108_s5 + $0x18] sm:$0xff] }
 0x1d4   : > { %v1215_v19 = vpop.permute.xlu1 %1214  ;;  %1690 = vmatpush.msra.mxu2 %v1671_v18 }
 0x1d5   : > { %v1220_v39 = vsel %vm839_vm12, %v1213_v58, %v1215_v19  ;;  %v2056_v58 = vperm.slane %v5325_v56, 1  ;;  %v1676_v19 = vld [vmem:[%s7109_s6 + $0x130] sm:$0xff] }
 0x1d6   : > { %v1224_v3 = vadd.f32 %v1220_v39, %v1182_v40  ;;  %1735 = vmatpush.msrb.mxu0 %v1676_v19  ;;  %v5538_v19 = vld [vmem:[#allocation15 + $0x20] ss:$8 sm:$0x3] }
 0x1d7   : > { %v2793_v18 = vperm.slane %v5538_v19, 0 }
 0x1d8   : > { %v5332_v9 = vadd.f32 %v1239_v35, %v1224_v3  ;;  %v1420_v3 = vmul.f32 %v5384_v14, %v5065_v54  ;;  %v2540_v35 = vperm.slane %v5405_v10, 0 }
 0x1d9   : > { %2008 = vrot.lane.b32.xlu0 %v2005_v61, %s4403_s13  ;;  %2006 = vrot.lane.b32.xlu2 %v2004_v45, %s4403_s13  ;;  %v2471_v61 = vperm.slane %v5399_v34, 1  ;;  %v2217_v45 = vperm.slane %v5340_v0, 0  ;;  %v1660_v0 = vld [vmem:[%s7109_s6 + $0xb0] sm:$0xff] }
 0x1da   : > { %2057 = vrot.lane.b32.xlu1 %v2055_v49, %s4404_s26 }
 0x1db   : > { %v1135_v28 = vpop.permute.xlu0 %1134  ;;  %v1219_v20 = vpop.permute.xlu2 %1218 }
 0x1dc   : > { %v5336_v55 = vpop.permute.xlu1 %1276  ;;  %v1137_v15 = vsel %vm781_vm10, %v5299_v7, %v1135_v28  ;;  %v1672_v28 = vld [vmem:[%s7109_s6 + $0x110] sm:$0xff] }
 0x1dd   : > { %v1141_v59 = vadd.f32 %v1137_v15, %v1099_v8  ;;  %v1284_v46 = vsel %vm752_vm9, %v5336_v55, %v5315_v12  ;;  %v4018_v12 = vld [vmem:[#allocation2 + $0x10] sm:$0xff]  ;;  %1713 = vmatpush.msra.mxu3 %v1672_v28  ;;  %v1667_v8 = vld [vmem:[%s7109_s6 + $0xe8] sm:$0xff] }
 0x1de   : > { %v5421_v49 = vmul.f32 %v4018_v12, %v5384_v14  ;;  %v1288_v54 = vadd.f32 %v1284_v46, %v5332_v9  ;;  %v1632_v55 = vld [vmem:[%s7108_s5 + $0x90] sm:$0xff]  ;;  %v1614_v46 = vld [vmem:[%s7108_s5] sm:$0xff] }
 0x1df   : > { %1764 = vmatpush.msrb.mxu1 %v1632_v55  ;;  %v1649_v55 = vld [vmem:[%s7109_s6 + $0x58] sm:$0xff] }
 0x1e0   : > { %v1428_v37 = vrot.slane %v5421_v49, 4 }
 0x1e1   : > { %2149 = vrot.lane.b32.xlu0 %v2147_v43, %s4396_s24  ;;  %2059 = vrot.lane.b32.xlu2 %v2056_v58, %s4404_s26  ;;  %v5530_v58 = vld [vmem:[#allocation15 + $0x16] ss:$8 sm:$0x3] }
 0x1e2   : > { %2151 = vrot.lane.b32.xlu1 %v2148_v52, %s4396_s24  ;;  %v1668_v52 = vld [vmem:[%s7109_s6 + $0xf0] sm:$0xff]  ;;  %1765 = vmatpush.msrb.mxu1 %v1629_v42  ;;  %v2681_v12 = vperm.slane %v5530_v58, 1  ;;  %v1646_v42 = vld [vmem:[%s7109_s6 + $0x40] sm:$0xff]  ;;  %v2680_v49 = vperm.slane %v5530_v58, 0 }
 0x1e3   : > { %v1175_v62 = vpop.permute.xlu0 %1174  ;;  %v5355_v47 = vpop.permute.xlu2 %1402  ;;  %1691 = vmatpush.msra.mxu2 %v1668_v52  ;;  %v1633_v52 = vld [vmem:[%s7108_s5 + $0x98] sm:$0xff] }
 0x1e4   : > { %v1177_v60 = vpop.permute.xlu1 %1176 }
 0x1e5   : > { %v1179_v6 = vsel %vm810_vm11, %v1175_v62, %v1177_v60  ;;  %v1670_v62 = vld [vmem:[%s7109_s6 + $0x100] sm:$0xff]  ;;  %v1427_v60 = vrot.slane %v1420_v3, 4  ;;  %v1636_v3 = vld [vmem:[%s7108_s5 + $0xb0] sm:$0xff] }
 0x1e6   : > { %v1183_v32 = vadd.f32 %v1179_v6, %v1141_v59  ;;  %v1626_v6 = vld [vmem:[%s7108_s5 + $0x60] sm:$0xff]  ;;  %v2608_v59 = vld [vmem:[#allocation15 + $0x15] ss:$8 sm:$0x3] }
 0x1e7   : > { %1766 = vmatpush.msrb.mxu1 %v1626_v6  ;;  %v1638_v6 = vld [vmem:[%s7109_s6] sm:$0xff] }
 0x1e9   : > { %2221 = vrot.lane.b32.xlu0 %v2218_v50, %s4397_s25  ;;  %v1665_v50 = vld [vmem:[%s7109_s6 + $0xd8] sm:$0xff]  ;;  %2219 = vrot.lane.b32.xlu2 %v2217_v45, %s4397_s25  ;;  %v5614_v45 = vld [vmem:[%s4635_s12 + $0x8] sm:$0xff] }
 0x1ea   : > { %2289 = vrot.lane.b32.xlu1 %v2287_v26, %s4403_s13  ;;  %v1666_v26 = vld [vmem:[%s7109_s6 + $0xe0] sm:$0xff]  ;;  %1692 = vmatpush.msra.mxu2 %v1665_v50  ;;  %v1641_v50 = vld [vmem:[%s7109_s6 + $0x18] sm:$0xff] }
 0x1eb   : > { %v1321_v23 = vpop.permute.xlu0 %1320  ;;  %v5413_v39 = vpop.permute.xlu2 %1282 }
 0x1ec   : > { %v1217_v57 = vpop.permute.xlu1 %1216  ;;  %v1326_v56 = vsel %vm781_vm10, %v5329_v63, %v1321_v23  ;;  %v1673_v63 = vld [vmem:[%s7109_s6 + $0x118] sm:$0xff]  ;;  %1693 = vmatpush.msra.mxu2 %v1662_v33  ;;  %v1624_v33 = vld [vmem:[%s7108_s5 + $0x50] sm:$0xff] }
 0x1ed   : > { %v1221_v7 = vsel %vm839_vm12, %v1217_v57, %v1219_v20  ;;  %v1669_v20 = vld [vmem:[%s7109_s6 + $0xf8] sm:$0xff]  ;;  %v1330_v9 = vadd.f32 %v1326_v56, %v1288_v54  ;;  %1736 = vmatpush.msrb.mxu0 %v1673_v63  ;;  %v1652_v56 = vld [vmem:[%s7109_s6 + $0x70] sm:$0xff]  ;;  %v1647_v54 = vld [vmem:[%s7109_s6 + $0x48] sm:$0xff] }
 0x1ee   : > { %v1225_v11 = vadd.f32 %v1221_v7, %v1183_v32  ;;  %1714 = vmatpush.msra.mxu3 %v1669_v20  ;;  %v1663_v32 = vld [vmem:[%s7109_s6 + $0xc8] sm:$0xff]  ;;  %v1664_v7 = vld [vmem:[%s7109_s6 + $0xd0] sm:$0xff]  ;;  %1694 = vmatpush.msra.mxu2 %v1659_v53  ;;  %v1618_v53 = vld [vmem:[%s7108_s5 + $0x20] sm:$0xff] }
 0x1ef   : > { %1737 = vmatpush.msrb.mxu0 %v1670_v62  ;;  %v5555_v63 = vld [vmem:[%s4635_s12] sm:$0xff]  ;;  %v1644_v20 = vld [vmem:[%s7109_s6 + $0x30] sm:$0xff]  ;;  %s7201_s12 = sld [smem:[#allocation46_spill]] }
 0x1f0   : > { %v5375_v4 = vadd.f32 %v1241_v25, %v1225_v11  ;;  %1715 = vmatpush.msra.mxu3 %v1666_v26  ;;  %v1429_v11 = vsel %vm1426_vm13, %v1427_v60, %v1428_v37  ;;  %v1661_v25 = vld [vmem:[%s7109_s6 + $0xb8] sm:$0xff]  ;;  %1695 = vmatpush.msra.mxu2 %v1656_v27  ;;  %v1630_v60 = vld [vmem:[%s7108_s5 + $0x80] sm:$0xff] }
 0x1f1   : > { %2359 = vrot.lane.b32.xlu0 %v2357_v2, %s4404_s26  ;;  %v2610_v2 = vperm.slane %v2608_v59, 0  ;;  %1738 = vmatpush.msrb.mxu0 %v1667_v8  ;;  %v1645_v62 = vld [vmem:[%s7109_s6 + $0x38] sm:$0xff]  ;;  %v1642_v26 = vld [vmem:[%s7109_s6 + $0x20] sm:$0xff]  ;;  %v1627_v8 = vld [vmem:[%s7108_s5 + $0x68] sm:$0xff] }
 0x1f2   : > { %2361 = vrot.lane.b32.xlu1 %v2358_v13, %s4404_s26  ;;  %v2611_v13 = vperm.slane %v2608_v59, 1  ;;  %1716 = vmatpush.msra.mxu3 %v1663_v32  ;;  %v1639_v59 = vld [vmem:[%s7109_s6 + $0x8] sm:$0xff] }
 0x1f3   : > { %v1361_v24 = vpop.permute.xlu0 %1360  ;;  %v5486_v1 = vpop.permute.xlu2 %1466  ;;  %1739 = vmatpush.msrb.mxu0 %v1664_v7  ;;  %1696 = vmatpush.msra.mxu2 %v1653_v17  ;;  %v5641_v27 = vld [vmem:[#allocation15 + $0x23] ss:$8 sm:$0x3] }
 0x1f4   : > { %v1363_v40 = vpop.permute.xlu1 %1362  ;;  %1717 = vmatpush.msra.mxu3 %v1660_v0 }
 0x1f5   : > { %v1368_v43 = vsel %vm810_vm11, %v1361_v24, %v1363_v40  ;;  %1740 = vmatpush.msrb.mxu0 %v1661_v25  ;;  %v1654_v24 = vld [vmem:[%s7109_s6 + $0x80] sm:$0xff]  ;;  %v1422_v25 = vmul.f32 %v5384_v14, %v5211_v16  ;;  %v2541_v14 = vperm.slane %v5405_v10, 1  ;;  %v1637_v10 = vld [vmem:[%s7108_s5 + $0xb8] sm:$0xff] }
 0x1f6   : > { %v1372_v15 = vadd.f32 %v1368_v43, %v1330_v9  ;;  %1718 = vmatpush.msra.mxu3 %v1657_v5  ;;  %v1650_v40 = vld [vmem:[%s7109_s6 + $0x60] sm:$0xff] }
 0x1f7   : > { %1741 = vmatpush.msrb.mxu0 %v1658_v44  ;;  %1697 = vmatpush.msra.mxu2 %v1650_v40 }
 0x1f8   : > { %1719 = vmatpush.msra.mxu3 %v1654_v24 }
 0x1f9   : > { %2474 = vrot.lane.b32.xlu0 %v2471_v61, %s4396_s24  ;;  %v1651_v61 = vld [vmem:[%s7109_s6 + $0x68] sm:$0xff]  ;;  %1742 = vmatpush.msrb.mxu0 %v1655_v30 }
 0x1fa   : > { %2542 = vrot.lane.b32.xlu1 %v2540_v35, %s4397_s25  ;;  %v2288_v35 = vperm.slane %v5342_v31, 1  ;;  %1720 = vmatpush.msra.mxu3 %v1651_v61  ;;  %v1648_v31 = vld [vmem:[%s7109_s6 + $0x50] sm:$0xff]  ;;  %v1634_v61 = vld [vmem:[%s7108_s5 + $0xa0] sm:$0xff] }
 0x1fb   : > { %v1405_v22 = vpop.permute.xlu0 %1404  ;;  %v5552_v28 = vpop.permute.xlu2 %1366  ;;  %1743 = vmatpush.msrb.mxu0 %v1652_v56  ;;  %1698 = vmatpush.msra.mxu2 %v1647_v54 }
 0x1fc   : > { %v1410_v29 = vsel %vm839_vm12, %v5355_v47, %v1405_v22  ;;  %v5468_v23 = vpop.permute.xlu1 %1280  ;;  %v1623_v47 = vld [vmem:[%s7108_s5 + $0x48] sm:$0xff]  ;;  %2291 = vrot.lane.b32.xlu2 %v2288_v35, %s4403_s13  ;;  %1721 = vmatpush.msra.mxu3 %v1648_v31 }
 0x1fd   : > { %v1414_v57 = vadd.f32 %v1410_v29, %v1372_v15  ;;  %1767 = vmatpush.msrb.mxu1 %v1623_v47  ;;  %1744 = vmatpush.msrb.mxu0 %v1649_v55  ;;  %v1643_v15 = vld [vmem:[%s7109_s6 + $0x28] sm:$0xff]  ;;  %v1640_v29 = vld [vmem:[%s7109_s6 + $0x10] sm:$0xff] }
 0x1fe   : > { %1699 = vmatpush.msra.mxu2 %v1644_v20  ;;  %v2861_v22 = vld [vmem:[#allocation15 + $0x21] ss:$8 sm:$0x3]  ;;  %1722 = vmatpush.msra.mxu3 %v1645_v62 }
 0x1ff   : > { %v5488_v51 = vadd.f32 %v1429_v11, %v1414_v57  ;;  %1768 = vmatpush.msrb.mxu1 %v1620_v41  ;;  %1745 = vmatpush.msrb.mxu0 %v1646_v42  ;;  %v2863_v32 = vperm.slane %v2861_v22, 0  ;;  %v2470_v57 = vperm.slane %v5399_v34, 0  ;;  %v2864_v7 = vperm.slane %v2861_v22, 1  ;;  %v1621_v11 = vld [vmem:[%s7108_s5 + $0x38] sm:$0xff]  ;;  %v1615_v41 = vld [vmem:[%s7108_s5 + $0x8] sm:$0xff]  ;;  %v1622_v62 = vld [vmem:[%s7108_s5 + $0x40] sm:$0xff] }
 0x200   : > { %1700 = vmatpush.msra.mxu2 %v1641_v50  ;;  %1723 = vmatpush.msra.mxu3 %v1642_v26  ;;  %v1631_v35 = vld [vmem:[%s7108_s5 + $0x88] sm:$0xff] }
 0x201   : > { %2612 = vrot.lane.b32.xlu0 %v2610_v2, %s4403_s13  ;;  %1769 = vmatpush.msrb.mxu1 %v1617_v36  ;;  %v3003_v36 = vperm.slane %v5641_v27, 0  ;;  %v3254_v26 = vld [vmem:[#allocation15 + $0x27] ss:$8 sm:$0x3] }
 0x202   : > { %2614 = vrot.lane.b32.xlu1 %v2611_v13, %s4403_s13  ;;  %1746 = vmatpush.msrb.mxu0 %v1643_v15  ;;  %v1285_v13 = vsel %vm752_vm9, %v5468_v23, %v5413_v39  ;;  %v5635_v39 = vld [vmem:[#allocation15 + $0x22] ss:$8 sm:$0x3] }
 0x203   : > { %v5514_v21 = vpop.permute.xlu0 %1322  ;;  %1770 = vmatpush.msrb.mxu1 %v1614_v46  ;;  %1701 = vmatpush.msra.mxu2 %v1638_v6  ;;  %v1407_v47 = vpop.permute.xlu2 %1406  ;;  %v1289_v23 = vadd.f32 %v1285_v13, %v5375_v4  ;;  %v2934_v16 = vperm.slane %v5635_v39, 1  ;;  %v1619_v15 = vld [vmem:[%s7108_s5 + $0x28] sm:$0xff] }
 0x204   : > { %v5522_v48 = vpop.permute.xlu1 %1324  ;;  %3834 = vmatmul.msk.f32.vlgmr.msrb.gmra.mxu1 %vm634_vm0, %v5555_v63  ;;  %1724 = vmatpush.msra.mxu3 %v1639_v59  ;;  %v2794_v59 = vperm.slane %v5538_v19, 1 }
 0x205   : > { %1786 = vmatpush.msra.mxu1 %v1636_v3  ;;  %1747 = vmatpush.msrb.mxu0 %v1640_v29  ;;  %v1327_v0 = vsel %vm781_vm10, %v5514_v21, %v5522_v48  ;;  %v1430_v21 = vrot.slane %v1422_v25, 4  ;;  %v3256_v29 = vperm.slane %v3254_v26, 0 }
 0x206   : > { %2472 = vrot.lane.b32.xlu2 %v2470_v57, %s4396_s24  ;;  %v1331_v44 = vadd.f32 %v1327_v0, %v1289_v23  ;;  %1809 = vmatpush.msrb.mxu2 %v1637_v10  ;;  %v1616_v57 = vld [vmem:[%s7108_s5 + $0x10] sm:$0xff] }
 0x207   : > { %1787 = vmatpush.msra.mxu1 %v1633_v52  ;;  %v1431_v56 = vsel %vm1426_vm13, %v1428_v37, %v1430_v21  ;;  %v1628_v37 = vld [vmem:[%s7108_s5 + $0x70] sm:$0xff] }
 0x208   : > { %1810 = vmatpush.msrb.mxu2 %v1634_v61 }
 0x209   : > { %2684 = vrot.lane.b32.xlu0 %v2681_v12, %s4404_s26  ;;  %1788 = vmatpush.msra.mxu1 %v1630_v60  ;;  %v3184_v60 = vld [vmem:[#allocation15 + $0x26] ss:$8 sm:$0x3] }
 0x20a   : > { %2795 = vrot.lane.b32.xlu1 %v2793_v18, %s4396_s24  ;;  %1811 = vmatpush.msrb.mxu2 %v1631_v35 }
 0x20b   : > { %v5568_v43 = vpop.permute.xlu0 %1468  ;;  %1789 = vmatpush.msra.mxu1 %v1627_v8  ;;  %v1553_v46 = vpop.permute.xlu2 %1552  ;;  %v3187_v8 = vperm.slane %v3184_v60, 1 }
 0x20c   : > { %v1365_v9 = vpop.permute.xlu1 %1364  ;;  %3835 = vmatmul.msk.f32.gmra.mxu1 %vm634_vm0, %v5614_v45  ;;  %v1474_v30 = vsel %vm752_vm9, %v5486_v1, %v5568_v43  ;;  %v3114_v1 = vld [vmem:[#allocation15 + $0x25] ss:$8 sm:$0x3]  ;;  %1812 = vmatpush.msrb.mxu2 %v1628_v37 }
 0x20d   : > { %1790 = vmatpush.msra.mxu1 %v1624_v33  ;;  %v1369_v5 = vsel %vm810_vm11, %v1365_v9, %v5552_v28  ;;  %v1478_v18 = vadd.f32 %v1474_v30, %v5488_v51  ;;  %v3116_v54 = vperm.slane %v3114_v1, 0  ;;  %v3117_v55 = vperm.slane %v3114_v1, 1  ;;  %v4017_v51 = vld [vmem:[#allocation12] ss:$0 sm:$0xff] }
 0x20e   : > { %v1373_v4 = vadd.f32 %v1369_v5, %v1331_v44  ;;  %2544 = vrot.lane.b32.xlu2 %v2541_v14, %s4397_s25  ;;  %v1625_v9 = vld [vmem:[%s7108_s5 + $0x58] sm:$0xff]  ;;  %v3004_v5 = vperm.slane %v5641_v27, 1 }
 0x20f   : > { %1791 = vmatpush.msra.mxu1 %v1621_v11  ;;  %1813 = vmatpush.msrb.mxu2 %v1625_v9  ;;  %v2933_v11 = vperm.slane %v5635_v39, 0 }
 0x211   : > { %2865 = vrot.lane.b32.xlu0 %v2863_v32, %s4397_s25  ;;  %1792 = vmatpush.msra.mxu1 %v1618_v53 }
 0x212   : > { %2867 = vrot.lane.b32.xlu1 %v2864_v7, %s4397_s25  ;;  %1814 = vmatpush.msrb.mxu2 %v1622_v62  ;;  %v3324_v7 = vld [vmem:[#allocation15 + $0x30] ss:$8 sm:$0x3] }
 0x213   : > { %v1509_v2 = vpop.permute.xlu0 %1508  ;;  %1793 = vmatpush.msra.mxu1 %v1615_v41  ;;  %v1471_v50 = vpop.permute.xlu2 %1470  ;;  %v3327_v13 = vperm.slane %v3324_v7, 1 }
 0x214   : > { %v1511_v34 = vpop.permute.xlu1 %1510  ;;  %3836 = vmatmul.msk.f32.vlgmr.msra.gmra.mxu1 %vm634_vm0, %v5555_v63  ;;  %1815 = vmatpush.msrb.mxu2 %v1619_v15 }
 0x215   : > { %v1516_v3 = vsel %vm781_vm10, %v1509_v2, %v1511_v34 }
 0x216   : > { %v1520_v31 = vadd.f32 %v1516_v3, %v1478_v18  ;;  %2682 = vrot.lane.b32.xlu2 %v2680_v49, %s4404_s26  ;;  %1816 = vmatpush.msrb.mxu2 %v1616_v57 }
 0x219   : > { %2937 = vrot.lane.b32.xlu0 %v2934_v16, %s4403_s13 }
 0x21a   : > { %3005 = vrot.lane.b32.xlu1 %v3003_v36, %s4404_s26 }
 0x21b   : > { %v1409_v17 = vpop.permute.xlu0 %1408  ;;  %v1515_v19 = vpop.permute.xlu2 %1514 }
 0x21c   : > { %v1411_v48 = vsel %vm839_vm12, %v1407_v47, %v1409_v17  ;;  %v1551_v24 = vpop.permute.xlu1 %1550  ;;  %3837 = vmatmul.msk.f32.gmra.mxu1 %vm634_vm0, %v5614_v45  ;;  %v3326_v47 = vperm.slane %v3324_v7, 0  ;;  %v3186_v17 = vperm.slane %v3184_v60, 0 }
 0x21d   : > { %v1415_v40 = vadd.f32 %v1411_v48, %v1373_v4  ;;  %v1558_v28 = vsel %vm810_vm11, %v1551_v24, %v1553_v46  ;;  %v3257_v48 = vperm.slane %v3254_v26, 1 }
 0x21e   : > { %v1562_v52 = vadd.f32 %v1558_v28, %v1520_v31  ;;  %2797 = vrot.lane.b32.xlu2 %v2794_v59, %s4396_s24 }
 0x21f   : > { %v1435_v12 = vadd.f32 %v1431_v56, %v1415_v40  ;;  %v5718_v40 = vld [vmem:[#allocation13] sm:$0x7] }
 0x220   : > { %v1827_v1 = vperm.slane %v5718_v40, 1 }
 0x221   : > { %3118 = vrot.lane.b32.xlu0 %v3116_v54, %s4396_s24 }
 0x222   : > { %3120 = vrot.lane.b32.xlu1 %v3117_v55, %s4396_s24  ;;  %s7169_s24 = smov 96  }
 0x223   : > { %v1593_v43 = vpop.permute.xlu0 %1592  ;;  %v1597_v44 = vpop.permute.xlu2 %1596 }
 0x224   : > { %v1595_v20 = vpop.permute.xlu1 %1594 }
 0x225   : > { %v1600_v58 = vsel %vm839_vm12, %v1593_v43, %v1595_v20 }
 0x226   : > { %v1604_v42 = vadd.f32 %v1600_v58, %v1562_v52  ;;  %2935 = vrot.lane.b32.xlu2 %v2933_v11, %s4403_s13 }
 0x228   : > { %v1610_v22 = vadd.f32 %v4017_v51, %v1604_v42 }
 0x229   : > { %3190 = vrot.lane.b32.xlu0 %v3187_v8, %s4397_s25 }
 0x22a   : > { %v1612_v6 = vmax.f32 %v1610_v22, 0.0  ;;  %3258 = vrot.lane.b32.xlu1 %v3256_v29, %s4403_s13 }
 0x22b   : > { %v1473_v33 = vpop.permute.xlu0 %1472  ;;  %v5714_v24 = vpop.permute.xlu2 %1909 }
 0x22c   : > { %1702 = vmatmul.f32.vlgmr.msra.gmra.mxu2 %v1612_v6  ;;  %1725 = vmatmul.f32.vlgmr.msra.gmra.mxu3 %v1612_v6  ;;  %v1513_v32 = vpop.permute.xlu1 %1512  ;;  %v1475_v2 = vsel %vm752_vm9, %v1471_v50, %v1473_v33 }
 0x22d   : > { %1748 = vmatmul.f32.vlgmr.msrb.gmra.mxu0 %v1612_v6  ;;  %v1479_v53 = vadd.f32 %v1475_v2, %v1435_v12  ;;  %v1517_v25 = vsel %vm781_vm10, %v1513_v32, %v1515_v19 }
 0x22e   : > { %3007 = vrot.lane.b32.xlu2 %v3004_v5, %s4404_s26 }
 0x22f   : > { %v1521_v41 = vadd.f32 %v1517_v25, %v1479_v53 }
 0x231   : > { %3328 = vrot.lane.b32.xlu0 %v3326_v47, %s4404_s26 }
 0x232   : > { %3330 = vrot.lane.b32.xlu1 %v3327_v13, %s4404_s26 }
 0x233   : > { %v1555_v34 = vpop.permute.xlu0 %1554  ;;  %v5716_v46 = vpop.permute.xlu2 %2006 }
 0x234   : > { %v1557_v0 = vpop.permute.xlu1 %1556 }
 0x235   : > { %v1559_v23 = vsel %vm810_vm11, %v1555_v34, %v1557_v0 }
 0x236   : > { %v1563_v16 = vadd.f32 %v1559_v23, %v1521_v41  ;;  %3188 = vrot.lane.b32.xlu2 %v3186_v17, %s4397_s25  ;;  %s7170_s25 = smov 112   ;;  %v1828_v23 = vperm.slane %v5718_v40, 2 }
 0x23b   : > { %v1599_v39 = vpop.permute.xlu0 %1598  ;;  %v5722_v56 = vpop.permute.xlu2 %2059 }
 0x23c   : > { %v1601_v14 = vsel %vm839_vm12, %v1597_v44, %v1599_v39  ;;  %v5720_v10 = vpop.permute.xlu1 %1907 }
 0x23d   : > { %v1605_v21 = vadd.f32 %v1601_v14, %v1563_v16  ;;  %v5741_v9 = vsel %vm1911_vm15, %v5720_v10, %v5714_v24 }
 0x23e   : > { %3260 = vrot.lane.b32.xlu2 %v3257_v48, %s4403_s13  ;;  %s4405_s13 = smov 80  }
 0x23f   : > { %v1611_v36 = vadd.f32 %v4017_v51, %v1605_v21 }
 0x241   : > { %v1613_v4 = vmax.f32 %v1611_v36, 0.0 }
 0x243   : > { %1705 = vmatmul.f32.gmra.mxu2 %v1613_v4  ;;  %1728 = vmatmul.f32.gmra.mxu3 %v1613_v4  ;;  %v5726_v37 = vpop.permute.xlu0 %1957  ;;  %v5730_v52 = vpop.permute.xlu2 %2219 }
 0x244   : > { %1751 = vmatmul.f32.gmra.mxu0 %v1613_v4  ;;  %v5728_v31 = vpop.permute.xlu1 %1959 }
 0x245   : > { %v1961_v59 = vsel %vm718_vm4, %v5726_v37, %v5728_v31 }
 0x24b   : > { %3838 = vmatmul.msk.f32.vlgmr.msrb.gmra.mxu2 %vm634_vm0, %v5555_v63  ;;  %v1826_v63 = vperm.slane %v5718_v40, 0  ;;  %v5734_v20 = vpop.permute.xlu0 %2008 }
 0x24c   : > { %v5743_v58 = vpop.permute.xlu1 %2057  ;;  %v5761_v22 = vsel %vm2010_vm1, %v5716_v46, %v5734_v20 }
 0x24d   : > { %v2061_v41 = vsel %vm634_vm0, %v5743_v58, %v5722_v56 }
 0x253   : > { %3839 = vmatmul.msk.f32.gmra.mxu2 %vm634_vm0, %v5614_v45  ;;  %v5768_v57 = vpop.permute.xlu0 %2149 }
 0x254   : > { %v5771_v2 = vpop.permute.xlu1 %2151 }
 0x256   : > { %v5754_v26 = vpop.permute.xlu2 %2291 }
 0x25b   : > { %v5798_v48 = vpop.permute.xlu0 %2221 }
 0x260   : > { %v5778_v53 = vpop.permute.xlu2 %2472 }
 0x281   : > { %v1772_v27 = vpop.f32.mrf.mxu1 }
 0x289   : > { %v1775_v30 = vpop.f32.mrf.mxu1 }
 0x291   : > { %v1795_v61 = vpop.f32.mrf.mxu1 }
 0x299   : > { %v1798_v15 = vpop.f32.mrf.mxu1 }
 0x2aa   : > { %v1749_v5 = vpop.f32.mrf.mxu0 }
 0x2af   : > { %v1703_v3 = vpop.f32.mrf.mxu2  ;;  %v1726_v12 = vpop.f32.mrf.mxu3 }
 0x2b0   : > { %v1773_v45 = vadd.f32 %v1772_v27, %v1703_v3  ;;  %v1796_v35 = vadd.f32 %v1795_v61, %v1726_v12 }
 0x2b2   : > { %v1832_v18 = vadd.f32 %v1826_v63, %v1773_v45  ;;  %v1833_v28 = vadd.f32 %v1827_v1, %v1796_v35 }
 0x2b4   : > { %v1838_v54 = vmax.f32 %v1832_v18, 0.0  ;;  %v1839_v49 = vmax.f32 %v1833_v28, 0.0  ;;  %v5814_v28 = vpop.permute.xlu0 %2359 }
 0x2b6   : > { %v1858_v55 = vrot.slane %v1838_v54, 6  ;;  %v1859_v43 = vrot.slane %v1839_v49, 6 }
 0x2b8   : > { %1876 = vst [vmem:[#allocation3] sm:$0xfc] %v1858_v55 }
 0x2b9   : > { %1877 = vst [vmem:[#allocation3 + $0x8] sm:$0xfc] %v1859_v43 }
 0x2bf   : > { %v5736_v51 = vld [vmem:[#allocation3] sm:$0xff] }
 0x2c0   : > { %v1965_v62 = vmul.f32 %v5726_v37, %v5736_v51  ;;  %v5747_v42 = vld [vmem:[#allocation3 + $0x8] sm:$0xff]  ;;  %v1916_v60 = vmul.f32 %v5720_v10, %v5736_v51  ;;  %v2015_v11 = vmul.f32 %v5716_v46, %v5736_v51  ;;  %v2065_v17 = vmul.f32 %v5743_v58, %v5736_v51 }
 0x2c1   : > { %v1917_v50 = vmul.f32 %v5741_v9, %v5747_v42  ;;  %v2016_v32 = vmul.f32 %v5761_v22, %v5747_v42  ;;  %v1966_v47 = vmul.f32 %v1961_v59, %v5747_v42  ;;  %v2066_v21 = vmul.f32 %v2061_v41, %v5747_v42  ;;  %v1752_v61 = vpop.f32.mrf.mxu0 }
 0x2c2   : > { %1977 = vrot.lane.b32.xlu2 %v1965_v62, %s7169_s24  ;;  %1928 = vrot.lane.b32.xlu0 %v1916_v60, %s7170_s25  ;;  %v2153_v60 = vsel %vm1911_vm15, %v5768_v57, %v5771_v2 }
 0x2c3   : > { %1930 = vrot.lane.b32.xlu1 %v1917_v50, %s7170_s25 }
 0x2c6   : > { %v1706_v8 = vpop.f32.mrf.mxu2  ;;  %v1729_v6 = vpop.f32.mrf.mxu3 }
 0x2c7   : > { %v1776_v29 = vadd.f32 %v1775_v30, %v1706_v8  ;;  %v1799_v33 = vadd.f32 %v1798_v15, %v1729_v6  ;;  %v5801_v30 = vpop.permute.xlu1 %2289 }
 0x2c9   : > { %v1835_v7 = vadd.f32 %v1826_v63, %v1776_v29  ;;  %v1836_v19 = vadd.f32 %v1827_v1, %v1799_v33  ;;  %v5804_v1 = vpop.permute.xlu2 %2544  ;;  %v5844_v33 = vpop.permute.xlu0 %2474 }
 0x2ca   : > { %2029 = vrot.lane.b32.xlu2 %v2016_v32, %s4405_s13  ;;  %1979 = vrot.lane.b32.xlu0 %v1966_v47, %s7169_s24 }
 0x2cb   : > { %v1841_v13 = vmax.f32 %v1835_v7, 0.0  ;;  %v1842_v34 = vmax.f32 %v1836_v19, 0.0  ;;  %2027 = vrot.lane.b32.xlu1 %v2015_v11, %s4405_s13  ;;  %v5850_v19 = vld [vmem:[#allocation3] sm:$0xfe] }
 0x2cd   : > { %v1861_v0 = vrot.slane %v1841_v13, 6  ;;  %v1863_v25 = vrot.slane %v1842_v34, 6  ;;  %v5852_v13 = vld [vmem:[#allocation3 + $0x8] sm:$0xfe] }
 0x2ce   : > { %v1818_v44 = vpop.f32.mrf.mxu2 }
 0x2cf   : > { %v5785_v16 = vsel %vm701_vm3, %v1858_v55, %v1861_v0  ;;  %1883 = vst [vmem:[#allocation3 + $0x30] sm:$0x3] %v1861_v0  ;;  %v5788_v39 = vsel %vm701_vm3, %v1859_v43, %v1863_v25  ;;  %v1819_v14 = vadd.f32 %v1818_v44, %v1749_v5  ;;  %v5816_v49 = vpop.permute.xlu1 %2361 }
 0x2d0   : > { %1880 = vst [vmem:[#allocation3 + $0x18] sm:$0xff] %v5785_v16  ;;  %v1919_v4 = vmul.f32 %v5720_v10, %v5785_v16  ;;  %v1968_v3 = vmul.f32 %v5726_v37, %v5785_v16  ;;  %v1969_v12 = vmul.f32 %v1961_v59, %v5788_v39  ;;  %v1920_v35 = vmul.f32 %v5741_v9, %v5788_v39 }
 0x2d1   : > { %1881 = vst [vmem:[#allocation3 + $0x20] sm:$0xff] %v5788_v39  ;;  %v1834_v36 = vadd.f32 %v1828_v23, %v1819_v14  ;;  %v2019_v43 = vmul.f32 %v5761_v22, %v5788_v39  ;;  %v2069_v62 = vmul.f32 %v2061_v41, %v5788_v39  ;;  %v5831_v50 = vpop.permute.xlu2 %2682  ;;  %v2018_v15 = vmul.f32 %v5716_v46, %v5785_v16 }
 0x2d2   : > { %1884 = vst [vmem:[#allocation3 + $0x38] sm:$0x3] %v1863_v25  ;;  %2079 = vrot.lane.b32.xlu2 %v2066_v21, %s4404_s26  ;;  %1934 = vrot.lane.b32.xlu0 %v1919_v4, %s7170_s25  ;;  %v2160_v6 = vmul.f32 %v5768_v57, %v5785_v16  ;;  %v2161_v59 = vmul.f32 %v2153_v60, %v5788_v39  ;;  %v5871_v4 = vpop.permute.xlu0 %2612 }
 0x2d3   : > { %v1840_v27 = vmax.f32 %v1834_v36, 0.0  ;;  %2077 = vrot.lane.b32.xlu1 %v2065_v17, %s4404_s26  ;;  %v2068_v7 = vmul.f32 %v5743_v58, %v5785_v16  ;;  %v2158_v41 = vmul.f32 %v2153_v60, %v5852_v13  ;;  %v2230_v5 = vmul.f32 %v5730_v52, %v5785_v16 }
 0x2d4   : > { %v2176_v47 = vrot.slane %v2160_v6, 1  ;;  %v2179_v11 = vrot.slane %v2161_v59, 1  ;;  %v2223_v21 = vsel %vm718_vm4, %v5730_v52, %v5798_v48 }
 0x2d5   : > { %v1860_v40 = vrot.slane %v1840_v27, 6  ;;  %v2178_v36 = vrot.slane %v2158_v41, 1  ;;  %v2228_v59 = vmul.f32 %v2223_v21, %v5852_v13 }
 0x2d6   : > { %v1821_v63 = vpop.f32.mrf.mxu2  ;;  %v5820_v55 = vld [vmem:[#allocation3 + $0x30] sm:$0x1] }
 0x2d7   : > { %1879 = vst.msk [vmem:[#allocation3 + $0x10] sm:$0xfc] %vm1878_vm2, %v1860_v40  ;;  %v1822_v10 = vadd.f32 %v1821_v63, %v1752_v61  ;;  %v2163_v22 = vmul.f32 %v5768_v57, %v5820_v55  ;;  %v5846_v32 = vpop.permute.xlu1 %2542  ;;  %v2233_v25 = vmul.f32 %v5730_v52, %v5820_v55  ;;  %v2180_v61 = vsel %vm856_vm6, %v2178_v36, %v2179_v11 }
 0x2d8   : > { %v2303_v63 = vmul.f32 %v5801_v30, %v5820_v55 }
 0x2d9   : > { %v1837_v45 = vadd.f32 %v1828_v23, %v1822_v10  ;;  %v5825_v9 = vld [vmem:[#allocation3 + $0x38] sm:$0x1]  ;;  %v2184_v29 = vrot.slane %v2163_v22, 1  ;;  %v2157_v23 = vmul.f32 %v5768_v57, %v5850_v19  ;;  %v5862_v58 = vpop.permute.xlu2 %2797  ;;  %v2254_v44 = vrot.slane %v2233_v25, 1 }
 0x2da   : > { %1983 = vrot.lane.b32.xlu2 %v1968_v3, %s7169_s24  ;;  %1985 = vrot.lane.b32.xlu0 %v1969_v12, %s7169_s24  ;;  %v2164_v8 = vmul.f32 %v2153_v60, %v5825_v9  ;;  %v2246_v57 = vrot.slane %v2230_v5, 1  ;;  %v2234_v27 = vmul.f32 %v2223_v21, %v5825_v9  ;;  %v2231_v3 = vmul.f32 %v2223_v21, %v5788_v39 }
 0x2db   : > { %v1843_v18 = vmax.f32 %v1837_v45, 0.0  ;;  %1936 = vrot.lane.b32.xlu1 %v1920_v35, %s7170_s25  ;;  %v2185_v34 = vsel %vm856_vm6, %v2176_v47, %v2184_v29  ;;  %v2175_v14 = vrot.slane %v2157_v23, 1  ;;  %v2300_v12 = vmul.f32 %v5801_v30, %v5785_v16 }
 0x2dc   : > { %v2186_v46 = vrot.slane %v2164_v8, 1  ;;  %v2255_v10 = vsel %vm856_vm6, %v2246_v57, %v2254_v44  ;;  %v2227_v45 = vmul.f32 %v5730_v52, %v5850_v19  ;;  %v2256_v35 = vrot.slane %v2234_v27, 1  ;;  %v5897_v8 = vpop.permute.xlu0 %2684 }
 0x2dd   : > { %v1865_v54 = vrot.slane %v1843_v18, 6  ;;  %v2177_v17 = vsel %vm856_vm6, %v2175_v14, %v2176_v47  ;;  %v2363_v25 = vsel %vm634_vm0, %v5814_v28, %v5816_v49  ;;  %v2373_v5 = vmul.f32 %v5814_v28, %v5820_v55 }
 0x2de   : > { %v2187_v0 = vsel %vm856_vm6, %v2179_v11, %v2186_v46  ;;  %v2297_v46 = vmul.f32 %v5801_v30, %v5850_v19  ;;  %v2248_v11 = vrot.slane %v2228_v59, 1  ;;  %v2374_v44 = vmul.f32 %v2363_v25, %v5825_v9 }
 0x2df   : > { %v1866_v37 = vsel %vm701_vm3, %v1860_v40, %v1865_v54  ;;  %1885 = vst.msk [vmem:[#allocation3 + $0x40] sm:$0x3] %vm1846_vm14, %v1865_v54  ;;  %v5875_v40 = vpop.permute.xlu1 %2614  ;;  %v2324_v54 = vrot.slane %v2303_v63, 1  ;;  %v2370_v21 = vmul.f32 %v5814_v28, %v5785_v16  ;;  %v2371_v36 = vmul.f32 %v2363_v25, %v5788_v39 }
 0x2e0   : > { %1882 = vst.msk [vmem:[#allocation3 + $0x28] sm:$0xff] %vm634_vm0, %v1866_v37  ;;  %v2249_v37 = vrot.slane %v2231_v3, 1  ;;  %v2394_v27 = vrot.slane %v2373_v5, 1  ;;  %v2396_v63 = vrot.slane %v2374_v44, 1  ;;  %v2483_v5 = vmul.f32 %v5778_v53, %v5785_v16 }
 0x2e1   : > { %v5889_v18 = vpop.permute.xlu2 %2935  ;;  %v2389_v3 = vrot.slane %v2371_v36, 1  ;;  %vm1850_vm3 = vcmask 519170  }
 0x2e2   : > { %2035 = vrot.lane.b32.xlu2 %v2019_v43, %s4405_s13  ;;  %2085 = vrot.lane.b32.xlu0 %v2069_v62, %s4404_s26  ;;  %v2316_v43 = vrot.slane %v2300_v12, 1  ;;  %v2245_v62 = vrot.slane %v2227_v45, 1  ;;  %v2257_v60 = vsel %vm856_vm6, %v2249_v37, %v2256_v35  ;;  %v2250_v41 = vsel %vm856_vm6, %v2248_v11, %v2249_v37  ;;  %1851 = vst.msk [vmem:[#allocation3 + $0x40] sm:$0xc] %vm1850_vm3, %v4398_v38 }
 0x2e3   : > { %2033 = vrot.lane.b32.xlu1 %v2018_v15, %s4405_s13  ;;  %v2293_v15 = vsel %vm2010_vm1, %v5801_v30, %v5754_v26  ;;  %v2476_v35 = vsel %vm1911_vm15, %v5778_v53, %v5844_v33  ;;  %v2397_v37 = vsel %vm856_vm6, %v2389_v3, %v2396_v63  ;;  %v2499_v36 = vrot.slane %v2483_v5, 2 }
 0x2e4   : > { %v2325_v22 = vsel %vm856_vm6, %v2316_v43, %v2324_v54  ;;  %v2247_v52 = vsel %vm856_vm6, %v2245_v62, %v2246_v57  ;;  %v2304_v6 = vmul.f32 %v2293_v15, %v5825_v9  ;;  %v5926_v57 = vpop.permute.xlu0 %2865  ;;  %v2386_v9 = vrot.slane %v2370_v21, 1 }
 0x2e6   : > { %v2326_v47 = vrot.slane %v2304_v6, 1  ;;  %v2395_v45 = vsel %vm856_vm6, %v2386_v9, %v2394_v27  ;;  %v2546_v27 = vsel %vm718_vm4, %v5846_v32, %v5804_v1 }
 0x2e7   : > { %v5903_v29 = vpop.permute.xlu1 %2795 }
 0x2ea   : > { %2083 = vrot.lane.b32.xlu2 %v2068_v7, %s4404_s26  ;;  %2196 = vrot.lane.b32.xlu0 %v2185_v34, %s7170_s25  ;;  %v2301_v7 = vmul.f32 %v2293_v15, %v5788_v39  ;;  %v5909_v34 = vpop.permute.xlu2 %3007 }
 0x2eb   : > { %2198 = vrot.lane.b32.xlu1 %v2187_v0, %s7170_s25  ;;  %v2315_v0 = vrot.slane %v2297_v46, 1  ;;  %v5951_v46 = vld [vmem:[#allocation3 + $0x30] sm:$0x3] }
 0x2ec   : > { %v2319_v23 = vrot.slane %v2301_v7, 1 }
 0x2ed   : > { %v2317_v30 = vsel %vm856_vm6, %v2315_v0, %v2316_v43 }
 0x2ee   : > { %v2327_v14 = vsel %vm856_vm6, %v2319_v23, %v2326_v47  ;;  %v5955_v47 = vld [vmem:[#allocation3 + $0x8] sm:$0xfc] }
 0x2f2   : > { %2190 = vrot.lane.b32.xlu2 %v2177_v17, %s7170_s25  ;;  %2192 = vrot.lane.b32.xlu0 %v2180_v61, %s7170_s25  ;;  %v2298_v17 = vmul.f32 %v2293_v15, %v5852_v13  ;;  %v5929_v61 = vpop.permute.xlu1 %2867  ;;  %v5937_v54 = vpop.permute.xlu2 %3188  ;;  %v2368_v15 = vmul.f32 %v2363_v25, %v5852_v13  ;;  %v2486_v25 = vmul.f32 %v5778_v53, %v5951_v46 }
 0x2f3   : > { %2266 = vrot.lane.b32.xlu1 %v2255_v10, %s7169_s24  ;;  %v5931_v10 = vld [vmem:[#allocation3 + $0x38] sm:$0x3]  ;;  %7171 = vst [vmem:[#allocation26_spill] sm:$0xff] %v5937_v54 }
 0x2f4   : > { %v2318_v12 = vrot.slane %v2298_v17, 1  ;;  %v2487_v62 = vmul.f32 %v2476_v35, %v5931_v10  ;;  %v2388_v11 = vrot.slane %v2368_v15, 1  ;;  %v2507_v21 = vrot.slane %v2486_v25, 2 }
 0x2f5   : > { %v2553_v15 = vmul.f32 %v5846_v32, %v5785_v16 }
 0x2f6   : > { %v2320_v43 = vsel %vm856_vm6, %v2318_v12, %v2319_v23  ;;  %v2509_v6 = vrot.slane %v2487_v62, 2  ;;  %v5959_v23 = vld [vmem:[#allocation3] sm:$0xfc]  ;;  %v2390_v13 = vsel %vm856_vm6, %v2388_v11, %v2389_v3  ;;  %v2554_v12 = vmul.f32 %v2546_v27, %v5788_v39 }
 0x2f7   : > { %v2551_v62 = vmul.f32 %v2546_v27, %v5955_v47 }
 0x2f9   : > { %v2571_v11 = vrot.slane %v2551_v62, 2 }
 0x2fa   : > { %2268 = vrot.lane.b32.xlu2 %v2257_v60, %s7169_s24  ;;  %2336 = vrot.lane.b32.xlu0 %v2325_v22, %s4405_s13  ;;  %v2367_v60 = vmul.f32 %v5814_v28, %v5850_v19  ;;  %v2484_v22 = vmul.f32 %v2476_v35, %v5788_v39  ;;  %v5953_v7 = vpop.permute.xlu1 %3005  ;;  %v5969_v44 = vpop.permute.xlu2 %3260 }
 0x2fb   : > { %2260 = vrot.lane.b32.xlu1 %v2247_v52, %s7169_s24  ;;  %v5949_v52 = vpop.permute.xlu0 %2937  ;;  %7172 = vst [vmem:[#allocation27_spill] sm:$0xff] %v5969_v44 }
 0x2fc   : > { %v2385_v59 = vrot.slane %v2367_v60, 1  ;;  %v2502_v28 = vrot.slane %v2484_v22, 2  ;;  %v2572_v22 = vrot.slane %v2554_v12, 2 }
 0x2fe   : > { %v2387_v0 = vsel %vm856_vm6, %v2385_v59, %v2386_v9 }
 0x302   : > { %2262 = vrot.lane.b32.xlu2 %v2250_v41, %s7169_s24  ;;  %2330 = vrot.lane.b32.xlu0 %v2317_v30, %s4405_s13  ;;  %v2510_v41 = vsel %vm1046_vm7, %v2502_v28, %v2509_v6  ;;  %v2481_v30 = vmul.f32 %v2476_v35, %v5955_v47  ;;  %v2556_v35 = vmul.f32 %v5846_v32, %v5951_v46 }
 0x303   : > { %2338 = vrot.lane.b32.xlu1 %v2327_v14, %s4405_s13  ;;  %v2480_v14 = vmul.f32 %v5778_v53, %v5959_v23  ;;  %v5977_v63 = vpop.permute.xlu0 %3118  ;;  %v2508_v53 = vsel %vm1046_vm7, %v2499_v36, %v2507_v21  ;;  %v1900_v21 = vld [vmem:[#allocation3 + $0x10] sm:$0xff] }
 0x304   : > { %v2501_v17 = vrot.slane %v2481_v30, 2  ;;  %v2577_v6 = vrot.slane %v2556_v35, 2  ;;  %v2017_v38 = vmul.f32 %v5734_v20, %v1900_v21  ;;  %v2067_v35 = vmul.f32 %v5722_v56, %v1900_v21 }
 0x305   : > { %v2498_v9 = vrot.slane %v2480_v14, 2  ;;  %v2550_v14 = vmul.f32 %v5846_v32, %v5959_v23  ;;  %v6023_v32 = vld [vmem:[#allocation3 + $0x28] sm:$0xff] }
 0x306   : > { %v2503_v3 = vsel %vm1046_vm7, %v2501_v17, %v2502_v28  ;;  %v2569_v28 = vrot.slane %v2553_v15, 2 }
 0x307   : > { %v2568_v17 = vrot.slane %v2550_v14, 2  ;;  %v2070_v14 = vmul.f32 %v5722_v56, %v6023_v32 }
 0x30a   : > { %2406 = vrot.lane.b32.xlu2 %v2395_v45, %s4404_s26  ;;  %2408 = vrot.lane.b32.xlu0 %v2397_v37, %s4404_s26  ;;  %v5981_v45 = vpop.permute.xlu1 %3120  ;;  %v2500_v37 = vsel %vm1046_vm7, %v2498_v9, %v2499_v36  ;;  %v1918_v36 = vmul.f32 %v5714_v24, %v1900_v21 }
 0x30b   : > { %2332 = vrot.lane.b32.xlu1 %v2320_v43, %s4405_s13  ;;  %v2557_v43 = vmul.f32 %v2546_v27, %v5931_v10  ;;  %v6000_v25 = vpop.permute.xlu0 %3190  ;;  %v2570_v27 = vsel %vm1046_vm7, %v2568_v17, %v2569_v28 }
 0x30c   : > { %7173 = vst [vmem:[#allocation28_spill] sm:$0xff] %v6000_v25 }
 0x30d   : > { %v2579_v59 = vrot.slane %v2557_v43, 2  ;;  %v1967_v43 = vmul.f32 %v5728_v31, %v1900_v21  ;;  %v6056_v21 = vmul.f32 %v5754_v26, %v6023_v32 }
 0x312   : > { %2400 = vrot.lane.b32.xlu2 %v2387_v0, %s4404_s26  ;;  %2402 = vrot.lane.b32.xlu0 %v2390_v13, %s4404_s26  ;;  %v2573_v0 = vsel %vm1046_vm7, %v2571_v11, %v2572_v22  ;;  %v2578_v13 = vsel %vm1046_vm7, %v2569_v28, %v2577_v6  ;;  %v6004_v5 = vpop.permute.xlu1 %3258 }
 0x313   : > { %2521 = vrot.lane.b32.xlu1 %v2510_v41, %s7170_s25  ;;  %v2580_v41 = vsel %vm1046_vm7, %v2572_v22, %v2579_v59  ;;  %7174 = vst [vmem:[#allocation29_spill] sm:$0xff] %v6004_v5 }
 0x31a   : > { %2515 = vrot.lane.b32.xlu2 %v2503_v3, %s7170_s25  ;;  %2519 = vrot.lane.b32.xlu0 %v2508_v53, %s7170_s25  ;;  %v6019_v3 = vpop.permute.xlu0 %3328  ;;  %v6021_v12 = vpop.permute.xlu1 %3330  ;;  %v6025_v53 = vld [vmem:[#allocation15] ss:$8 sm:$0x3] }
 0x31b   : > { %2513 = vrot.lane.b32.xlu1 %v2500_v37, %s7170_s25  ;;  %7175 = vst [vmem:[#allocation30_spill] sm:$0xff] %v6019_v3  ;;  %v2020_v37 = vmul.f32 %v5734_v20, %v6023_v32  ;;  %v7129_v62 = vperm.slane %v6025_v53, 0  ;;  %v2143_v20 = vld [vmem:[#allocation3 + $0x40] sm:$0x1] }
 0x31c   : > { %v5992_v60 = vpop.permute.xlu2 %1977  ;;  %7176 = vst [vmem:[#allocation31_spill] sm:$0xff] %v6021_v12  ;;  %v2165_v17 = vmul.f32 %v5771_v2, %v2143_v20 }
 0x31d   : > { %v1896_v6 = vmul.f32 %v7129_v62, %v5736_v51  ;;  %v1970_v51 = vmul.f32 %v5728_v31, %v6023_v32 }
 0x322   : > { %2585 = vrot.lane.b32.xlu2 %v2573_v0, %s7169_s24  ;;  %2589 = vrot.lane.b32.xlu0 %v2578_v13, %s7169_s24  ;;  %v1921_v0 = vmul.f32 %v5714_v24, %v6023_v32  ;;  %v2232_v13 = vmul.f32 %v5798_v48, %v6023_v32  ;;  %v2162_v24 = vmul.f32 %v5771_v2, %v6023_v32 }
 0x323   : > { %2591 = vrot.lane.b32.xlu1 %v2580_v41, %s7169_s24  ;;  %v2235_v41 = vmul.f32 %v5798_v48, %v2143_v20 }
 0x324   : > { %v6007_v30 = vpop.permute.xlu2 %2029 }
 0x32a   : > { %1932 = vrot.lane.b32.xlu2 %v1918_v36, %s7170_s25  ;;  %2031 = vrot.lane.b32.xlu0 %v2017_v38, %s4405_s13  ;;  %v2305_v36 = vmul.f32 %v5754_v26, %v2143_v20  ;;  %v2252_v38 = vrot.slane %v2232_v13, 1  ;;  %v6075_v13 = vld [vmem:[#allocation15 + $0x5] ss:$8 sm:$0x3] }
 0x32b   : > { %2583 = vrot.lane.b32.xlu1 %v2570_v27, %s7169_s24  ;;  %v2258_v27 = vrot.slane %v2235_v41, 1  ;;  %7177 = vst [vmem:[#allocation32_spill] sm:$0xff] %v6075_v13  ;;  %v6081_v41 = vmul.f32 %v5816_v49, %v6023_v32 }
 0x32c   : > { %v6017_v9 = vpop.permute.xlu2 %2079 }
 0x32d   : > { %v2259_v3 = vsel %vm856_vm6, %v2252_v38, %v2258_v27 }
 0x332   : > { %2081 = vrot.lane.b32.xlu2 %v2067_v35, %s4404_s26  ;;  %2037 = vrot.lane.b32.xlu0 %v2020_v37, %s4405_s13 }
 0x333   : > { %1981 = vrot.lane.b32.xlu1 %v1967_v43, %s7169_s24  ;;  %v2322_v43 = vrot.slane %v6056_v21, 1 }
 0x334   : > { %v6035_v15 = vpop.permute.xlu2 %1983  ;;  %v1929_v22 = vpop.permute.xlu0 %1928 }
 0x335   : > { %v6040_v59 = vpop.permute.xlu1 %1930 }
 0x336   : > { %v1940_v11 = vsel %vm781_vm10, %v1929_v22, %v6040_v59  ;;  %v2328_v22 = vrot.slane %v2305_v36, 1 }
 0x337   : > { %v1948_v28 = vadd.f32 %v1940_v11, %v1896_v6  ;;  %v2182_v11 = vrot.slane %v2162_v24, 1 }
 0x33a   : > { %1938 = vrot.lane.b32.xlu2 %v1921_v0, %s7170_s25  ;;  %2087 = vrot.lane.b32.xlu0 %v2070_v14, %s4404_s26  ;;  %v2188_v0 = vrot.slane %v2165_v17, 1  ;;  %v2108_v17 = vperm.slane %v6075_v13, 0 }
 0x33b   : > { %1987 = vrot.lane.b32.xlu1 %v1970_v51, %s7169_s24  ;;  %v2142_v51 = vld [vmem:[#allocation3 + $0x10] sm:$0xfe] }
 0x33c   : > { %v6064_v56 = vpop.permute.xlu2 %2035  ;;  %v6066_v31 = vpop.permute.xlu0 %1979  ;;  %v2189_v21 = vsel %vm856_vm6, %v2182_v11, %v2188_v0  ;;  %v2229_v36 = vmul.f32 %v5798_v48, %v2142_v51 }
 0x33d   : > { %v1989_v35 = vsel %vm839_vm12, %v5992_v60, %v6066_v31  ;;  %v2028_v37 = vpop.permute.xlu1 %2027  ;;  %v2329_v60 = vsel %vm856_vm6, %v2322_v43, %v2328_v22 }
 0x33e   : > { %v1997_v6 = vadd.f32 %v1989_v35, %v1948_v28  ;;  %v2040_v14 = vsel %vm2039_vm5, %v2028_v37, %v6007_v30  ;;  %v2375_v28 = vmul.f32 %v5816_v49, %v2143_v20  ;;  %v2392_v37 = vrot.slane %v6081_v41, 1 }
 0x33f   : > { %v6092_v20 = vmul.f32 %v2108_v17, %v5785_v16 }
 0x340   : > { %v2048_v62 = vadd.f32 %v2040_v14, %v1997_v6  ;;  %v2398_v22 = vrot.slane %v2375_v28, 1  ;;  %v2251_v6 = vrot.slane %v2229_v36, 1  ;;  %v2112_v14 = vmul.f32 %v2108_v17, %v5850_v19 }
 0x341   : > { %v2299_v36 = vmul.f32 %v5754_v26, %v2142_v51 }
 0x342   : > { %2270 = vrot.lane.b32.xlu2 %v2259_v3, %s7169_s24  ;;  %2340 = vrot.lane.b32.xlu0 %v2329_v60, %s4405_s13  ;;  %v2159_v3 = vmul.f32 %v5771_v2, %v2142_v51  ;;  %v2616_v60 = vsel %vm2010_vm1, %v5871_v4, %v5875_v40  ;;  %v2399_v28 = vsel %vm856_vm6, %v2392_v37, %v2398_v22 }
 0x343   : > { %2200 = vrot.lane.b32.xlu1 %v2189_v21, %s7170_s25  ;;  %v2253_v21 = vsel %vm856_vm6, %v2251_v6, %v2252_v38  ;;  %v2627_v41 = vmul.f32 %v2616_v60, %v5931_v10  ;;  %v2624_v22 = vmul.f32 %v2616_v60, %v5788_v39  ;;  %v2321_v12 = vrot.slane %v2299_v36, 1 }
 0x344   : > { %v2084_v24 = vpop.permute.xlu2 %2083  ;;  %v1935_v27 = vpop.permute.xlu0 %1934  ;;  %v2181_v2 = vrot.slane %v2159_v3, 1  ;;  %v2623_v3 = vmul.f32 %v5871_v4, %v5785_v16 }
 0x345   : > { %v2078_v35 = vpop.permute.xlu1 %2077  ;;  %v2642_v25 = vrot.slane %v2624_v22, 2  ;;  %v2323_v13 = vsel %vm856_vm6, %v2321_v12, %v2322_v43  ;;  %v2620_v12 = vmul.f32 %v5871_v4, %v5959_v23  ;;  %v2621_v43 = vmul.f32 %v2616_v60, %v5955_v47 }
 0x346   : > { %v2089_v48 = vsel %vm634_vm0, %v2078_v35, %v6017_v9  ;;  %v2626_v35 = vmul.f32 %v5871_v4, %v5951_v46  ;;  %v2183_v19 = vsel %vm856_vm6, %v2181_v2, %v2182_v11  ;;  %v7178_v11 = vperm.slane %v6025_v53, 0 }
 0x347   : > { %v2097_v0 = vadd.f32 %v2089_v48, %v2048_v62  ;;  %v2125_v62 = vrot.slane %v6092_v20, 1  ;;  %v2124_v48 = vrot.slane %v2112_v14, 1  ;;  %v2649_v20 = vrot.slane %v2627_v41, 2 }
 0x348   : > { %v1898_v26 = vmul.f32 %v7178_v11, %v5785_v16  ;;  %v2647_v2 = vrot.slane %v2626_v35, 2  ;;  %v2639_v54 = vrot.slane %v2623_v3, 2  ;;  %v6150_v3 = vld [vmem:[#allocation3 + $0x40] sm:$0x3]  ;;  %v2638_v22 = vrot.slane %v2620_v12, 2 }
 0x349   : > { %v2686_v4 = vsel %vm634_vm0, %v5831_v50, %v5897_v8  ;;  %v2641_v60 = vrot.slane %v2621_v43, 2 }
 0x34a   : > { %2264 = vrot.lane.b32.xlu2 %v2253_v21, %s7169_s24  ;;  %2410 = vrot.lane.b32.xlu0 %v2399_v28, %s4404_s26  ;;  %v2126_v28 = vsel %vm856_vm6, %v2124_v48, %v2125_v62  ;;  %v2648_v35 = vsel %vm1046_vm7, %v2639_v54, %v2647_v2  ;;  %v2650_v48 = vsel %vm1046_vm7, %v2642_v25, %v2649_v20 }
 0x34b   : > { %2194 = vrot.lane.b32.xlu1 %v2183_v19, %s7170_s25  ;;  %v6129_v5 = vadd.f32 %v2126_v28, %v2097_v0  ;;  %v2640_v2 = vsel %vm1046_vm7, %v2638_v22, %v2639_v54  ;;  %v2697_v28 = vmul.f32 %v2686_v4, %v5931_v10  ;;  %v2694_v54 = vmul.f32 %v2686_v4, %v5788_v39 }
 0x34c   : > { %v6111_v38 = vpop.permute.xlu2 %2190  ;;  %v6116_v6 = vpop.permute.xlu0 %1985 }
 0x34d   : > { %v6118_v21 = vpop.permute.xlu1 %1936  ;;  %v1991_v14 = vsel %vm839_vm12, %v6035_v15, %v6116_v6  ;;  %v2116_v15 = vmul.f32 %v2108_v17, %v5820_v55 }
 0x34e   : > { %v1942_v19 = vsel %vm781_vm10, %v1935_v27, %v6118_v21  ;;  %v2369_v27 = vmul.f32 %v5816_v49, %v2142_v51 }
 0x34f   : > { %v1950_v44 = vadd.f32 %v1942_v19, %v1898_v26  ;;  %v2130_v55 = vrot.slane %v2116_v15, 1  ;;  %v2696_v26 = vmul.f32 %v5831_v50, %v5951_v46  ;;  %v2643_v19 = vsel %vm1046_vm7, %v2641_v60, %v2642_v25 }
 0x350   : > { %v2391_v49 = vrot.slane %v2369_v27, 1  ;;  %v2719_v15 = vrot.slane %v2697_v28, 2  ;;  %v2690_v60 = vmul.f32 %v5831_v50, %v5959_v23 }
 0x351   : > { %v1999_v41 = vadd.f32 %v1991_v14, %v1950_v44  ;;  %v2485_v14 = vmul.f32 %v5844_v33, %v6023_v32  ;;  %v2717_v10 = vrot.slane %v2696_v26, 2  ;;  %v2691_v26 = vmul.f32 %v2686_v4, %v5955_v47 }
 0x352   : > { %2334 = vrot.lane.b32.xlu2 %v2323_v13, %s4405_s13  ;;  %2659 = vrot.lane.b32.xlu0 %v2648_v35, %s4405_s13  ;;  %v2393_v11 = vsel %vm856_vm6, %v2391_v49, %v2392_v37  ;;  %v2488_v37 = vmul.f32 %v5844_v33, %v6150_v3 }
 0x353   : > { %2661 = vrot.lane.b32.xlu1 %v2650_v48, %s4405_s13  ;;  %v2505_v12 = vrot.slane %v2485_v14, 2  ;;  %v2711_v47 = vrot.slane %v2691_v26, 2 }
 0x354   : > { %v6139_v0 = vpop.permute.xlu2 %2268  ;;  %v6144_v44 = vpop.permute.xlu0 %2085  ;;  %v2511_v43 = vrot.slane %v2488_v37, 2  ;;  %v6201_v37 = vld [vmem:[#allocation3 + $0x30] sm:$0x7] }
 0x355   : > { %7179 = vst [vmem:[#allocation33_spill] sm:$0xff] %v6139_v0  ;;  %v2034_v13 = vpop.permute.xlu1 %2033  ;;  %v2091_v51 = vsel %vm634_vm0, %v2084_v24, %v6144_v44  ;;  %v2693_v24 = vmul.f32 %v5831_v50, %v5785_v16 }
 0x356   : > { %v2042_v36 = vsel %vm2039_vm5, %v2034_v13, %v6064_v56  ;;  %v2512_v22 = vsel %vm1046_vm7, %v2505_v12, %v2511_v43 }
 0x357   : > { %v2050_v17 = vadd.f32 %v2042_v36, %v1999_v41  ;;  %v2131_v41 = vsel %vm856_vm6, %v2125_v62, %v2130_v55  ;;  %v2709_v13 = vrot.slane %v2693_v24, 2  ;;  %v2712_v62 = vrot.slane %v2694_v54, 2  ;;  %v6180_v55 = vld [vmem:[#allocation3 + $0x10] sm:$0xfc] }
 0x358   : > { %v2555_v54 = vmul.f32 %v5804_v1, %v6023_v32 }
 0x359   : > { %v2099_v20 = vadd.f32 %v2091_v51, %v2050_v17  ;;  %v2718_v51 = vsel %vm1046_vm7, %v2709_v13, %v2717_v10  ;;  %v2720_v17 = vsel %vm1046_vm7, %v2712_v62, %v2719_v15  ;;  %v2799_v10 = vsel %vm1911_vm15, %v5903_v29, %v5862_v58 }
 0x35a   : > { %2404 = vrot.lane.b32.xlu2 %v2393_v11, %s4404_s26  ;;  %2653 = vrot.lane.b32.xlu0 %v2640_v2, %s4405_s13 }
 0x35b   : > { %2655 = vrot.lane.b32.xlu1 %v2643_v19, %s4405_s13  ;;  %v2140_v48 = vadd.f32 %v2131_v41, %v2099_v20  ;;  %v2482_v20 = vmul.f32 %v5844_v33, %v6180_v55  ;;  %v2708_v19 = vrot.slane %v2690_v60, 2  ;;  %v6203_v41 = vld [vmem:[#allocation3 + $0x38] sm:$0x7] }
 0x35c   : > { %v6171_v35 = vpop.permute.xlu2 %2262  ;;  %v2197_v27 = vpop.permute.xlu0 %2196  ;;  %v2810_v43 = vmul.f32 %v2799_v10, %v6203_v41 }
 0x35d   : > { %7180 = vst [vmem:[#allocation34_spill] sm:$0xff] %v6171_v35  ;;  %v6174_v25 = vpop.permute.xlu1 %2198  ;;  %v2504_v33 = vrot.slane %v2482_v20, 2 }
 0x35e   : > { %7181 = vst [vmem:[#allocation35_spill] sm:$0xff] %v6174_v25  ;;  %v2204_v36 = vsel %vm781_vm10, %v2197_v27, %v6174_v25  ;;  %v2809_v27 = vmul.f32 %v5903_v29, %v6201_v37  ;;  %v2832_v26 = vrot.slane %v2810_v43, 3 }
 0x35f   : > { %v2212_v49 = vadd.f32 %v2204_v36, %v2140_v48  ;;  %v2710_v48 = vsel %vm1046_vm7, %v2708_v19, %v2709_v13  ;;  %v2506_v15 = vsel %vm1046_vm7, %v2504_v33, %v2505_v12  ;;  %v2806_v36 = vmul.f32 %v5903_v29, %v5785_v16  ;;  %v6233_v19 = vld [vmem:[#allocation3] sm:$0xf8] }
 0x360   : > { %v2830_v60 = vrot.slane %v2809_v27, 3  ;;  %v6238_v33 = vmul.f32 %v5875_v40, %v6023_v32  ;;  %v2803_v27 = vmul.f32 %v5903_v29, %v6233_v19 }
 0x361   : > { %v2822_v20 = vrot.slane %v2806_v36, 3 }
 0x362   : > { %2729 = vrot.lane.b32.xlu2 %v2718_v51, %s4404_s26  ;;  %2731 = vrot.lane.b32.xlu0 %v2720_v17, %s4404_s26  ;;  %v7137_v36 = vrot.slane %v6238_v33, 2 }
 0x363   : > { %2523 = vrot.lane.b32.xlu1 %v2512_v22, %s7170_s25 }
 0x364   : > { %v6188_v11 = vpop.permute.xlu2 %2406  ;;  %v6193_v24 = vpop.permute.xlu0 %2192 }
 0x365   : > { %7182 = vst [vmem:[#allocation36_spill] sm:$0xff] %v6193_v24  ;;  %v2267_v2 = vpop.permute.xlu1 %2266  ;;  %v2202_v28 = vsel %vm781_vm10, %v6111_v38, %v6193_v24  ;;  %v2558_v38 = vmul.f32 %v5804_v1, %v6150_v3 }
 0x366   : > { %v2274_v50 = vsel %vm839_vm12, %v2267_v2, %v6139_v0  ;;  %v2210_v14 = vadd.f32 %v2202_v28, %v6129_v5  ;;  %v2713_v5 = vsel %vm1046_vm7, %v2711_v47, %v2712_v62  ;;  %v2575_v62 = vrot.slane %v2555_v54, 2 }
 0x367   : > { %v2282_v4 = vadd.f32 %v2274_v50, %v2212_v49  ;;  %v6226_v49 = vmul.f32 %v2799_v10, %v5788_v39  ;;  %v2581_v51 = vrot.slane %v2558_v38, 2  ;;  %v2831_v47 = vsel %vm1236_vm8, %v2822_v20, %v2830_v60  ;;  %v6246_v38 = vld [vmem:[#allocation15 + $0x12] ss:$8 sm:$0x3] }
 0x368   : > { %7183 = vst [vmem:[#allocation37_spill] sm:$0xff] %v6246_v38 }
 0x369   : > { %v2825_v28 = vrot.slane %v6226_v49, 3  ;;  %v2582_v50 = vsel %vm1046_vm7, %v2575_v62, %v2581_v51  ;;  %v2431_v51 = vperm.slane %v6246_v38, 0 }
 0x36a   : > { %2723 = vrot.lane.b32.xlu2 %v2710_v48, %s4404_s26  ;;  %2725 = vrot.lane.b32.xlu0 %v2713_v5, %s4404_s26  ;;  %v2628_v48 = vmul.f32 %v5875_v40, %v6150_v3 }
 0x36b   : > { %2517 = vrot.lane.b32.xlu1 %v2506_v15, %s7170_s25  ;;  %v2833_v54 = vsel %vm1236_vm8, %v2825_v28, %v2832_v26  ;;  %v2439_v26 = vmul.f32 %v2431_v51, %v5951_v46 }
 0x36c   : > { %v6221_v13 = vpop.permute.xlu2 %2400  ;;  %v2337_v17 = vpop.permute.xlu0 %2336  ;;  %v2651_v49 = vrot.slane %v2628_v48, 2 }
 0x36d   : > { %v2261_v22 = vpop.permute.xlu1 %2260 }
 0x36e   : > { %v2272_v12 = vsel %vm839_vm12, %v2261_v22, %v6171_v35  ;;  %v2652_v48 = vsel %vm1046_vm7, %v7137_v36, %v2651_v49  ;;  %v2453_v49 = vrot.slane %v2439_v26, 2  ;;  %v1893_v35 = vperm.slane %v6025_v53, 1 }
 0x36f   : > { %v2280_v2 = vadd.f32 %v2272_v12, %v2210_v14  ;;  %v2552_v14 = vmul.f32 %v5804_v1, %v6180_v55  ;;  %v6259_v12 = vld [vmem:[#allocation3 + $0x8] sm:$0xf8] }
 0x371   : > { %v2574_v22 = vrot.slane %v2552_v14, 2 }
 0x372   : > { %2593 = vrot.lane.b32.xlu2 %v2582_v50, %s7169_s24  ;;  %2842 = vrot.lane.b32.xlu0 %v2831_v47, %s7170_s25  ;;  %v2821_v50 = vrot.slane %v2803_v27, 3  ;;  %v2869_v47 = vsel %vm718_vm4, %v5926_v57, %v5929_v61  ;;  %v2876_v27 = vmul.f32 %v5926_v57, %v5785_v16 }
 0x373   : > { %2844 = vrot.lane.b32.xlu1 %v2833_v54, %s7170_s25  ;;  %v2576_v29 = vsel %vm1046_vm7, %v2574_v22, %v2575_v62  ;;  %v2880_v54 = vmul.f32 %v2869_v47, %v6203_v41  ;;  %v2804_v62 = vmul.f32 %v2799_v10, %v6259_v12 }
 0x374   : > { %v6249_v5 = vpop.permute.xlu2 %2515  ;;  %v2331_v15 = vpop.permute.xlu0 %2330  ;;  %v2823_v46 = vsel %vm1236_vm8, %v2821_v50, %v2822_v20  ;;  %v2892_v24 = vrot.slane %v2876_v27, 3 }
 0x375   : > { %v6253_v43 = vpop.permute.xlu1 %2338  ;;  %v2824_v36 = vrot.slane %v2804_v62, 3 }
 0x376   : > { %7184 = vst [vmem:[#allocation38_spill] sm:$0xff] %v6253_v43  ;;  %v2344_v1 = vsel %vm2039_vm5, %v2337_v17, %v6253_v43  ;;  %v2437_v17 = vmul.f32 %v2431_v51, %v5785_v16 }
 0x377   : > { %v2352_v60 = vadd.f32 %v2344_v1, %v2282_v4  ;;  %v2879_v4 = vmul.f32 %v5926_v57, %v6201_v37  ;;  %v6283_v1 = vmul.f32 %v2869_v47, %v5788_v39  ;;  %v2826_v43 = vsel %vm1236_vm8, %v2824_v36, %v2825_v28 }
 0x379   : > { %v2900_v50 = vrot.slane %v2879_v4, 3  ;;  %v2895_v25 = vrot.slane %v6283_v1, 3 }
 0x37a   : > { %2587 = vrot.lane.b32.xlu2 %v2576_v29, %s7169_s24  ;;  %2663 = vrot.lane.b32.xlu0 %v2652_v48, %s4405_s13  ;;  %v2448_v29 = vrot.slane %v2437_v17, 2 }
 0x37b   : > { %2836 = vrot.lane.b32.xlu1 %v2823_v46, %s7170_s25  ;;  %v2902_v46 = vrot.slane %v2880_v54, 3  ;;  %v2622_v54 = vmul.f32 %v5875_v40, %v6180_v55 }
 0x37c   : > { %v6278_v14 = vpop.permute.xlu2 %2585  ;;  %v6285_v22 = vpop.permute.xlu0 %2408  ;;  %v2454_v0 = vsel %vm1046_vm7, %v2448_v29, %v2453_v49 }
 0x37d   : > { %v6287_v20 = vpop.permute.xlu1 %2332  ;;  %v2414_v10 = vsel %vm634_vm0, %v6188_v11, %v6285_v22  ;;  %v2435_v11 = vmul.f32 %v2431_v51, %v5959_v23  ;;  %v2903_v17 = vsel %vm1236_vm8, %v2895_v25, %v2902_v46  ;;  %v1897_v23 = vmul.f32 %v1893_v35, %v5747_v42 }
 0x37e   : > { %v2342_v48 = vsel %vm2039_vm5, %v2331_v15, %v6287_v20  ;;  %v2422_v38 = vadd.f32 %v2414_v10, %v2352_v60  ;;  %v2901_v15 = vsel %vm1236_vm8, %v2892_v24, %v2900_v50  ;;  %v6303_v60 = vmul.f32 %v5897_v8, %v6023_v32 }
 0x37f   : > { %v2350_v26 = vadd.f32 %v2342_v48, %v2280_v2  ;;  %v2698_v2 = vmul.f32 %v5897_v8, %v6150_v3  ;;  %v2873_v3 = vmul.f32 %v5926_v57, %v6233_v19  ;;  %v2644_v27 = vrot.slane %v2622_v54, 2 }
 0x380   : > { %v2463_v4 = vadd.f32 %v2454_v0, %v2422_v38  ;;  %v2447_v38 = vrot.slane %v2435_v11, 2  ;;  %v2715_v42 = vrot.slane %v6303_v60, 2  ;;  %v7185_v57 = vrot.slane %v6238_v33, 2 }
 0x381   : > { %v2721_v62 = vrot.slane %v2698_v2, 2  ;;  %v2891_v1 = vrot.slane %v2873_v3, 3  ;;  %v2939_v48 = vsel %vm2010_vm1, %v5889_v18, %v5949_v52  ;;  %v2949_v46 = vmul.f32 %v5889_v18, %v6201_v37 }
 0x382   : > { %2838 = vrot.lane.b32.xlu2 %v2826_v43, %s7170_s25  ;;  %2912 = vrot.lane.b32.xlu0 %v2901_v15, %s7169_s24  ;;  %v2646_v10 = vsel %vm1046_vm7, %v2644_v27, %v7185_v57  ;;  %v2874_v33 = vmul.f32 %v2869_v47, %v6259_v12  ;;  %v2946_v15 = vmul.f32 %v5889_v18, %v5785_v16 }
 0x383   : > { %2914 = vrot.lane.b32.xlu1 %v2903_v17, %s7169_s24  ;;  %v2947_v60 = vmul.f32 %v2939_v48, %v5788_v39  ;;  %v2970_v54 = vrot.slane %v2949_v46, 3  ;;  %v2692_v27 = vmul.f32 %v5897_v8, %v6180_v55  ;;  %v6373_v8 = vld [vmem:[#allocation3 + $0x40] sm:$0x7] }
 0x384   : > { %v1933_v0 = vpop.permute.xlu2 %1932  ;;  %v6319_v43 = vpop.permute.xlu0 %2402  ;;  %v2962_v3 = vrot.slane %v2946_v15, 3  ;;  %v2808_v15 = vmul.f32 %v5862_v58, %v6023_v32 }
 0x385   : > { %v1941_v28 = vsel %vm781_vm10, %v6040_v59, %v1933_v0  ;;  %v6321_v36 = vpop.permute.xlu1 %2521  ;;  %v2412_v51 = vsel %vm634_vm0, %v6221_v13, %v6319_v43  ;;  %v2449_v59 = vsel %vm1046_vm7, %v2447_v38, %v2448_v29  ;;  %v2722_v13 = vsel %vm1046_vm7, %v2715_v42, %v2721_v62 }
 0x386   : > { %v6323_v40 = vadd.f32 %v1941_v28, %v1897_v23  ;;  %v2420_v49 = vadd.f32 %v2412_v51, %v2350_v26  ;;  %v2893_v26 = vsel %vm1236_vm8, %v2891_v1, %v2892_v24  ;;  %v2950_v29 = vmul.f32 %v2939_v48, %v6203_v41 }
 0x387   : > { %v2894_v0 = vrot.slane %v2874_v33, 3  ;;  %v2965_v51 = vrot.slane %v2947_v60, 3  ;;  %v2971_v16 = vsel %vm1236_vm8, %v2962_v3, %v2970_v54  ;;  %v2714_v57 = vrot.slane %v2692_v27, 2 }
 0x388   : > { %v2461_v50 = vadd.f32 %v2449_v59, %v2420_v49  ;;  %v2972_v23 = vrot.slane %v2950_v29, 3  ;;  %v2811_v60 = vmul.f32 %v5862_v58, %v6373_v8 }
 0x389   : > { %v2896_v62 = vsel %vm1236_vm8, %v2894_v0, %v2895_v25  ;;  %v2944_v25 = vmul.f32 %v2939_v48, %v6259_v12  ;;  %v3019_v48 = vmul.f32 %v5953_v7, %v6201_v37 }
 0x38a   : > { %2657 = vrot.lane.b32.xlu2 %v2646_v10, %s4405_s13  ;;  %2733 = vrot.lane.b32.xlu0 %v2722_v13, %s4404_s26  ;;  %v2973_v39 = vsel %vm1236_vm8, %v2965_v51, %v2972_v23  ;;  %v3009_v13 = vsel %vm634_vm0, %v5953_v7, %v5909_v34 }
 0x38b   : > { %2906 = vrot.lane.b32.xlu1 %v2893_v26, %s7169_s24  ;;  %v2964_v46 = vrot.slane %v2944_v25, 3  ;;  %v3020_v29 = vmul.f32 %v3009_v13, %v6203_v41  ;;  %v6405_v25 = vld [vmem:[#allocation3 + $0x10] sm:$0xf8] }
 0x38c   : > { %v6345_v11 = vpop.permute.xlu2 %2081  ;;  %v2520_v2 = vpop.permute.xlu0 %2519 }
 0x38d   : > { %v2514_v17 = vpop.permute.xlu1 %2513  ;;  %v2527_v24 = vsel %vm781_vm10, %v2520_v2, %v6321_v36  ;;  %v2966_v33 = vsel %vm1236_vm8, %v2964_v46, %v2965_v51  ;;  %v6389_v2 = vld [vmem:[#allocation3 + $0x18] sm:$0xff]  ;;  %v2828_v51 = vrot.slane %v2808_v15, 3  ;;  %v3014_v46 = vmul.f32 %v3009_v13, %v6259_v12 }
 0x38e   : > { %v2525_v47 = vsel %vm781_vm10, %v2514_v17, %v6249_v5  ;;  %v2535_v28 = vadd.f32 %v2527_v24, %v2463_v4  ;;  %v2943_v4 = vmul.f32 %v5889_v18, %v6233_v19  ;;  %v2716_v18 = vsel %vm1046_vm7, %v2714_v57, %v2715_v42  ;;  %v6397_v24 = vld [vmem:[#allocation3 + $0x20] sm:$0xff] }
 0x38f   : > { %v2533_v38 = vadd.f32 %v2525_v47, %v2461_v50  ;;  %v3016_v42 = vmul.f32 %v6389_v2, %v5953_v7  ;;  %v3017_v54 = vmul.f32 %v6397_v24, %v3009_v13  ;;  %v3040_v47 = vrot.slane %v3019_v48, 3 }
 0x390   : > { %v2961_v55 = vrot.slane %v2943_v4, 3  ;;  %v6428_v15 = vsel %vm1911_vm15, %v5977_v63, %v5981_v45 }
 0x391   : > { %v3035_v27 = vrot.slane %v3017_v54, 3 }
 0x392   : > { %2908 = vrot.lane.b32.xlu2 %v2896_v62, %s7169_s24  ;;  %2982 = vrot.lane.b32.xlu0 %v2971_v16, %s4405_s13  ;;  %v2963_v26 = vsel %vm1236_vm8, %v2961_v55, %v2962_v3  ;;  %v2834_v62 = vrot.slane %v2811_v60, 3  ;;  %v3032_v16 = vrot.slane %v3016_v42, 3  ;;  %v2805_v55 = vmul.f32 %v5862_v58, %v6405_v25 }
 0x393   : > { %2984 = vrot.lane.b32.xlu1 %v2973_v39, %s4405_s13  ;;  %v3034_v42 = vrot.slane %v3014_v46, 3 }
 0x394   : > { %v6362_v49 = vpop.permute.xlu2 %1938  ;;  %v2590_v59 = vpop.permute.xlu0 %2589  ;;  %v3041_v4 = vsel %vm1236_vm8, %v3032_v16, %v3040_v47  ;;  %v2835_v57 = vsel %vm1236_vm8, %v2828_v51, %v2834_v62  ;;  %v2827_v58 = vrot.slane %v2805_v55, 3  ;;  %v2881_v47 = vmul.f32 %v5929_v61, %v6373_v8 }
 0x395   : > { %v6367_v1 = vpop.permute.xlu1 %2591 }
 0x396   : > { %v2597_v10 = vsel %vm839_vm12, %v2590_v59, %v6367_v1  ;;  %v2829_v62 = vsel %vm1236_vm8, %v2827_v58, %v2828_v51 }
 0x397   : > { %v6371_v50 = vadd.f32 %v2597_v10, %v2535_v28  ;;  %v3042_v28 = vrot.slane %v3020_v29, 3  ;;  %v3013_v10 = vmul.f32 %v5953_v7, %v6233_v19  ;;  %v6423_v7 = vld [vmem:[#allocation3 + $0x30] sm:$0xf] }
 0x399   : > { %v3043_v59 = vsel %vm1236_vm8, %v3035_v27, %v3042_v28  ;;  %v3031_v29 = vrot.slane %v3013_v10, 3  ;;  %v3036_v28 = vsel %vm1236_vm8, %v3034_v42, %v3035_v27  ;;  %v1899_v27 = vmul.f32 %v6397_v24, %v1893_v35  ;;  %v4023_v35 = vld [vmem:[#allocation3 + $0x38] sm:$0x1] }
 0x39a   : > { %2727 = vrot.lane.b32.xlu2 %v2716_v18, %s4404_s26  ;;  %2976 = vrot.lane.b32.xlu0 %v2963_v26, %s4405_s13 }
 0x39b   : > { %2978 = vrot.lane.b32.xlu1 %v2966_v33, %s4405_s13  ;;  %v6421_v33 = vld [vmem:[#allocation3 + $0x38] sm:$0xf]  ;;  %v3033_v54 = vsel %vm1236_vm8, %v3031_v29, %v3032_v16  ;;  %v7186_v16 = vld [vmem:[#allocation32_spill] sm:$0xff] }
 0x39c   : > { %v6395_v17 = vpop.permute.xlu2 %2270  ;;  %v2032_v23 = vpop.permute.xlu0 %2031 }
 0x39d   : > { %v2584_v0 = vpop.permute.xlu1 %2583  ;;  %v2041_v13 = vsel %vm2039_vm5, %v6007_v30, %v2032_v23  ;;  %v3132_v30 = vmul.f32 %v5977_v63, %v6423_v7  ;;  %v2090_v23 = vsel %vm634_vm0, %v6017_v9, %v6345_v11  ;;  %v6463_v9 = vmul.f32 %v6397_v24, %v6428_v15 }
 0x39e   : > { %v2595_v3 = vsel %vm839_vm12, %v2584_v0, %v6278_v14 }
 0x39f   : > { %v6402_v39 = vadd.f32 %v2595_v3, %v2533_v38  ;;  %v1943_v3 = vsel %vm781_vm10, %v6118_v21, %v6362_v49  ;;  %v3129_v21 = vmul.f32 %v6389_v2, %v5977_v63  ;;  %v2904_v49 = vrot.slane %v2881_v47, 3  ;;  %v6479_v47 = vld [vmem:[#allocation3] sm:$0xf0] }
 0x3a0   : > { %v1951_v55 = vadd.f32 %v1943_v3, %v1899_v27 }
 0x3a1   : > { %v3145_v42 = vrot.slane %v3129_v21, 4 }
 0x3a2   : > { %3052 = vrot.lane.b32.xlu2 %v3041_v4, %s4404_s26  ;;  %3054 = vrot.lane.b32.xlu0 %v3043_v59, %s4404_s26  ;;  %v2109_v4 = vperm.slane %v7186_v16, 1 }
 0x3a3   : > { %2846 = vrot.lane.b32.xlu1 %v2835_v57, %s7170_s25 }
 0x3a4   : > { %v6414_v38 = vpop.permute.xlu2 %2264  ;;  %v2038_v18 = vpop.permute.xlu0 %2037  ;;  %v2117_v51 = vmul.f32 %v4023_v35, %v2109_v4  ;;  %v7187_v35 = vld [vmem:[#allocation38_spill] sm:$0xff] }
 0x3a5   : > { %v1982_v48 = vpop.permute.xlu1 %1981 }
 0x3a6   : > { %v1990_v26 = vsel %vm839_vm12, %v6066_v31, %v1982_v48  ;;  %v6436_v31 = vmul.f32 %v5929_v61, %v6023_v32  ;;  %v3153_v48 = vrot.slane %v3132_v30, 4 }
 0x3a7   : > { %v1998_v60 = vadd.f32 %v1990_v26, %v6323_v40  ;;  %v3133_v40 = vmul.f32 %v6428_v15, %v6421_v33 }
 0x3a8   : > { %v2898_v53 = vrot.slane %v6436_v31, 3  ;;  %v2132_v31 = vrot.slane %v2117_v51, 1 }
 0x3a9   : > { %v2049_v0 = vadd.f32 %v2041_v13, %v1998_v60  ;;  %v3155_v29 = vrot.slane %v3133_v40, 4  ;;  %v2115_v60 = vmul.f32 %v6397_v24, %v2109_v4  ;;  %v3148_v13 = vrot.slane %v6463_v9, 4 }
 0x3aa   : > { %3046 = vrot.lane.b32.xlu2 %v3033_v54, %s4404_s26  ;;  %3048 = vrot.lane.b32.xlu0 %v3036_v28, %s4404_s26  ;;  %v2905_v54 = vsel %vm1236_vm8, %v2898_v53, %v2904_v49  ;;  %v6485_v40 = vmul.f32 %v5949_v52, %v6023_v32  ;;  %v2951_v28 = vmul.f32 %v5949_v52, %v6373_v8 }
 0x3ab   : > { %v6458_v59 = vadd.f32 %v2090_v23, %v2049_v0  ;;  %2840 = vrot.lane.b32.xlu1 %v2829_v62, %s7170_s25  ;;  %v2875_v23 = vmul.f32 %v5929_v61, %v6405_v25 }
 0x3ac   : > { %v2335_v57 = vpop.permute.xlu2 %2334  ;;  %v2088_v10 = vpop.permute.xlu0 %2087  ;;  %v2968_v51 = vrot.slane %v6485_v40, 3 }
 0x3ad   : > { %v6469_v11 = vsel %vm2039_vm5, %v6287_v20, %v2335_v57  ;;  %v1988_v46 = vpop.permute.xlu1 %1987  ;;  %v2043_v20 = vsel %vm2039_vm5, %v6064_v56, %v2038_v18  ;;  %v3156_v56 = vsel %vm1426_vm13, %v3148_v13, %v3155_v29  ;;  %v2128_v18 = vrot.slane %v2115_v60, 1  ;;  %v6510_v29 = vld [vmem:[#allocation3 + $0x8] sm:$0xf0] }
 0x3ae   : > { %v1992_v26 = vsel %vm839_vm12, %v6116_v6, %v1988_v46  ;;  %v3154_v6 = vsel %vm1426_vm13, %v3145_v42, %v3153_v48  ;;  %v2092_v30 = vsel %vm634_vm0, %v6144_v44, %v2088_v10  ;;  %v3126_v57 = vmul.f32 %v5977_v63, %v6479_v47  ;;  %v7189_v63 = vld [vmem:[#allocation33_spill] sm:$0xff] }
 0x3af   : > { %v2000_v58 = vadd.f32 %v1992_v26, %v1951_v55  ;;  %v2133_v27 = vsel %vm856_vm6, %v2128_v18, %v2132_v31  ;;  %v2974_v10 = vrot.slane %v2951_v28, 3  ;;  %v7188_v55 = vld [vmem:[#allocation35_spill] sm:$0xff]  ;;  %v2897_v48 = vrot.slane %v2875_v23, 3  ;;  %v7190_v31 = vld [vmem:[#allocation28_spill] sm:$0xff] }
 0x3b1   : > { %v2051_v0 = vadd.f32 %v2043_v20, %v2000_v58  ;;  %v2275_v58 = vsel %vm839_vm12, %v7189_v63, %v6395_v17  ;;  %v3144_v20 = vrot.slane %v3126_v57, 4 }
 0x3b2   : > { %2916 = vrot.lane.b32.xlu2 %v2905_v54, %s7169_s24  ;;  %3165 = vrot.lane.b32.xlu0 %v3154_v6, %s7170_s25  ;;  %v2899_v54 = vsel %vm1236_vm8, %v2897_v48, %v2898_v53  ;;  %v3127_v53 = vmul.f32 %v6428_v15, %v6510_v29 }
 0x3b3   : > { %3167 = vrot.lane.b32.xlu1 %v3156_v56, %s7170_s25  ;;  %v2100_v62 = vadd.f32 %v2092_v30, %v2051_v0  ;;  %v7191_v0 = vld [vmem:[#allocation26_spill] sm:$0xff]  ;;  %v3146_v30 = vsel %vm1426_vm13, %v3144_v20, %v3145_v42  ;;  %v6557_v20 = vmul.f32 %v5909_v34, %v6023_v32 }
 0x3b4   : > { %v2405_v3 = vpop.permute.xlu2 %2404  ;;  %v2341_v21 = vpop.permute.xlu0 %2340  ;;  %v3192_v6 = vsel %vm718_vm4, %v7191_v0, %v7190_v31  ;;  %v3202_v56 = vmul.f32 %v7191_v0, %v6423_v7  ;;  %v3196_v32 = vmul.f32 %v7191_v0, %v6479_v47 }
 0x3b5   : > { %v6500_v16 = vsel %vm634_vm0, %v6319_v43, %v2405_v3  ;;  %v2201_v44 = vpop.permute.xlu1 %2200  ;;  %v2141_v49 = vadd.f32 %v2133_v27, %v2100_v62  ;;  %v2345_v61 = vsel %vm2039_vm5, %v7187_v35, %v2341_v21  ;;  %v4024_v43 = vld [vmem:[#allocation3 + $0x8] sm:$0xfe]  ;;  %v3203_v23 = vmul.f32 %v3192_v6, %v6421_v33 }
 0x3b6   : > { %v2205_v46 = vsel %vm781_vm10, %v7188_v55, %v2201_v44  ;;  %v2113_v26 = vmul.f32 %v4024_v43, %v2109_v4  ;;  %v2975_v4 = vsel %vm1236_vm8, %v2968_v51, %v2974_v10  ;;  %v3199_v27 = vmul.f32 %v6389_v2, %v7191_v0  ;;  %v7192_v10 = vld [vmem:[#allocation36_spill] sm:$0xff] }
 0x3b7   : > { %v2213_v60 = vadd.f32 %v2205_v46, %v2141_v49  ;;  %v6537_v42 = vmul.f32 %v6397_v24, %v3192_v6  ;;  %v3223_v35 = vrot.slane %v3202_v56, 4  ;;  %v3147_v46 = vrot.slane %v3127_v53, 4 }
 0x3b8   : > { %v2127_v17 = vrot.slane %v2113_v26, 1  ;;  %v7193_v26 = vld [vmem:[#allocation34_spill] sm:$0xff]  ;;  %v3214_v53 = vrot.slane %v3196_v32, 4 }
 0x3b9   : > { %v2283_v28 = vadd.f32 %v2275_v58, %v2213_v60  ;;  %v2273_v60 = vsel %vm839_vm12, %v7193_v26, %v6414_v38  ;;  %v3218_v63 = vrot.slane %v6537_v42, 4 }
 0x3ba   : > { %2910 = vrot.lane.b32.xlu2 %v2899_v54, %s7169_s24  ;;  %2986 = vrot.lane.b32.xlu0 %v2975_v4, %s4405_s13  ;;  %v2129_v57 = vsel %vm856_vm6, %v2127_v17, %v2128_v18  ;;  %v3215_v18 = vrot.slane %v3199_v27, 4  ;;  %v3021_v54 = vmul.f32 %v5909_v34, %v6373_v8  ;;  %v3038_v8 = vrot.slane %v6557_v20, 3  ;;  %v7195_v27 = vld [vmem:[#allocation29_spill] sm:$0xff] }
 0x3bb   : > { %3159 = vrot.lane.b32.xlu1 %v3146_v30, %s7170_s25  ;;  %v2353_v62 = vadd.f32 %v2345_v61, %v2283_v28  ;;  %v2139_v49 = vadd.f32 %v2129_v57, %v6458_v59  ;;  %v3225_v61 = vrot.slane %v3203_v23, 4  ;;  %v2945_v28 = vmul.f32 %v5949_v52, %v6405_v25 }
 0x3bc   : > { %v6531_v3 = vpop.permute.xlu2 %2729  ;;  %v2411_v21 = vpop.permute.xlu0 %2410  ;;  %v3224_v58 = vsel %vm1426_vm13, %v3215_v18, %v3223_v35  ;;  %v3044_v30 = vrot.slane %v3021_v54, 3  ;;  %v3272_v42 = vmul.f32 %v7195_v27, %v6423_v7  ;;  %v3269_v35 = vmul.f32 %v6389_v2, %v7195_v27 }
 0x3bd   : > { %v2195_v44 = vpop.permute.xlu1 %2194  ;;  %v2415_v15 = vsel %vm634_vm0, %v6285_v22, %v2411_v21  ;;  %v3149_v22 = vsel %vm1426_vm13, %v3147_v46, %v3148_v13  ;;  %v3226_v38 = vsel %vm1426_vm13, %v3218_v63, %v3225_v61  ;;  %v2967_v52 = vrot.slane %v2945_v28, 3 }
 0x3be   : > { %v2203_v55 = vsel %vm781_vm10, %v7192_v10, %v2195_v44  ;;  %v6544_v48 = vadd.f32 %v2415_v15, %v2353_v62  ;;  %v7194_v62 = vld [vmem:[#allocation27_spill] sm:$0xff]  ;;  %v3216_v21 = vsel %vm1426_vm13, %v3214_v53, %v3215_v18  ;;  %v3293_v18 = vrot.slane %v3272_v42, 4 }
 0x3bf   : > { %v2211_v43 = vadd.f32 %v2203_v55, %v2139_v49  ;;  %v2969_v0 = vsel %vm1236_vm8, %v2967_v52, %v2968_v51  ;;  %v3262_v57 = vsel %vm2010_vm1, %v7195_v27, %v7194_v62  ;;  %v7196_v51 = vld [vmem:[#allocation37_spill] sm:$0xff]  ;;  %v4025_v55 = vld [vmem:[#allocation3 + $0x38] sm:$0x3]  ;;  %v3285_v54 = vrot.slane %v3269_v35, 4 }
 0x3c0   : > { %v3273_v40 = vmul.f32 %v3262_v57, %v6421_v33  ;;  %v2432_v44 = vperm.slane %v7196_v51, 1  ;;  %v6597_v49 = vld [vmem:[#allocation15 + $0x17] ss:$8 sm:$0x3] }
 0x3c1   : > { %v2281_v59 = vadd.f32 %v2273_v60, %v2211_v43  ;;  %v6608_v26 = vperm.slane %v6597_v49, 0  ;;  %v4026_v51 = vld [vmem:[#allocation3 + $0x8] sm:$0xfc] }
 0x3c2   : > { %3161 = vrot.lane.b32.xlu2 %v3149_v22, %s7170_s25  ;;  %3235 = vrot.lane.b32.xlu0 %v3224_v58, %s7169_s24  ;;  %v2440_v61 = vmul.f32 %v4025_v55, %v2432_v44  ;;  %v3295_v60 = vrot.slane %v3273_v40, 4  ;;  %v7198_v55 = vld [vmem:[#allocation30_spill] sm:$0xff] }
 0x3c3   : > { %v2351_v9 = vadd.f32 %v6469_v11, %v2281_v59  ;;  %3237 = vrot.lane.b32.xlu1 %v3226_v38, %s7169_s24  ;;  %v2438_v59 = vmul.f32 %v6397_v24, %v2432_v44  ;;  %v2762_v38 = vmul.f32 %v6608_v26, %v6201_v37  ;;  %v3266_v37 = vmul.f32 %v7195_v27, %v6479_v47 }
 0x3c4   : > { %v6567_v13 = vpop.permute.xlu2 %2723  ;;  %v2660_v4 = vpop.permute.xlu0 %2659  ;;  %v2455_v32 = vrot.slane %v2440_v61, 2 }
 0x3c5   : > { %v6571_v56 = vpop.permute.xlu1 %2661  ;;  %v6575_v17 = vadd.f32 %v6500_v16, %v2351_v9  ;;  %v3045_v16 = vsel %vm1236_vm8, %v3038_v8, %v3044_v30  ;;  %v6623_v30 = vmul.f32 %v6389_v2, %v6608_v26  ;;  %v2776_v53 = vrot.slane %v2762_v38, 3 }
 0x3c6   : > { %v2667_v11 = vsel %vm2039_vm5, %v2660_v4, %v6571_v56  ;;  %v3294_v4 = vsel %vm1426_vm13, %v3285_v54, %v3293_v18  ;;  %v3284_v35 = vrot.slane %v3266_v37, 4 }
 0x3c7   : > { %v2675_v23 = vadd.f32 %v2667_v11, %v6371_v50  ;;  %v3197_v50 = vmul.f32 %v3192_v6, %v6510_v29  ;;  %v3270_v6 = vmul.f32 %v6397_v24, %v3262_v57  ;;  %v3015_v11 = vmul.f32 %v5909_v34, %v6405_v25 }
 0x3c8   : > { %v2771_v25 = vrot.slane %v6623_v30, 3 }
 0x3c9   : > { %v3217_v22 = vrot.slane %v3197_v50, 4  ;;  %v3288_v28 = vrot.slane %v3270_v6, 4  ;;  %v3037_v40 = vrot.slane %v3015_v11, 3  ;;  %v7197_v6 = vld [vmem:[#allocation31_spill] sm:$0xff] }
 0x3ca   : > { %2980 = vrot.lane.b32.xlu2 %v2969_v0, %s4405_s13  ;;  %3056 = vrot.lane.b32.xlu0 %v3045_v16, %s4404_s26  ;;  %v3267_v0 = vmul.f32 %v3262_v57, %v6510_v29  ;;  %v3332_v61 = vsel %vm634_vm0, %v7198_v55, %v7197_v6 }
 0x3cb   : > { %3229 = vrot.lane.b32.xlu1 %v3216_v21, %s7169_s24  ;;  %v3219_v9 = vsel %vm1426_vm13, %v3217_v22, %v3218_v63  ;;  %v3296_v52 = vsel %vm1426_vm13, %v3288_v28, %v3295_v60  ;;  %v3339_v60 = vmul.f32 %v6389_v2, %v7198_v55  ;;  %v3286_v22 = vsel %vm1426_vm13, %v3284_v35, %v3285_v54 }
 0x3cc   : > { %v2594_v15 = vpop.permute.xlu2 %2593  ;;  %v2654_v46 = vpop.permute.xlu0 %2653  ;;  %v3287_v18 = vrot.slane %v3267_v0, 4 }
 0x3cd   : > { %v2598_v10 = vsel %vm839_vm12, %v6367_v1, %v2594_v15  ;;  %v6605_v43 = vpop.permute.xlu1 %2655  ;;  %v2436_v15 = vmul.f32 %v4026_v51, %v2432_v44 }
 0x3ce   : > { %v2665_v58 = vsel %vm2039_vm5, %v2654_v46, %v6605_v43  ;;  %v3289_v38 = vsel %vm1426_vm13, %v3287_v18, %v3288_v28 }
 0x3cf   : > { %v6614_v1 = vadd.f32 %v2665_v58, %v6402_v39  ;;  %v2451_v39 = vrot.slane %v2438_v59, 2  ;;  %v3343_v59 = vmul.f32 %v3332_v61, %v6421_v33  ;;  %v2450_v20 = vrot.slane %v2436_v15, 2 }
 0x3d1   : > { %v2456_v16 = vsel %vm1046_vm7, %v2451_v39, %v2455_v32 }
 0x3d2   : > { %3231 = vrot.lane.b32.xlu2 %v3219_v9, %s7169_s24  ;;  %3305 = vrot.lane.b32.xlu0 %v3294_v4, %s4405_s13  ;;  %v2464_v21 = vadd.f32 %v2456_v16, %v6544_v48  ;;  %v6646_v48 = vld [vmem:[#allocation3 + $0x40] sm:$0xf]  ;;  %v6664_v9 = vld [vmem:[#allocation3 + $0x28] sm:$0xff]  ;;  %v2452_v4 = vsel %vm1046_vm7, %v2450_v20, %v2451_v39  ;;  %v3365_v16 = vrot.slane %v3343_v59, 4 }
 0x3d3   : > { %3307 = vrot.lane.b32.xlu1 %v3296_v52, %s4405_s13  ;;  %v3134_v32 = vmul.f32 %v5981_v45, %v6646_v48  ;;  %v2462_v37 = vadd.f32 %v2452_v4, %v6575_v17 }
 0x3d4   : > { %v2588_v63 = vpop.permute.xlu2 %2587  ;;  %v6634_v42 = vpop.permute.xlu0 %2731 }
 0x3d5   : > { %v2524_v50 = vpop.permute.xlu1 %2523  ;;  %v2737_v34 = vsel %vm634_vm0, %v6531_v3, %v6634_v42  ;;  %v2777_v3 = vsel %vm1236_vm8, %v2771_v25, %v2776_v53  ;;  %v3355_v53 = vrot.slane %v3339_v60, 4  ;;  %v2596_v51 = vsel %vm839_vm12, %v6278_v14, %v2588_v63 }
 0x3d6   : > { %v2528_v27 = vsel %vm781_vm10, %v6321_v36, %v2524_v50  ;;  %v2745_v57 = vadd.f32 %v2737_v34, %v2675_v23  ;;  %v3039_v36 = vsel %vm1236_vm8, %v3037_v40, %v3038_v8  ;;  %v3342_v23 = vmul.f32 %v7198_v55, %v6423_v7 }
 0x3d7   : > { %v2536_v46 = vadd.f32 %v2528_v27, %v2464_v21  ;;  %v3131_v8 = vmul.f32 %v6664_v9, %v5981_v45  ;;  %v3157_v34 = vrot.slane %v3134_v32, 4 }
 0x3d8   : > { %v2786_v44 = vadd.f32 %v2777_v3, %v2745_v57  ;;  %v3363_v28 = vrot.slane %v3342_v23, 4  ;;  %v3111_v57 = vld [vmem:[#allocation3 + $0x10] sm:$0xf0] }
 0x3d9   : > { %v6661_v58 = vadd.f32 %v2598_v10, %v2536_v46  ;;  %v3340_v10 = vmul.f32 %v6397_v24, %v3332_v61  ;;  %v3151_v21 = vrot.slane %v3131_v8, 4  ;;  %v3128_v46 = vmul.f32 %v5981_v45, %v3111_v57 }
 0x3da   : > { %3050 = vrot.lane.b32.xlu2 %v3039_v36, %s4404_s26  ;;  %3299 = vrot.lane.b32.xlu0 %v3286_v22, %s4405_s13  ;;  %v3364_v17 = vsel %vm1426_vm13, %v3355_v53, %v3363_v28  ;;  %v3204_v45 = vmul.f32 %v7190_v31, %v6646_v48  ;;  %v3274_v8 = vmul.f32 %v7194_v62, %v6646_v48 }
 0x3db   : > { %3301 = vrot.lane.b32.xlu1 %v3289_v38, %s4405_s13  ;;  %v3358_v40 = vrot.slane %v3340_v10, 4  ;;  %v3158_v35 = vsel %vm1426_vm13, %v3151_v21, %v3157_v34  ;;  %v3150_v59 = vrot.slane %v3128_v46, 4  ;;  %v3198_v10 = vmul.f32 %v7190_v31, %v3111_v57 }
 0x3dc   : > { %v6672_v54 = vpop.permute.xlu2 %2838  ;;  %v6676_v52 = vpop.permute.xlu0 %2725  ;;  %v3297_v34 = vrot.slane %v3274_v8, 4 }
 0x3dd   : > { %v2518_v11 = vpop.permute.xlu1 %2517  ;;  %v2735_v0 = vsel %vm634_vm0, %v6567_v13, %v6676_v52  ;;  %v3366_v13 = vsel %vm1426_vm13, %v3358_v40, %v3365_v16 }
 0x3de   : > { %v2526_v50 = vsel %vm781_vm10, %v6249_v5, %v2518_v11  ;;  %v2743_v27 = vadd.f32 %v2735_v0, %v6614_v1  ;;  %v3336_v5 = vmul.f32 %v7198_v55, %v6479_v47  ;;  %v3337_v1 = vmul.f32 %v3332_v61, %v6510_v29 }
 0x3df   : > { %v2534_v39 = vadd.f32 %v2526_v50, %v2462_v37  ;;  %v2758_v55 = vmul.f32 %v6608_v26, %v6233_v19  ;;  %v3152_v19 = vsel %vm1426_vm13, %v3150_v59, %v3151_v21  ;;  %v3227_v11 = vrot.slane %v3204_v45, 4 }
 0x3e0   : > { %v3354_v23 = vrot.slane %v3336_v5, 4  ;;  %v3357_v22 = vrot.slane %v3337_v1, 4 }
 0x3e1   : > { %v2604_v15 = vadd.f32 %v2596_v51, %v2534_v39  ;;  %v2770_v26 = vrot.slane %v2758_v55, 3 }
 0x3e2   : > { %3375 = vrot.lane.b32.xlu2 %v3364_v17, %s4404_s26  ;;  %3377 = vrot.lane.b32.xlu0 %v3366_v13, %s4404_s26  ;;  %v3356_v38 = vsel %vm1426_vm13, %v3354_v23, %v3355_v53  ;;  %v3359_v20 = vsel %vm1426_vm13, %v3357_v22, %v3358_v40  ;;  %v3220_v40 = vrot.slane %v3198_v10, 4  ;;  %v3268_v17 = vmul.f32 %v7194_v62, %v3111_v57 }
 0x3e3   : > { %3169 = vrot.lane.b32.xlu1 %v3158_v35, %s7170_s25  ;;  %v2772_v4 = vsel %vm1236_vm8, %v2770_v26, %v2771_v25  ;;  %v3341_v25 = vmul.f32 %v6664_v9, %v7197_v6  ;;  %v3338_v13 = vmul.f32 %v7197_v6, %v3111_v57  ;;  %v3075_v26 = vld [vmem:[#allocation15 + $0x24] ss:$8 sm:$0x3] }
 0x3e4   : > { %v2658_v14 = vpop.permute.xlu2 %2657  ;;  %v2843_v3 = vpop.permute.xlu0 %2842  ;;  %v2784_v0 = vadd.f32 %v2772_v4, %v2743_v27  ;;  %v6760_v4 = vperm.slane %v3075_v26, 0 }
 0x3e5   : > { %v2666_v63 = vsel %vm2039_vm5, %v6605_v43, %v2658_v14  ;;  %v6699_v18 = vpop.permute.xlu1 %2844  ;;  %v3201_v43 = vmul.f32 %v6664_v9, %v7190_v31  ;;  %v3361_v1 = vrot.slane %v3341_v25, 4 }
 0x3e6   : > { %v2674_v36 = vadd.f32 %v2666_v63, %v2604_v15  ;;  %v2850_v60 = vsel %vm781_vm10, %v2843_v3, %v6699_v18 }
 0x3e7   : > { %v2858_v61 = vadd.f32 %v2850_v60, %v2786_v44  ;;  %v3271_v44 = vmul.f32 %v6664_v9, %v7194_v62  ;;  %v3221_v28 = vrot.slane %v3201_v43, 4  ;;  %v3360_v62 = vrot.slane %v3338_v13, 4 }
 0x3e9   : > { %v3291_v21 = vrot.slane %v3271_v44, 4  ;;  %v3228_v30 = vsel %vm1426_vm13, %v3221_v28, %v3227_v11  ;;  %v3222_v27 = vsel %vm1426_vm13, %v3220_v40, %v3221_v28 }
 0x3ea   : > { %3369 = vrot.lane.b32.xlu2 %v3356_v38, %s4404_s26  ;;  %3371 = vrot.lane.b32.xlu0 %v3359_v20, %s4404_s26 }
 0x3eb   : > { %3163 = vrot.lane.b32.xlu1 %v3152_v19, %s7170_s25  ;;  %v3298_v51 = vsel %vm1426_vm13, %v3291_v21, %v3297_v34  ;;  %v2755_v19 = vperm.slane %v6597_v49, 1  ;;  %v6770_v49 = vmul.f32 %v6389_v2, %v6760_v4 }
 0x3ec   : > { %v6719_v32 = vpop.permute.xlu2 %2908  ;;  %v2664_v37 = vpop.permute.xlu0 %2663 }
 0x3ed   : > { %v2837_v53 = vpop.permute.xlu1 %2836  ;;  %v2668_v16 = vsel %vm2039_vm5, %v6571_v56, %v2664_v37  ;;  %v3344_v56 = vmul.f32 %v7197_v6, %v6646_v48  ;;  %v3290_v48 = vrot.slane %v3268_v17, 4  ;;  %v2763_v8 = vmul.f32 %v2755_v19, %v6203_v41 }
 0x3ee   : > { %v2848_v50 = vsel %vm781_vm10, %v2837_v53, %v6672_v54  ;;  %v2676_v39 = vadd.f32 %v2668_v16, %v6661_v58  ;;  %v2761_v28 = vmul.f32 %v6397_v24, %v2755_v19  ;;  %v3085_v53 = vmul.f32 %v6760_v4, %v6423_v7 }
 0x3ef   : > { %v2856_v31 = vadd.f32 %v2848_v50, %v2784_v0  ;;  %v3367_v14 = vrot.slane %v3344_v56, 4  ;;  %v3292_v3 = vsel %vm1426_vm13, %v3290_v48, %v3291_v21  ;;  %v2778_v0 = vrot.slane %v2763_v8, 3 }
 0x3f0   : > { %v2774_v16 = vrot.slane %v2761_v28, 3  ;;  %v3099_v50 = vrot.slane %v3085_v53, 4  ;;  %v2759_v25 = vmul.f32 %v2755_v19, %v6259_v12 }
 0x3f1   : > { %v3368_v23 = vsel %vm1426_vm13, %v3361_v1, %v3367_v14 }
 0x3f2   : > { %3239 = vrot.lane.b32.xlu2 %v3228_v30, %s7169_s24  ;;  %3233 = vrot.lane.b32.xlu0 %v3222_v27, %s7169_s24  ;;  %v2779_v21 = vsel %vm1236_vm8, %v2774_v16, %v2778_v0  ;;  %v3094_v30 = vrot.slane %v6770_v49, 4  ;;  %v3512_v49 = vld [vmem:[%s7200_s17 + $0x78] sm:$0xff]  ;;  %s4314_s24 = scalar_lea.hbm %s4313_s20, 8 }
 0x3f3   : > { %3309 = vrot.lane.b32.xlu1 %v3298_v51, %s4405_s13  ;;  %3529 = vmatpush.msra.mxu2 %v3512_v49  ;;  %v3576_v49 = vld [vmem:[%s7201_s12 + $0x38] sm:$0xff]  ;;  %p4315_p1 = scmp.ne.s32.totalorder %s4313_s20, %s4314_s24 }
 0x3f4   : > { %v2728_v58 = vpop.permute.xlu2 %2727  ;;  %v2913_v9 = vpop.permute.xlu0 %2912  ;;  %v3100_v56 = vsel %vm1426_vm13, %v3094_v30, %v3099_v50  ;;  %v3081_v50 = vmul.f32 %v6760_v4, %v6479_v47 }
 0x3f5   : > { %v2736_v15 = vsel %vm634_vm0, %v6676_v52, %v2728_v58  ;;  %v2915_v5 = vpop.permute.xlu1 %2914  ;;  %v3362_v52 = vsel %vm1426_vm13, %v3360_v62, %v3361_v1  ;;  %p4316_p3 = pnand %p4315_p1, %p4597_p4 }
 0x3f6   : > { %v2744_v35 = vadd.f32 %v2736_v15, %v2674_v36  ;;  %v2920_v63 = vsel %vm839_vm12, %v2913_v9, %v2915_v5  ;;  %v2773_v15 = vrot.slane %v2759_v25, 3  ;;  %v3093_v25 = vrot.slane %v3081_v50, 4  ;;  %v3581_v50 = vld [vmem:[%s7201_s12 + $0x60] sm:$0xff] }
 0x3f7   : > { %v2928_v46 = vadd.f32 %v2920_v63, %v2858_v61  ;;  %p4317_p5 = pneg %p4316_p3 }
 0x3f8   : > { %v2775_v9 = vsel %vm1236_vm8, %v2773_v15, %v2774_v16  ;;  %v3095_v4 = vsel %vm1426_vm13, %v3093_v25, %v3094_v30 }
 0x3fa   : > { %3303 = vrot.lane.b32.xlu2 %v3292_v3, %s4405_s13  ;;  %3379 = vrot.lane.b32.xlu0 %v3368_v23, %s4404_s26 }
 0x3fb   : > { %3373 = vrot.lane.b32.xlu1 %v3362_v52, %s4404_s26  ;;  %s3829_s26 = sshll.u32 %s4631_s23, 3 }
 0x3fc   : > { %v3053_v6 = vpop.permute.xlu2 %3052  ;;  %v2734_v57 = vpop.permute.xlu0 %2733  ;;  %s609_s9 = scalar_lea.vmem [#allocation19], %s3829_s26  ;;  %s4318_s26 = scalar_lea.hbm %s7202_s19, 16 }
 0x3fd   : > { %v2907_v36 = vpop.permute.xlu1 %2906  ;;  %v2738_v55 = vsel %vm634_vm0, %v6634_v42, %v2734_v57  ;;  %s3656_s1 = sshll.u32 %s609_s9, 4  ;;  %p4320_p7 = scmp.lt.s32.totalorder %s4318_s26, %s4314_s24  ;;  %s3657_s1 = int_to_ptr.vmem [resolvable:$true] %s3656_s1 }
 0x3fe   : > { %v2918_v60 = vsel %vm839_vm12, %v2907_v36, %v6719_v32  ;;  %v2746_v61 = vadd.f32 %v2738_v55, %v2676_v39 }
 0x3ff   : > { %v2926_v22 = vadd.f32 %v2918_v60, %v2856_v31  ;;  %p4321_p8 = por %p4320_p7, %p4319_p12 }
 0x400   : > { %v2787_v31 = vadd.f32 %v2779_v21, %v2746_v61 }
 0x401   : > { %p4322_p9 = pnand %p4321_p8, %p4317_p5 }
 0x404   : > { %v6755_v59 = vpop.permute.xlu2 %3046  ;;  %v2983_v38 = vpop.permute.xlu0 %2982 }
 0x405   : > { %v2985_v43 = vpop.permute.xlu1 %2984 }
 0x406   : > { %v2990_v45 = vsel %vm2039_vm5, %v2983_v38, %v2985_v43  ;;  %v3078_v38 = vperm.slane %v3075_v26, 1 }
 0x407   : > { %v2998_v20 = vadd.f32 %v2990_v45, %v2928_v46 }
 0x408   : > { %v3086_v45 = vmul.f32 %v3078_v38, %v6421_v33 }
 0x40a   : > { %v3101_v19 = vrot.slane %v3086_v45, 4 }
 0x40c   : > { %v2917_v44 = vpop.permute.xlu2 %2916  ;;  %v2977_v10 = vpop.permute.xlu0 %2976 }
 0x40d   : > { %v2979_v42 = vpop.permute.xlu1 %2978  ;;  %v2921_v51 = vsel %vm839_vm12, %v2915_v5, %v2917_v44 }
 0x40e   : > { %v2988_v11 = vsel %vm2039_vm5, %v2977_v10, %v2979_v42 }
 0x40f   : > { %v6764_v37 = vadd.f32 %v2988_v11, %v2926_v22 }
 0x414   : > { %v2911_v41 = vpop.permute.xlu2 %2910  ;;  %v3055_v34 = vpop.permute.xlu0 %3054 }
 0x415   : > { %v2847_v39 = vpop.permute.xlu1 %2846  ;;  %v3060_v40 = vsel %vm634_vm0, %v3053_v6, %v3055_v34  ;;  %v2919_v63 = vsel %vm839_vm12, %v6719_v32, %v2911_v41 }
 0x416   : > { %v2851_v7 = vsel %vm781_vm10, %v6699_v18, %v2847_v39  ;;  %v3068_v27 = vadd.f32 %v3060_v40, %v2998_v20  ;;  %v2785_v18 = vadd.f32 %v2775_v9, %v2744_v35  ;;  %v6800_v20 = vmul.f32 %v6397_v24, %v3078_v38 }
 0x417   : > { %v2859_v2 = vadd.f32 %v2851_v7, %v2787_v31  ;;  %v6823_v31 = vld [vmem:[%s7199_s2] sm:$0x3] }
 0x418   : > { %v3109_v17 = vadd.f32 %v3100_v56, %v3068_v27  ;;  %v3097_v10 = vrot.slane %v6800_v20, 4  ;;  %v3395_v47 = vperm.slane %v6823_v31, 0  ;;  %v3583_v20 = vld [vmem:[%s7201_s12 + $0x70] sm:$0xff] }
 0x419   : > { %v2929_v58 = vadd.f32 %v2921_v51, %v2859_v2 }
 0x41a   : > { %v3102_v28 = vsel %vm1426_vm13, %v3097_v10, %v3101_v19  ;;  %v6864_v19 = vld [vmem:[#allocation16] sm:$0xff] }
 0x41c   : > { %v6782_v13 = vpop.permute.xlu2 %3161  ;;  %v3049_v1 = vpop.permute.xlu0 %3048 }
 0x41d   : > { %v2841_v14 = vpop.permute.xlu1 %2840  ;;  %v3058_v41 = vsel %vm634_vm0, %v6755_v59, %v3049_v1 }
 0x41e   : > { %v2849_v12 = vsel %vm781_vm10, %v6672_v54, %v2841_v14  ;;  %v3066_v40 = vadd.f32 %v3058_v41, %v6764_v37 }
 0x41f   : > { %v2857_v48 = vadd.f32 %v2849_v12, %v2785_v18  ;;  %v3511_v18 = vld [vmem:[%s7200_s17 + $0x70] sm:$0xff] }
 0x420   : > { %v3107_v37 = vadd.f32 %v3095_v4, %v3066_v40  ;;  %3530 = vmatpush.msra.mxu2 %v3511_v18  ;;  %v3575_v18 = vld [vmem:[%s7201_s12 + $0x30] sm:$0xff] }
 0x421   : > { %v2927_v46 = vadd.f32 %v2919_v63, %v2857_v48 }
 0x424   : > { %v2981_v62 = vpop.permute.xlu2 %2980  ;;  %v3166_v3 = vpop.permute.xlu0 %3165 }
 0x425   : > { %v2989_v5 = vsel %vm2039_vm5, %v2979_v42, %v2981_v62  ;;  %v3168_v23 = vpop.permute.xlu1 %3167 }
 0x426   : > { %v2997_v52 = vadd.f32 %v2989_v5, %v2927_v46  ;;  %v3173_v24 = vsel %vm781_vm10, %v3166_v3, %v3168_v23  ;;  %v3510_v46 = vld [vmem:[%s7200_s17 + $0x68] sm:$0xff]  ;;  %v3509_v3 = vld [vmem:[%s7200_s17 + $0x60] sm:$0xff] }
 0x427   : > { %3531 = vmatpush.msra.mxu2 %v3510_v46  ;;  %v3525_v46 = vld [vmem:[%s7200_s17 + $0xe0] sm:$0xff] }
 0x429   : > { %3532 = vmatpush.msra.mxu2 %v3509_v3  ;;  %v3596_v3 = vld [vmem:[%s7201_s12 + $0xd8] sm:$0xff] }
 0x42c   : > { %v6790_v6 = vpop.permute.xlu2 %3231  ;;  %v2987_v57 = vpop.permute.xlu0 %2986 }
 0x42d   : > { %v3160_v36 = vpop.permute.xlu1 %3159  ;;  %v2991_v35 = vsel %vm2039_vm5, %v2985_v43, %v2987_v57  ;;  %v3082_v57 = vmul.f32 %v3078_v38, %v6510_v29  ;;  %v3584_v29 = vld [vmem:[%s7201_s12 + $0x78] sm:$0xff]  ;;  %v3506_v38 = vld [vmem:[%s7200_s17 + $0x48] sm:$0xff] }
 0x42e   : > { %v2999_v55 = vadd.f32 %v2991_v35, %v2929_v58  ;;  %v3171_v2 = vsel %vm781_vm10, %v3160_v36, %v6782_v13  ;;  %v3508_v35 = vld [vmem:[%s7200_s17 + $0x58] sm:$0xff] }
 0x42f   : > { %v3179_v30 = vadd.f32 %v3171_v2, %v3107_v37  ;;  %3533 = vmatpush.msra.mxu2 %v3508_v35  ;;  %v3579_v2 = vld [vmem:[%s7201_s12 + $0x50] sm:$0xff]  ;;  %v3521_v35 = vld [vmem:[%s7200_s17 + $0xc0] sm:$0xff] }
 0x434   : > { %v3051_v60 = vpop.permute.xlu2 %3050  ;;  %v3236_v61 = vpop.permute.xlu0 %3235 }
 0x435   : > { %v3059_v54 = vsel %vm634_vm0, %v3049_v1, %v3051_v60  ;;  %v6794_v22 = vpop.permute.xlu1 %3237 }
 0x436   : > { %v6796_v32 = vadd.f32 %v3059_v54, %v2997_v52  ;;  %v3243_v21 = vsel %vm839_vm12, %v3236_v61, %v6794_v22  ;;  %v3507_v54 = vld [vmem:[%s7200_s17 + $0x50] sm:$0xff]  ;;  %v3096_v61 = vrot.slane %v3082_v57, 4  ;;  %v3522_v57 = vld [vmem:[%s7200_s17 + $0xc8] sm:$0xff] }
 0x437   : > { %3534 = vmatpush.msra.mxu2 %v3507_v54  ;;  %v3592_v54 = vld [vmem:[%s7201_s12 + $0xb8] sm:$0xff] }
 0x439   : > { %3535 = vmatpush.msra.mxu2 %v3506_v38  ;;  %v3573_v38 = vld [vmem:[%s7201_s12 + $0x20] sm:$0xff] }
 0x43c   : > { %v3057_v44 = vpop.permute.xlu0 %3056  ;;  %v3376_v33 = vpop.permute.xlu2 %3375 }
 0x43d   : > { %v3230_v8 = vpop.permute.xlu1 %3229  ;;  %v3061_v43 = vsel %vm634_vm0, %v3055_v34, %v3057_v44  ;;  %v3181_v34 = vadd.f32 %v3173_v24, %v3109_v17  ;;  %v6866_v44 = vld [vmem:[#allocation18] sm:$0xff] }
 0x43e   : > { %v3069_v42 = vadd.f32 %v3061_v43, %v2999_v55  ;;  %v3241_v9 = vsel %vm839_vm12, %v3230_v8, %v6790_v6  ;;  %v3098_v8 = vsel %vm1426_vm13, %v3096_v61, %v3097_v10  ;;  %v3519_v61 = vld [vmem:[%s7200_s17 + $0xb0] sm:$0xff] }
 0x43f   : > { %v3251_v7 = vadd.f32 %v3243_v21, %v3181_v34  ;;  %v3249_v48 = vadd.f32 %v3241_v9, %v3179_v30  ;;  %v3503_v21 = vld [vmem:[%s7200_s17 + $0x30] sm:$0xff]  ;;  %v3528_v9 = vld [vmem:[%s7200_s17 + $0xf8] sm:$0xff] }
 0x440   : > { %v3110_v11 = vadd.f32 %v3102_v28, %v3069_v42  ;;  %v3108_v28 = vadd.f32 %v3098_v8, %v6796_v32  ;;  %v3527_v30 = vld [vmem:[%s7200_s17 + $0xf0] sm:$0xff]  ;;  %v3517_v8 = vld [vmem:[%s7200_s17 + $0xa0] sm:$0xff] }
 0x444   : > { %v3306_v53 = vpop.permute.xlu0 %3305  ;;  %v3370_v56 = vpop.permute.xlu2 %3369 }
 0x445   : > { %v6807_v26 = vpop.permute.xlu1 %3307 }
 0x446   : > { %v3313_v39 = vsel %vm2039_vm5, %v3306_v53, %v6807_v26  ;;  %v3582_v53 = vld [vmem:[%s7201_s12 + $0x68] sm:$0xff] }
 0x447   : > { %v3321_v59 = vadd.f32 %v3313_v39, %v3251_v7  ;;  %v3396_v7 = vperm.slane %v6823_v31, 1  ;;  %v3578_v31 = vld [vmem:[%s7201_s12 + $0x48] sm:$0xff] }
 0x44c   : > { %v3300_v0 = vpop.permute.xlu0 %3299  ;;  %v3240_v55 = vpop.permute.xlu2 %3239 }
 0x44d   : > { %v6810_v16 = vpop.permute.xlu1 %3301 }
 0x44e   : > { %v3311_v12 = vsel %vm2039_vm5, %v3300_v0, %v6810_v16  ;;  %v3244_v0 = vsel %vm839_vm12, %v6794_v22, %v3240_v55  ;;  %v3580_v22 = vld [vmem:[%s7201_s12 + $0x58] sm:$0xff]  ;;  %v3593_v55 = vld [vmem:[%s7201_s12 + $0xc0] sm:$0xff] }
 0x44f   : > { %v3319_v62 = vadd.f32 %v3311_v12, %v3249_v48  ;;  %v3526_v12 = vld [vmem:[%s7200_s17 + $0xe8] sm:$0xff] }
 0x450   : > { %v3598_v48 = vld [vmem:[%s7201_s12 + $0xe8] sm:$0xff] }
 0x454   : > { %v6826_v27 = vpop.permute.xlu0 %3377  ;;  %v3304_v24 = vpop.permute.xlu2 %3303 }
 0x455   : > { %v3170_v51 = vpop.permute.xlu1 %3169  ;;  %v3383_v17 = vsel %vm634_vm0, %v3376_v33, %v6826_v27  ;;  %v3504_v33 = vld [vmem:[%s7200_s17 + $0x38] sm:$0xff]  ;;  %v3312_v39 = vsel %vm2039_vm5, %v6810_v16, %v3304_v24  ;;  %v3514_v24 = vld [vmem:[%s7200_s17 + $0x88] sm:$0xff] }
 0x456   : > { %v3174_v58 = vsel %vm781_vm10, %v3168_v23, %v3170_v51  ;;  %v3391_v15 = vadd.f32 %v3383_v17, %v3321_v59 }
 0x457   : > { %v3182_v1 = vadd.f32 %v3174_v58, %v3110_v11 }
 0x458   : > { %v3401_v14 = vadd.f32 %v3395_v47, %v3391_v15 }
 0x459   : > { %v3252_v34 = vadd.f32 %v3244_v0, %v3182_v1  ;;  %v3600_v1 = vld [vmem:[%s7201_s12 + $0xf8] sm:$0xff]  ;;  %v3570_v0 = vld [vmem:[%s7201_s12 + $0x8] sm:$0xff] }
 0x45a   : > { %v3405_v63 = vmax.f32 %v3401_v14, 0.0  ;;  %v3599_v14 = vld [vmem:[%s7201_s12 + $0xf0] sm:$0xff] }
 0x45c   : > { %v6850_v5 = vpop.permute.xlu0 %3371  ;;  %3425 = vmatpush.msrb.mxu3 %v3405_v63  ;;  %3469 = vmatpush.msra.mxu0 %v3405_v63  ;;  %v3574_v63 = vld [vmem:[%s7201_s12 + $0x28] sm:$0xff] }
 0x45d   : > { %v3164_v23 = vpop.permute.xlu1 %3163  ;;  %v3381_v52 = vsel %vm634_vm0, %v3370_v56, %v6850_v5 }
 0x45e   : > { %v3389_v36 = vadd.f32 %v3381_v52, %v3319_v62  ;;  %v3172_v43 = vsel %vm781_vm10, %v6782_v13, %v3164_v23  ;;  %v3505_v13 = vld [vmem:[%s7200_s17 + $0x40] sm:$0xff]  ;;  %v3523_v23 = vld [vmem:[%s7200_s17 + $0xd0] sm:$0xff] }
 0x45f   : > { %v3180_v32 = vadd.f32 %v3172_v43, %v3108_v28  ;;  %3536 = vmatpush.msra.mxu2 %v3505_v13  ;;  %v3597_v62 = vld [vmem:[%s7201_s12 + $0xe0] sm:$0xff]  ;;  %v3595_v52 = vld [vmem:[%s7201_s12 + $0xd0] sm:$0xff]  ;;  %v3572_v28 = vld [vmem:[%s7201_s12 + $0x18] sm:$0xff] }
 0x460   : > { %v3399_v60 = vadd.f32 %v3395_v47, %v3389_v36  ;;  %v3594_v36 = vld [vmem:[%s7201_s12 + $0xc8] sm:$0xff]  ;;  %v3589_v43 = vld [vmem:[%s7201_s12 + $0xa0] sm:$0xff]  ;;  %v3499_v13 = vld [vmem:[%s7200_s17 + $0x10] sm:$0xff] }
 0x461   : > { %3537 = vmatpush.msra.mxu2 %v3504_v33  ;;  %v3498_v33 = vld [vmem:[%s7200_s17 + $0x8] sm:$0xff] }
 0x462   : > { %v3403_v45 = vmax.f32 %v3399_v60, 0.0  ;;  %v3520_v60 = vld [vmem:[%s7200_s17 + $0xb8] sm:$0xff] }
 0x463   : > { %3538 = vmatpush.msra.mxu2 %v3503_v21  ;;  %v3513_v21 = vld [vmem:[%s7200_s17 + $0x80] sm:$0xff] }
 0x464   : > { %v3234_v42 = vpop.permute.xlu0 %3233  ;;  %3426 = vmatpush.msrb.mxu3 %v3403_v45  ;;  %3470 = vmatpush.msra.mxu0 %v3403_v45  ;;  %v3591_v45 = vld [vmem:[%s7201_s12 + $0xb0] sm:$0xff] }
 0x465   : > { %v3310_v11 = vpop.permute.xlu1 %3309  ;;  %3840 = vmatmul.msk.f32.vlgmr.msrb.gmra.mxu3 %vm1911_vm15, %v6864_v19  ;;  %3842 = vmatmul.msk.f32.vlgmr.msra.gmra.mxu0 %vm1911_vm15, %v6866_v44  ;;  %v3242_v10 = vsel %vm839_vm12, %v6790_v6, %v3234_v42  ;;  %v3500_v42 = vld [vmem:[%s7200_s17 + $0x18] sm:$0xff] }
 0x466   : > { %3601 = vmatpush.msrb.mxu0 %v3584_v29  ;;  %v3314_v6 = vsel %vm2039_vm5, %v6807_v26, %v3310_v11  ;;  %v3250_v41 = vadd.f32 %v3242_v10, %v3180_v32  ;;  %v3502_v26 = vld [vmem:[%s7200_s17 + $0x28] sm:$0xff]  ;;  %v3501_v29 = vld [vmem:[%s7200_s17 + $0x20] sm:$0xff]  ;;  %v3516_v11 = vld [vmem:[%s7200_s17 + $0x98] sm:$0xff] }
 0x467   : > { %v3322_v40 = vadd.f32 %v3314_v6, %v3252_v34  ;;  %3539 = vmatpush.msra.mxu2 %v3502_v26  ;;  %v3571_v10 = vld [vmem:[%s7201_s12 + $0x10] sm:$0xff]  ;;  %v3586_v6 = vld [vmem:[%s7201_s12 + $0x88] sm:$0xff]  ;;  %v3585_v34 = vld [vmem:[%s7201_s12 + $0x80] sm:$0xff] }
 0x468   : > { %3602 = vmatpush.msrb.mxu0 %v3583_v20  ;;  %v3320_v47 = vadd.f32 %v3312_v39, %v3250_v41  ;;  %v3588_v20 = vld [vmem:[%s7201_s12 + $0x98] sm:$0xff]  ;;  %v3515_v32 = vld [vmem:[%s7200_s17 + $0x90] sm:$0xff]  ;;  %v3497_v41 = vld [vmem:[%s7200_s17] sm:$0xff] }
 0x469   : > { %3540 = vmatpush.msra.mxu2 %v3501_v29 }
 0x46a   : > { %3603 = vmatpush.msrb.mxu0 %v3582_v53  ;;  %v3587_v53 = vld [vmem:[%s7201_s12 + $0x90] sm:$0xff] }
 0x46b   : > { %3541 = vmatpush.msra.mxu2 %v3500_v42 }
 0x46c   : > { %v3380_v25 = vpop.permute.xlu0 %3379  ;;  %3604 = vmatpush.msrb.mxu0 %v3581_v50  ;;  %v3569_v50 = vld [vmem:[%s7201_s12] sm:$0xff] }
 0x46d   : > { %v3374_v59 = vpop.permute.xlu1 %3373  ;;  %v3384_v4 = vsel %vm634_vm0, %v6826_v27, %v3380_v25  ;;  %v3577_v27 = vld [vmem:[%s7201_s12 + $0x40] sm:$0xff]  ;;  %3542 = vmatpush.msra.mxu2 %v3499_v13 }
 0x46e   : > { %v3382_v56 = vsel %vm634_vm0, %v6850_v5, %v3374_v59  ;;  %v3392_v51 = vadd.f32 %v3384_v4, %v3322_v40  ;;  %3605 = vmatpush.msrb.mxu0 %v3580_v22  ;;  %v3524_v5 = vld [vmem:[%s7200_s17 + $0xd8] sm:$0xff] }
 0x46f   : > { %v3390_v16 = vadd.f32 %v3382_v56, %v3320_v47  ;;  %3543 = vmatpush.msra.mxu2 %v3498_v33 }
 0x470   : > { %v3402_v17 = vadd.f32 %v3396_v7, %v3392_v51  ;;  %3606 = vmatpush.msrb.mxu0 %v3579_v2 }
 0x471   : > { %v3400_v37 = vadd.f32 %v3396_v7, %v3390_v16  ;;  %3544 = vmatpush.msra.mxu2 %v3497_v41 }
 0x472   : > { %v3406_v58 = vmax.f32 %v3402_v17, 0.0  ;;  %3607 = vmatpush.msrb.mxu0 %v3578_v31 }
 0x473   : > { %v3404_v15 = vmax.f32 %v3400_v37, 0.0 }
 0x474   : > { %3445 = vmatpush.msra.mxu3 %v3406_v58  ;;  %3489 = vmatpush.msrb.mxu1 %v3406_v58 }
 0x475   : > { %3608 = vmatpush.msrb.mxu0 %v3577_v27 }
 0x476   : > { %3446 = vmatpush.msra.mxu3 %v3404_v15  ;;  %3490 = vmatpush.msrb.mxu1 %v3404_v15 }
 0x477   : > { %3841 = vmatmul.msk.f32.vlgmr.msra.gmra.mxu3 %vm1911_vm15, %v6864_v19  ;;  %3843 = vmatmul.msk.f32.vlgmr.msrb.gmra.mxu1 %vm1911_vm15, %v6866_v44  ;;  %v3518_v19 = vld [vmem:[%s7200_s17 + $0xa8] sm:$0xff] }
 0x478   : > { %3549 = vmatpush.msrb.mxu3 %v3528_v9  ;;  %3621 = vmatpush.msra.mxu1 %v3600_v1  ;;  %v3590_v44 = vld [vmem:[%s7201_s12 + $0xa8] sm:$0xff] }
 0x479   : > { %3609 = vmatpush.msrb.mxu0 %v3576_v49 }
 0x47a   : > { %3550 = vmatpush.msrb.mxu3 %v3527_v30  ;;  %3622 = vmatpush.msra.mxu1 %v3599_v14 }
 0x47b   : > { %3610 = vmatpush.msrb.mxu0 %v3575_v18 }
 0x47c   : > { %3551 = vmatpush.msrb.mxu3 %v3526_v12  ;;  %3623 = vmatpush.msra.mxu1 %v3598_v48 }
 0x47d   : > { %3611 = vmatpush.msrb.mxu0 %v3574_v63 }
 0x47e   : > { %3552 = vmatpush.msrb.mxu3 %v3525_v46  ;;  %3624 = vmatpush.msra.mxu1 %v3597_v62 }
 0x47f   : > { %3612 = vmatpush.msrb.mxu0 %v3573_v38 }
 0x480   : > { %3553 = vmatpush.msrb.mxu3 %v3524_v5  ;;  %3625 = vmatpush.msra.mxu1 %v3596_v3 }
 0x481   : > { %3613 = vmatpush.msrb.mxu0 %v3572_v28 }
 0x482   : > { %3554 = vmatpush.msrb.mxu3 %v3523_v23  ;;  %3626 = vmatpush.msra.mxu1 %v3595_v52 }
 0x483   : > { %3614 = vmatpush.msrb.mxu0 %v3571_v10 }
 0x484   : > { %3555 = vmatpush.msrb.mxu3 %v3522_v57  ;;  %3627 = vmatpush.msra.mxu1 %v3594_v36 }
 0x485   : > { %3615 = vmatpush.msrb.mxu0 %v3570_v0 }
 0x486   : > { %3556 = vmatpush.msrb.mxu3 %v3521_v35  ;;  %3628 = vmatpush.msra.mxu1 %v3593_v55 }
 0x487   : > { %3616 = vmatpush.msrb.mxu0 %v3569_v50 }
 0x488   : > { %3557 = vmatpush.msrb.mxu3 %v3520_v60  ;;  %3629 = vmatpush.msra.mxu1 %v3592_v54 }
 0x48a   : > { %3558 = vmatpush.msrb.mxu3 %v3519_v61  ;;  %3630 = vmatpush.msra.mxu1 %v3591_v45 }
 0x48c   : > { %3559 = vmatpush.msrb.mxu3 %v3518_v19  ;;  %3631 = vmatpush.msra.mxu1 %v3590_v44 }
 0x48e   : > { %3560 = vmatpush.msrb.mxu3 %v3517_v8  ;;  %3632 = vmatpush.msra.mxu1 %v3589_v43 }
 0x490   : > { %3561 = vmatpush.msrb.mxu3 %v3516_v11  ;;  %3633 = vmatpush.msra.mxu1 %v3588_v20 }
 0x492   : > { %3562 = vmatpush.msrb.mxu3 %v3515_v32  ;;  %3634 = vmatpush.msra.mxu1 %v3587_v53 }
 0x494   : > { %3563 = vmatpush.msrb.mxu3 %v3514_v24  ;;  %3635 = vmatpush.msra.mxu1 %v3586_v6 }
 0x496   : > { %3564 = vmatpush.msrb.mxu3 %v3513_v21  ;;  %3636 = vmatpush.msra.mxu1 %v3585_v34 }
 0x4e2   : > { %v3472_v22 = vpop.f32.mrf.mxu0 }
 0x4e8   : > { %v3428_v26 = vpop.f32.mrf.mxu3 }
 0x4e9   : > { %v3495_v39 = vmax.f32 %v3428_v26, %v3472_v22 }
 0x4eb   : > { %3545 = vmatmul.f32.vlgmr.msra.gmra.mxu2 %v3495_v39  ;;  %3617 = vmatmul.f32.vlgmr.msrb.gmra.mxu0 %v3495_v39 }
 0x4f4   : > { %v3492_v40 = vpop.f32.mrf.mxu1 }
 0x4fa   : > { %v3448_v7 = vpop.f32.mrf.mxu3 }
 0x4fb   : > { %v3496_v25 = vmax.f32 %v3448_v7, %v3492_v40 }
 0x4fd   : > { %3565 = vmatmul.f32.vlgmr.msrb.gmra.mxu3 %v3496_v25  ;;  %3637 = vmatmul.f32.vlgmr.msra.gmra.mxu1 %v3496_v25 }
 0x568   : > { %v3618_v47 = vpop.f32.mrf.mxu0 }
 0x56e   : > { %v3546_v4 = vpop.f32.mrf.mxu2 }
 0x57a   : > { %v3638_v59 = vpop.f32.mrf.mxu1 }
 0x57b   : > { %v3639_v56 = vadd.f32 %v3638_v59, %v3618_v47 }
 0x580   : > { %v3566_v2 = vpop.f32.mrf.mxu3 }
 0x581   : > { %v3567_v51 = vadd.f32 %v3566_v2, %v3546_v4 }
 0x583   : > { %v3641_v16 = vmax.f32 %v3567_v51, %v3639_v56 }
 0x585   : > { %3642 = vst [vmem:[%s609_s9] sm:$0xff] %v3641_v16 }
 0x586   : > { %4325 = shalt.err (!%p4322_p9)
}
 0x587   : > { %3883 = dma.vmem_to_hbm [thread:$0]  (%p4597_p4), %s3657_s1, 128, %s3659_s28, %s3644_s4  }
 0x588 PF: > { %s3670_s23 = sand.u32 1, %s4368_s29   ;;  %p7203_p10 = scmp.ge.s32.totalorder %s4380_s16, 2 }
 0x589   : > { %s3671_s21 = scalar_lea.sflag [#allocation6], %s3670_s23 }
 0x58a   : > { %p3915_p13 = pnand %p7203_p10, %p4601_p6 }
 0x58c   : > { %p3916_p11 = pneg %p3915_p13 }
 0x58e   : > { %4363 = dma.done.wait (%p3916_p11), %s3671_s21, 128  }
 0x58f   : > { %4365 = vsyncadd (%p3916_p11), %s3671_s21, 4294967168  ;;  %p31_p0 = scmp.ge.s32.totalorder %s4571_s18, 4   ;;  %s7204_s29 = smov %s4372_s30 }
 0x590   : > { %s7205_s30 = smov %s4376_s15  ;;  %s7206_s15 = smov %s4582_s22 }
 0x591   : > { %s7207_s16 = smov %s4571_s18  ;;  %33 = sbr.rel (!%p31_p0) target bundleno = 19 (0x13), region = 177 }
 0x596   :  { %3677 = vsyncpa [#allocation5], 1 }
 0x597   :  { %3679 = vsyncpa [#allocation5 + $0x1], 1 }
 0x598   :  { %3680 = vsyncpa [#allocation8], 1 }
 0x599   :  { %3681 = vsyncpa [#allocation11], 1 }
 0x59a   :  { %3682 = vsyncpa [#allocation14], 1 }
 0x59b   :  { %3683 = vsyncpa [#allocation17], 1 }
 0x59c   :  { %3684 = vsyncpa [#allocation6], 1 }
 0x59d   :  { %3686 = vsyncpa [#allocation6 + $0x1], 1 }

</bundles_post_ra>
